<compile_context>
chip_gen: v7x
topology: tpu7x:2x2x1
jax: 0.10.0
libtpu: 0.0.40
codegen_flags: <defaults>
</compile_context>

<pallas_src>
import functools

import jax
import jax.numpy as jnp
from jax.experimental import pallas as pl
from jax.experimental.pallas import tpu as pltpu

# ---- small BERT-like config ----
VOCAB = 100
HIDDEN = 32
N_LAYERS = 2
N_HEADS = 4
HEAD_DIM = HIDDEN // N_HEADS
INTER = 64
MAX_POS = 16
LN_EPS = 1e-12


# ---------------- fused encoder kernel (one invocation: all layers, full batch) ----------------

def _encoder_kernel(emb_ref, mask_ref, emb_ln_ref,
                    wqkv_ref, wo_ref, wi_ref, wf_ref,
                    vecs_ref, bias2_ref,
                    cls_ref, *, n_layers, n_heads, head_dim, inter, eps):
    BS, H = emb_ref.shape              # [B*S, H]
    S = mask_ref.shape[-1]
    B = BS // S
    BN = B * n_heads

    def layernorm(x, g, b):
        # f32 elementwise math (v5e has no bf16 VPU/EUP).
        mu = jnp.mean(x, axis=-1, keepdims=True)
        var = jnp.mean(jnp.square(x - mu), axis=-1, keepdims=True)
        return (x - mu) * jax.lax.rsqrt(var + eps) * g + b

    mask = mask_ref[...]                                      # [B*nH, 1, S] f32 additive bias
    emb_ln = emb_ln_ref[...]                                  # [2, H]
    x = layernorm(emb_ref[...], emb_ln[0:1, :], emb_ln[1:2, :])   # [BS, H] f32

    for l in range(n_layers):
        vecs = vecs_ref[l]                                    # [6, H] f32
        bias2 = bias2_ref[l]                                  # [2, 3H] f32
        bqkv = bias2[0:1, :]                                  # [1, 3H] (Q part pre-scaled)
        bi = bias2[1:2, 0:inter]                              # [1, INTER]
        bo, g1, b1 = vecs[0:1], vecs[1:2], vecs[2:3]
        bf, g2, b2 = vecs[3:4], vecs[4:5], vecs[5:6]

        # ---- fused QKV projection: one MXU matmul for the whole batch ----
        xb = x.astype(jnp.bfloat16)                           # hoisted cast
        qkv = jnp.dot(xb, wqkv_ref[l],
                      preferred_element_type=jnp.float32) + bqkv      # [BS, 3H] f32
        # 1/sqrt(head_dim) is folded into the Q columns of wqkv/bqkv at init.

        # ---- head-batched attention (single batched einsum per step) ----
        qkvb = qkv.astype(jnp.bfloat16)                       # single cast, then slice
        qkvb = jnp.swapaxes(qkvb.reshape(B, S, 3 * n_heads, head_dim), 1, 2)  # [B,3nH,S,D]
        q = qkvb[:, 0:n_heads].reshape(BN, S, head_dim)
        k = qkvb[:, n_heads:2 * n_heads].reshape(BN, S, head_dim)
        v = qkvb[:, 2 * n_heads:3 * n_heads].reshape(BN, S, head_dim)

        s = jnp.einsum('bqd,bkd->bqk', q, k,
                       preferred_element_type=jnp.float32) + mask      # [BN, S, S] f32
        s_max = jnp.max(s, axis=-1, keepdims=True)
        p = jnp.exp(s - s_max)
        p = p * pl.reciprocal(jnp.sum(p, axis=-1, keepdims=True), approx=True)
        ctx = jnp.einsum('bqk,bkd->bqd', p.astype(jnp.bfloat16), v,
                         preferred_element_type=jnp.float32)            # [BN, S, D] f32

        # Re-concatenate heads and apply the output projection as ONE [BS,H]@[H,H].
        ctx = jnp.swapaxes(ctx.astype(jnp.bfloat16).reshape(B, n_heads, S, head_dim),
                           1, 2).reshape(BS, H)                         # [BS, H] bf16
        attn = jnp.dot(ctx, wo_ref[l], preferred_element_type=jnp.float32)   # [BS, H]
        x = layernorm(attn + bo + x, g1, b1)

        # ---- FFN ----
        xb2 = x.astype(jnp.bfloat16)
        ffn = jnp.dot(xb2, wi_ref[l], preferred_element_type=jnp.float32) + bi   # [BS, INTER]
        # TODO(synk): HF BERT uses exact erf-GELU; tanh-approx GELU used here.
        ffn = jax.nn.gelu(ffn, approximate=True)
        ffn = jnp.dot(ffn.astype(jnp.bfloat16), wf_ref[l],
                      preferred_element_type=jnp.float32) + bf                   # [BS, H]
        x = layernorm(ffn + x, g2, b2)

    # Only the CLS row of each batch element is returned by TextEncoder.forward.
    cls_ref[...] = x.reshape(B, S, H)[:, 0:1, :].reshape(B, H)   # single [B,H] store


# ---------------- parameters (deterministic synthetic init) ----------------

def init_params(key):
    def norm(k, shape):
        return 0.02 * jax.random.normal(k, shape, jnp.float32)

    keys = jax.random.split(key, 7)
    scale = 1.0 / (HEAD_DIM ** 0.5)

    # QKV weight columns ordered (q-heads | k-heads | v-heads); fold the softmax
    # scale into the Q block (weights AND bias) so the kernel never multiplies scores.
    wqkv = norm(keys[3], (N_LAYERS, HIDDEN, 3 * HIDDEN))
    wqkv = wqkv.at[:, :, :HIDDEN].multiply(scale)
    bqkv = jnp.zeros((N_LAYERS, 3 * HIDDEN), jnp.float32)
    bqkv = bqkv.at[:, :HIDDEN].multiply(scale)

    # Packed tiny per-layer vectors:
    #   vecs[:, 0]=bo, 1=ln1_g, 2=ln1_b, 3=bf, 4=ln2_g, 5=ln2_b
    vecs = jnp.zeros((N_LAYERS, 6, HIDDEN), jnp.float32)
    vecs = vecs.at[:, 1, :].set(1.0)
    vecs = vecs.at[:, 4, :].set(1.0)
    #   bias2[:, 0]=bqkv (width 3H), bias2[:, 1, :INTER]=bi (zero-padded to 3H)
    bias2 = jnp.zeros((N_LAYERS, 2, 3 * HIDDEN), jnp.float32)
    bias2 = bias2.at[:, 0, :].set(bqkv)

    emb_ln = jnp.concatenate([jnp.ones((1, HIDDEN), jnp.float32),
                              jnp.zeros((1, HIDDEN), jnp.float32)], axis=0)

    return {
        "word_emb": norm(keys[0], (VOCAB, HIDDEN)),
        "pos_emb": norm(keys[1], (MAX_POS, HIDDEN)),
        "tok_emb": norm(keys[2], (2, HIDDEN)),
        "emb_ln": emb_ln,                                            # [2, H]
        "wqkv": wqkv.astype(jnp.bfloat16),                           # [L, H, 3H]
        "wo": norm(keys[4], (N_LAYERS, HIDDEN, HIDDEN)).astype(jnp.bfloat16),
        "wi": norm(keys[5], (N_LAYERS, HIDDEN, INTER)).astype(jnp.bfloat16),
        "wf": norm(keys[6], (N_LAYERS, INTER, HIDDEN)).astype(jnp.bfloat16),
        "vecs": vecs,                                                # [L, 6, H]
        "bias2": bias2,                                              # [L, 2, 3H]
    }


# ---------------- forward (== TextEncoder.forward) ----------------

def text_encoder_forward(input_ids, attention_mask, params):
    B, S = input_ids.shape

    # Embedding gather + position / token-type embeddings (glue in plain JAX).
    # TODO(synk): token_type_ids assumed all-zero, as the reference TextEncoder
    # signature never passes token_type_ids; the gather could be pulled into the
    # kernel via PrefetchScalarGridSpec at real scale.
    emb = (params["word_emb"][input_ids]
           + params["pos_emb"][None, :S, :]
           + params["tok_emb"][0][None, None, :]).astype(jnp.float32)   # [B,S,H]
    emb2d = emb.reshape(B * S, HIDDEN)                                   # batch folded

    # Extended additive attention mask, pre-broadcast over heads: [B*nH, 1, S].
    neg = (1.0 - attention_mask.astype(jnp.float32)) * -1e9              # [B, S]
    mask_bh = jnp.broadcast_to(neg[:, None, None, :],
                               (B, N_HEADS, 1, S)).reshape(B * N_HEADS, 1, S)

    kernel = functools.partial(
        _encoder_kernel, n_layers=N_LAYERS, n_heads=N_HEADS,
        head_dim=HEAD_DIM, inter=INTER, eps=LN_EPS)

    def full(shape):
        n = len(shape)
        return pl.BlockSpec(shape, lambda i, _n=n: (0,) * _n)

    cls = pl.pallas_call(
        kernel,
        out_shape=jax.ShapeDtypeStruct((B, HIDDEN), jnp.float32),
        grid=(1,),                                # ONE fused step: whole batch + all layers
        in_specs=[
            full((B * S, HIDDEN)),                # emb (flattened batch)
            full((B * N_HEADS, 1, S)),            # mask bias (head-broadcast)
            full((2, HIDDEN)),                    # emb LN (g, b)
            full((N_LAYERS, HIDDEN, 3 * HIDDEN)),  # wqkv (Q cols pre-scaled)
            full((N_LAYERS, HIDDEN, HIDDEN)),      # wo
            full((N_LAYERS, HIDDEN, INTER)),       # wi
            full((N_LAYERS, INTER, HIDDEN)),       # wf
            full((N_LAYERS, 6, HIDDEN)),           # packed bo/ln1/bf/ln2
            full((N_LAYERS, 2, 3 * HIDDEN)),       # packed bqkv / bi
        ],
        out_specs=full((B, HIDDEN)),               # single contiguous CLS slab
        compiler_params=pltpu.CompilerParams(
            dimension_semantics=("arbitrary",)),   # no TC split at toy size
    )(emb2d, mask_bh, params["emb_ln"],
      params["wqkv"], params["wo"], params["wi"], params["wf"],
      params["vecs"], params["bias2"])

    return cls   # last_hidden_state[:, 0, :]


if __name__ == "__main__":
    key = jax.random.PRNGKey(0)
    pkey, ikey = jax.random.split(key)
    params = init_params(pkey)

    B, S = 2, 8
    input_ids = jax.random.randint(ikey, (B, S), 0, VOCAB)
    attention_mask = jnp.ones((B, S), jnp.int32).at[1, 6:].set(0)  # exercise padding mask

    out = jax.jit(text_encoder_forward)(input_ids, attention_mask, params)
    jax.block_until_ready(out)
    assert out.shape == (B, HIDDEN) and out.dtype == jnp.float32
    assert bool(jnp.all(jnp.isfinite(out)))
    print("KERNEL_OK")
</pallas_src>

<mosaic_0001>
module attributes {stable_mosaic.version = 11 : i64} {
  func.func @_encoder_kernel(%arg0: i32, %arg1: memref<16x32xf32, #tpu.memory_space<vmem>>, %arg2: memref<8x1x8xf32, #tpu.memory_space<vmem>>, %arg3: memref<2x32xf32, #tpu.memory_space<vmem>>, %arg4: memref<2x32x96xbf16, #tpu.memory_space<vmem>>, %arg5: memref<2x32x32xbf16, #tpu.memory_space<vmem>>, %arg6: memref<2x32x64xbf16, #tpu.memory_space<vmem>>, %arg7: memref<2x64x32xbf16, #tpu.memory_space<vmem>>, %arg8: memref<2x6x32xf32, #tpu.memory_space<vmem>>, %arg9: memref<2x2x96xf32, #tpu.memory_space<vmem>>, %arg10: memref<2x32xf32, #tpu.memory_space<vmem>>) attributes {dimension_semantics = [#tpu.dimension_semantics<arbitrary>], iteration_bounds = array<i64: 1>, scalar_prefetch = 0 : i64, scratch_operands = 0 : i64, tpu.core_type = #tpu.core_type<tc>, window_params = [{pipeline_mode = #tpu.pipeline_mode<synchronous>, transform_indices = @transform_0, window_bounds = array<i64: 16, 32>}, {pipeline_mode = #tpu.pipeline_mode<synchronous>, transform_indices = @transform_1, window_bounds = array<i64: 8, 1, 8>}, {pipeline_mode = #tpu.pipeline_mode<synchronous>, transform_indices = @transform_2, window_bounds = array<i64: 2, 32>}, {pipeline_mode = #tpu.pipeline_mode<synchronous>, transform_indices = @transform_3, window_bounds = array<i64: 2, 32, 96>}, {pipeline_mode = #tpu.pipeline_mode<synchronous>, transform_indices = @transform_4, window_bounds = array<i64: 2, 32, 32>}, {pipeline_mode = #tpu.pipeline_mode<synchronous>, transform_indices = @transform_5, window_bounds = array<i64: 2, 32, 64>}, {pipeline_mode = #tpu.pipeline_mode<synchronous>, transform_indices = @transform_6, window_bounds = array<i64: 2, 64, 32>}, {pipeline_mode = #tpu.pipeline_mode<synchronous>, transform_indices = @transform_7, window_bounds = array<i64: 2, 6, 32>}, {pipeline_mode = #tpu.pipeline_mode<synchronous>, transform_indices = @transform_8, window_bounds = array<i64: 2, 2, 96>}, {pipeline_mode = #tpu.pipeline_mode<synchronous>, transform_indices = @transform_9, window_bounds = array<i64: 2, 32>}]} {
    %c0 = arith.constant 0 : index
    %c0_0 = arith.constant 0 : index
    %c0_1 = arith.constant 0 : index
    %0 = vector.load %arg2[%c0, %c0_0, %c0_1] : memref<8x1x8xf32, #tpu.memory_space<vmem>>, vector<8x1x8xf32>
    %c0_2 = arith.constant 0 : index
    %c0_3 = arith.constant 0 : index
    %1 = vector.load %arg3[%c0_2, %c0_3] : memref<2x32xf32, #tpu.memory_space<vmem>>, vector<2x32xf32>
    %c0_4 = arith.constant 0 : index
    %c0_5 = arith.constant 0 : index
    %2 = vector.load %arg1[%c0_4, %c0_5] : memref<16x32xf32, #tpu.memory_space<vmem>>, vector<16x32xf32>
    %3 = vector.extract_strided_slice %1 {offsets = [0, 0], sizes = [1, 32], strides = [1, 1]} : vector<2x32xf32> to vector<1x32xf32>
    %4 = vector.extract_strided_slice %1 {offsets = [1, 0], sizes = [1, 32], strides = [1, 1]} : vector<2x32xf32> to vector<1x32xf32>
    %cst = arith.constant dense<0.000000e+00> : vector<16xf32>
    %5 = vector.multi_reduction <add>, %2, %cst [1] : vector<16x32xf32> to vector<16xf32>
    %6 = vector.shape_cast %5 : vector<16xf32> to vector<16x1xf32>
    %cst_6 = arith.constant 3.200000e+01 : f32
    %7 = vector.broadcast %cst_6 : f32 to vector<16x1xf32>
    %8 = arith.divf %6, %7 : vector<16x1xf32>
    %9 = vector.broadcast %8 : vector<16x1xf32> to vector<16x32xf32>
    %10 = arith.subf %2, %9 : vector<16x32xf32>
    %11 = arith.mulf %10, %10 : vector<16x32xf32>
    %cst_7 = arith.constant dense<0.000000e+00> : vector<16xf32>
    %12 = vector.multi_reduction <add>, %11, %cst_7 [1] : vector<16x32xf32> to vector<16xf32>
    %13 = vector.shape_cast %12 : vector<16xf32> to vector<16x1xf32>
    %cst_8 = arith.constant 3.200000e+01 : f32
    %14 = vector.broadcast %cst_8 : f32 to vector<16x1xf32>
    %15 = arith.divf %13, %14 : vector<16x1xf32>
    %16 = vector.broadcast %8 : vector<16x1xf32> to vector<16x32xf32>
    %17 = arith.subf %2, %16 : vector<16x32xf32>
    %cst_9 = arith.constant 9.99999996E-13 : f32
    %18 = vector.broadcast %cst_9 : f32 to vector<16x1xf32>
    %19 = arith.addf %15, %18 : vector<16x1xf32>
    %20 = math.rsqrt %19 : vector<16x1xf32>
    %21 = vector.broadcast %20 : vector<16x1xf32> to vector<16x32xf32>
    %22 = arith.mulf %17, %21 : vector<16x32xf32>
    %23 = vector.broadcast %3 : vector<1x32xf32> to vector<16x32xf32>
    %24 = arith.mulf %22, %23 : vector<16x32xf32>
    %25 = vector.broadcast %4 : vector<1x32xf32> to vector<16x32xf32>
    %26 = arith.addf %24, %25 : vector<16x32xf32>
    %c0_10 = arith.constant 0 : index
    %c0_11 = arith.constant 0 : index
    %c0_12 = arith.constant 0 : index
    %27 = vector.load %arg8[%c0_10, %c0_11, %c0_12] : memref<2x6x32xf32, #tpu.memory_space<vmem>>, vector<1x6x32xf32>
    %28 = vector.shape_cast %27 : vector<1x6x32xf32> to vector<6x32xf32>
    %c0_13 = arith.constant 0 : index
    %c0_14 = arith.constant 0 : index
    %c0_15 = arith.constant 0 : index
    %29 = vector.load %arg9[%c0_13, %c0_14, %c0_15] : memref<2x2x96xf32, #tpu.memory_space<vmem>>, vector<1x2x96xf32>
    %30 = vector.shape_cast %29 : vector<1x2x96xf32> to vector<2x96xf32>
    %31 = vector.extract_strided_slice %30 {offsets = [0, 0], sizes = [1, 96], strides = [1, 1]} : vector<2x96xf32> to vector<1x96xf32>
    %32 = vector.extract_strided_slice %30 {offsets = [1, 0], sizes = [1, 64], strides = [1, 1]} : vector<2x96xf32> to vector<1x64xf32>
    %33 = vector.extract_strided_slice %28 {offsets = [0, 0], sizes = [1, 32], strides = [1, 1]} : vector<6x32xf32> to vector<1x32xf32>
    %34 = vector.extract_strided_slice %28 {offsets = [1, 0], sizes = [1, 32], strides = [1, 1]} : vector<6x32xf32> to vector<1x32xf32>
    %35 = vector.extract_strided_slice %28 {offsets = [2, 0], sizes = [1, 32], strides = [1, 1]} : vector<6x32xf32> to vector<1x32xf32>
    %36 = vector.extract_strided_slice %28 {offsets = [3, 0], sizes = [1, 32], strides = [1, 1]} : vector<6x32xf32> to vector<1x32xf32>
    %37 = vector.extract_strided_slice %28 {offsets = [4, 0], sizes = [1, 32], strides = [1, 1]} : vector<6x32xf32> to vector<1x32xf32>
    %38 = vector.extract_strided_slice %28 {offsets = [5, 0], sizes = [1, 32], strides = [1, 1]} : vector<6x32xf32> to vector<1x32xf32>
    %39 = arith.truncf %26 : vector<16x32xf32> to vector<16x32xbf16>
    %c0_16 = arith.constant 0 : index
    %c0_17 = arith.constant 0 : index
    %c0_18 = arith.constant 0 : index
    %40 = vector.load %arg4[%c0_16, %c0_17, %c0_18] : memref<2x32x96xbf16, #tpu.memory_space<vmem>>, vector<1x32x96xbf16>
    %41 = vector.shape_cast %40 : vector<1x32x96xbf16> to vector<32x96xbf16>
    %cst_19 = arith.constant dense<0.000000e+00> : vector<16x96xf32>
    %42 = tpu.matmul %39, %41, %cst_19 {dimension_numbers = #tpu.dot_dimension_numbers<[1], [0], [0], [1], [0, 0, 1, 1], [], []>} : vector<16x32xbf16>, vector<32x96xbf16>, vector<16x96xf32> -> vector<16x96xf32>
    %43 = vector.broadcast %31 : vector<1x96xf32> to vector<16x96xf32>
    %44 = arith.addf %42, %43 : vector<16x96xf32>
    %45 = arith.truncf %44 : vector<16x96xf32> to vector<16x96xbf16>
    %46 = vector.shape_cast %45 : vector<16x96xbf16> to vector<2x8x12x8xbf16>
    %47 = tpu.transpose %46, [0, 2, 1, 3] : vector<2x8x12x8xbf16> -> vector<2x12x8x8xbf16>
    %48 = vector.extract_strided_slice %47 {offsets = [0, 0, 0, 0], sizes = [2, 4, 8, 8], strides = [1, 1, 1, 1]} : vector<2x12x8x8xbf16> to vector<2x4x8x8xbf16>
    %49 = vector.shape_cast %48 : vector<2x4x8x8xbf16> to vector<8x8x8xbf16>
    %50 = vector.extract_strided_slice %47 {offsets = [0, 4, 0, 0], sizes = [2, 4, 8, 8], strides = [1, 1, 1, 1]} : vector<2x12x8x8xbf16> to vector<2x4x8x8xbf16>
    %51 = vector.shape_cast %50 : vector<2x4x8x8xbf16> to vector<8x8x8xbf16>
    %52 = vector.extract_strided_slice %47 {offsets = [0, 8, 0, 0], sizes = [2, 4, 8, 8], strides = [1, 1, 1, 1]} : vector<2x12x8x8xbf16> to vector<2x4x8x8xbf16>
    %53 = vector.shape_cast %52 : vector<2x4x8x8xbf16> to vector<8x8x8xbf16>
    "tpu.trace_start"() <{level = 10 : i32, message = "bqd,bkd->bqk"}> : () -> ()
    %cst_20 = arith.constant dense<0.000000e+00> : vector<8x8x8xf32>
    %54 = tpu.matmul %49, %51, %cst_20 {dimension_numbers = #tpu.dot_dimension_numbers<[2], [2], [1], [1], [0, 0, 0, 1, 1, 1], [0], [0]>} : vector<8x8x8xbf16>, vector<8x8x8xbf16>, vector<8x8x8xf32> -> vector<8x8x8xf32>
    "tpu.trace_stop"() : () -> ()
    %55 = vector.broadcast %0 : vector<8x1x8xf32> to vector<8x8x8xf32>
    %56 = arith.addf %54, %55 : vector<8x8x8xf32>
    %cst_21 = arith.constant dense<0xFF800000> : vector<8x8xf32>
    %57 = vector.multi_reduction <maximumf>, %56, %cst_21 [2] : vector<8x8x8xf32> to vector<8x8xf32>
    %58 = vector.shape_cast %57 : vector<8x8xf32> to vector<8x8x1xf32>
    %59 = vector.broadcast %58 : vector<8x8x1xf32> to vector<8x8x8xf32>
    %60 = arith.subf %56, %59 : vector<8x8x8xf32>
    %61 = math.exp %60 : vector<8x8x8xf32>
    %cst_22 = arith.constant dense<0.000000e+00> : vector<8x8xf32>
    %62 = vector.multi_reduction <add>, %61, %cst_22 [2] : vector<8x8x8xf32> to vector<8x8xf32>
    %63 = vector.shape_cast %62 : vector<8x8xf32> to vector<8x8x1xf32>
    %64 = tpu.reciprocal %63 {approx = true} : vector<8x8x1xf32> -> vector<8x8x1xf32>
    %65 = vector.broadcast %64 : vector<8x8x1xf32> to vector<8x8x8xf32>
    %66 = arith.mulf %61, %65 : vector<8x8x8xf32>
    %67 = arith.truncf %66 : vector<8x8x8xf32> to vector<8x8x8xbf16>
    "tpu.trace_start"() <{level = 10 : i32, message = "bqk,bkd->bqd"}> : () -> ()
    %cst_23 = arith.constant dense<0.000000e+00> : vector<8x8x8xf32>
    %68 = tpu.matmul %67, %53, %cst_23 {dimension_numbers = #tpu.dot_dimension_numbers<[2], [1], [1], [2], [0, 0, 0, 1, 1, 2], [0], [0]>} : vector<8x8x8xbf16>, vector<8x8x8xbf16>, vector<8x8x8xf32> -> vector<8x8x8xf32>
    "tpu.trace_stop"() : () -> ()
    %69 = arith.truncf %68 : vector<8x8x8xf32> to vector<8x8x8xbf16>
    %70 = vector.shape_cast %69 : vector<8x8x8xbf16> to vector<2x4x8x8xbf16>
    %71 = tpu.transpose %70, [0, 2, 1, 3] : vector<2x4x8x8xbf16> -> vector<2x8x4x8xbf16>
    %72 = vector.shape_cast %71 : vector<2x8x4x8xbf16> to vector<16x32xbf16>
    %c0_24 = arith.constant 0 : index
    %c0_25 = arith.constant 0 : index
    %c0_26 = arith.constant 0 : index
    %73 = vector.load %arg5[%c0_24, %c0_25, %c0_26] : memref<2x32x32xbf16, #tpu.memory_space<vmem>>, vector<1x32x32xbf16>
    %74 = vector.shape_cast %73 : vector<1x32x32xbf16> to vector<32x32xbf16>
    %cst_27 = arith.constant dense<0.000000e+00> : vector<16x32xf32>
    %75 = tpu.matmul %72, %74, %cst_27 {dimension_numbers = #tpu.dot_dimension_numbers<[1], [0], [0], [1], [0, 0, 1, 1], [], []>} : vector<16x32xbf16>, vector<32x32xbf16>, vector<16x32xf32> -> vector<16x32xf32>
    %76 = vector.broadcast %33 : vector<1x32xf32> to vector<16x32xf32>
    %77 = arith.addf %75, %76 : vector<16x32xf32>
    %78 = arith.addf %77, %26 : vector<16x32xf32>
    %cst_28 = arith.constant dense<0.000000e+00> : vector<16xf32>
    %79 = vector.multi_reduction <add>, %78, %cst_28 [1] : vector<16x32xf32> to vector<16xf32>
    %80 = vector.shape_cast %79 : vector<16xf32> to vector<16x1xf32>
    %cst_29 = arith.constant 3.200000e+01 : f32
    %81 = vector.broadcast %cst_29 : f32 to vector<16x1xf32>
    %82 = arith.divf %80, %81 : vector<16x1xf32>
    %83 = vector.broadcast %82 : vector<16x1xf32> to vector<16x32xf32>
    %84 = arith.subf %78, %83 : vector<16x32xf32>
    %85 = arith.mulf %84, %84 : vector<16x32xf32>
    %cst_30 = arith.constant dense<0.000000e+00> : vector<16xf32>
    %86 = vector.multi_reduction <add>, %85, %cst_30 [1] : vector<16x32xf32> to vector<16xf32>
    %87 = vector.shape_cast %86 : vector<16xf32> to vector<16x1xf32>
    %cst_31 = arith.constant 3.200000e+01 : f32
    %88 = vector.broadcast %cst_31 : f32 to vector<16x1xf32>
    %89 = arith.divf %87, %88 : vector<16x1xf32>
    %90 = vector.broadcast %82 : vector<16x1xf32> to vector<16x32xf32>
    %91 = arith.subf %78, %90 : vector<16x32xf32>
    %cst_32 = arith.constant 9.99999996E-13 : f32
    %92 = vector.broadcast %cst_32 : f32 to vector<16x1xf32>
    %93 = arith.addf %89, %92 : vector<16x1xf32>
    %94 = math.rsqrt %93 : vector<16x1xf32>
    %95 = vector.broadcast %94 : vector<16x1xf32> to vector<16x32xf32>
    %96 = arith.mulf %91, %95 : vector<16x32xf32>
    %97 = vector.broadcast %34 : vector<1x32xf32> to vector<16x32xf32>
    %98 = arith.mulf %96, %97 : vector<16x32xf32>
    %99 = vector.broadcast %35 : vector<1x32xf32> to vector<16x32xf32>
    %100 = arith.addf %98, %99 : vector<16x32xf32>
    %101 = arith.truncf %100 : vector<16x32xf32> to vector<16x32xbf16>
    %c0_33 = arith.constant 0 : index
    %c0_34 = arith.constant 0 : index
    %c0_35 = arith.constant 0 : index
    %102 = vector.load %arg6[%c0_33, %c0_34, %c0_35] : memref<2x32x64xbf16, #tpu.memory_space<vmem>>, vector<1x32x64xbf16>
    %103 = vector.shape_cast %102 : vector<1x32x64xbf16> to vector<32x64xbf16>
    %cst_36 = arith.constant dense<0.000000e+00> : vector<16x64xf32>
    %104 = tpu.matmul %101, %103, %cst_36 {dimension_numbers = #tpu.dot_dimension_numbers<[1], [0], [0], [1], [0, 0, 1, 1], [], []>} : vector<16x32xbf16>, vector<32x64xbf16>, vector<16x64xf32> -> vector<16x64xf32>
    %105 = vector.broadcast %32 : vector<1x64xf32> to vector<16x64xf32>
    %106 = arith.addf %104, %105 : vector<16x64xf32>
    %107 = arith.mulf %106, %106 : vector<16x64xf32>
    %108 = arith.mulf %106, %107 : vector<16x64xf32>
    %cst_37 = arith.constant 4.471500e-02 : f32
    %109 = vector.broadcast %cst_37 : f32 to vector<16x64xf32>
    %110 = arith.mulf %109, %108 : vector<16x64xf32>
    %111 = arith.addf %106, %110 : vector<16x64xf32>
    %cst_38 = arith.constant 0.797884583 : f32
    %112 = vector.broadcast %cst_38 : f32 to vector<16x64xf32>
    %113 = arith.mulf %112, %111 : vector<16x64xf32>
    %114 = math.tanh %113 : vector<16x64xf32>
    %cst_39 = arith.constant 1.000000e+00 : f32
    %115 = vector.broadcast %cst_39 : f32 to vector<16x64xf32>
    %116 = arith.addf %115, %114 : vector<16x64xf32>
    %cst_40 = arith.constant 5.000000e-01 : f32
    %117 = vector.broadcast %cst_40 : f32 to vector<16x64xf32>
    %118 = arith.mulf %117, %116 : vector<16x64xf32>
    %119 = arith.mulf %106, %118 : vector<16x64xf32>
    %120 = arith.truncf %119 : vector<16x64xf32> to vector<16x64xbf16>
    %c0_41 = arith.constant 0 : index
    %c0_42 = arith.constant 0 : index
    %c0_43 = arith.constant 0 : index
    %121 = vector.load %arg7[%c0_41, %c0_42, %c0_43] : memref<2x64x32xbf16, #tpu.memory_space<vmem>>, vector<1x64x32xbf16>
    %122 = vector.shape_cast %121 : vector<1x64x32xbf16> to vector<64x32xbf16>
    %cst_44 = arith.constant dense<0.000000e+00> : vector<16x32xf32>
    %123 = tpu.matmul %120, %122, %cst_44 {dimension_numbers = #tpu.dot_dimension_numbers<[1], [0], [0], [1], [0, 0, 1, 1], [], []>} : vector<16x64xbf16>, vector<64x32xbf16>, vector<16x32xf32> -> vector<16x32xf32>
    %124 = vector.broadcast %36 : vector<1x32xf32> to vector<16x32xf32>
    %125 = arith.addf %123, %124 : vector<16x32xf32>
    %126 = arith.addf %125, %100 : vector<16x32xf32>
    %cst_45 = arith.constant dense<0.000000e+00> : vector<16xf32>
    %127 = vector.multi_reduction <add>, %126, %cst_45 [1] : vector<16x32xf32> to vector<16xf32>
    %128 = vector.shape_cast %127 : vector<16xf32> to vector<16x1xf32>
    %cst_46 = arith.constant 3.200000e+01 : f32
    %129 = vector.broadcast %cst_46 : f32 to vector<16x1xf32>
    %130 = arith.divf %128, %129 : vector<16x1xf32>
    %131 = vector.broadcast %130 : vector<16x1xf32> to vector<16x32xf32>
    %132 = arith.subf %126, %131 : vector<16x32xf32>
    %133 = arith.mulf %132, %132 : vector<16x32xf32>
    %cst_47 = arith.constant dense<0.000000e+00> : vector<16xf32>
    %134 = vector.multi_reduction <add>, %133, %cst_47 [1] : vector<16x32xf32> to vector<16xf32>
    %135 = vector.shape_cast %134 : vector<16xf32> to vector<16x1xf32>
    %cst_48 = arith.constant 3.200000e+01 : f32
    %136 = vector.broadcast %cst_48 : f32 to vector<16x1xf32>
    %137 = arith.divf %135, %136 : vector<16x1xf32>
    %138 = vector.broadcast %130 : vector<16x1xf32> to vector<16x32xf32>
    %139 = arith.subf %126, %138 : vector<16x32xf32>
    %cst_49 = arith.constant 9.99999996E-13 : f32
    %140 = vector.broadcast %cst_49 : f32 to vector<16x1xf32>
    %141 = arith.addf %137, %140 : vector<16x1xf32>
    %142 = math.rsqrt %141 : vector<16x1xf32>
    %143 = vector.broadcast %142 : vector<16x1xf32> to vector<16x32xf32>
    %144 = arith.mulf %139, %143 : vector<16x32xf32>
    %145 = vector.broadcast %37 : vector<1x32xf32> to vector<16x32xf32>
    %146 = arith.mulf %144, %145 : vector<16x32xf32>
    %147 = vector.broadcast %38 : vector<1x32xf32> to vector<16x32xf32>
    %148 = arith.addf %146, %147 : vector<16x32xf32>
    %c1 = arith.constant 1 : index
    %c0_50 = arith.constant 0 : index
    %c0_51 = arith.constant 0 : index
    %149 = vector.load %arg8[%c1, %c0_50, %c0_51] : memref<2x6x32xf32, #tpu.memory_space<vmem>>, vector<1x6x32xf32>
    %150 = vector.shape_cast %149 : vector<1x6x32xf32> to vector<6x32xf32>
    %c1_52 = arith.constant 1 : index
    %c0_53 = arith.constant 0 : index
    %c0_54 = arith.constant 0 : index
    %151 = vector.load %arg9[%c1_52, %c0_53, %c0_54] : memref<2x2x96xf32, #tpu.memory_space<vmem>>, vector<1x2x96xf32>
    %152 = vector.shape_cast %151 : vector<1x2x96xf32> to vector<2x96xf32>
    %153 = vector.extract_strided_slice %152 {offsets = [0, 0], sizes = [1, 96], strides = [1, 1]} : vector<2x96xf32> to vector<1x96xf32>
    %154 = vector.extract_strided_slice %152 {offsets = [1, 0], sizes = [1, 64], strides = [1, 1]} : vector<2x96xf32> to vector<1x64xf32>
    %155 = vector.extract_strided_slice %150 {offsets = [0, 0], sizes = [1, 32], strides = [1, 1]} : vector<6x32xf32> to vector<1x32xf32>
    %156 = vector.extract_strided_slice %150 {offsets = [1, 0], sizes = [1, 32], strides = [1, 1]} : vector<6x32xf32> to vector<1x32xf32>
    %157 = vector.extract_strided_slice %150 {offsets = [2, 0], sizes = [1, 32], strides = [1, 1]} : vector<6x32xf32> to vector<1x32xf32>
    %158 = vector.extract_strided_slice %150 {offsets = [3, 0], sizes = [1, 32], strides = [1, 1]} : vector<6x32xf32> to vector<1x32xf32>
    %159 = vector.extract_strided_slice %150 {offsets = [4, 0], sizes = [1, 32], strides = [1, 1]} : vector<6x32xf32> to vector<1x32xf32>
    %160 = vector.extract_strided_slice %150 {offsets = [5, 0], sizes = [1, 32], strides = [1, 1]} : vector<6x32xf32> to vector<1x32xf32>
    %161 = arith.truncf %148 : vector<16x32xf32> to vector<16x32xbf16>
    %c1_55 = arith.constant 1 : index
    %c0_56 = arith.constant 0 : index
    %c0_57 = arith.constant 0 : index
    %162 = vector.load %arg4[%c1_55, %c0_56, %c0_57] : memref<2x32x96xbf16, #tpu.memory_space<vmem>>, vector<1x32x96xbf16>
    %163 = vector.shape_cast %162 : vector<1x32x96xbf16> to vector<32x96xbf16>
    %cst_58 = arith.constant dense<0.000000e+00> : vector<16x96xf32>
    %164 = tpu.matmul %161, %163, %cst_58 {dimension_numbers = #tpu.dot_dimension_numbers<[1], [0], [0], [1], [0, 0, 1, 1], [], []>} : vector<16x32xbf16>, vector<32x96xbf16>, vector<16x96xf32> -> vector<16x96xf32>
    %165 = vector.broadcast %153 : vector<1x96xf32> to vector<16x96xf32>
    %166 = arith.addf %164, %165 : vector<16x96xf32>
    %167 = arith.truncf %166 : vector<16x96xf32> to vector<16x96xbf16>
    %168 = vector.shape_cast %167 : vector<16x96xbf16> to vector<2x8x12x8xbf16>
    %169 = tpu.transpose %168, [0, 2, 1, 3] : vector<2x8x12x8xbf16> -> vector<2x12x8x8xbf16>
    %170 = vector.extract_strided_slice %169 {offsets = [0, 0, 0, 0], sizes = [2, 4, 8, 8], strides = [1, 1, 1, 1]} : vector<2x12x8x8xbf16> to vector<2x4x8x8xbf16>
    %171 = vector.shape_cast %170 : vector<2x4x8x8xbf16> to vector<8x8x8xbf16>
    %172 = vector.extract_strided_slice %169 {offsets = [0, 4, 0, 0], sizes = [2, 4, 8, 8], strides = [1, 1, 1, 1]} : vector<2x12x8x8xbf16> to vector<2x4x8x8xbf16>
    %173 = vector.shape_cast %172 : vector<2x4x8x8xbf16> to vector<8x8x8xbf16>
    %174 = vector.extract_strided_slice %169 {offsets = [0, 8, 0, 0], sizes = [2, 4, 8, 8], strides = [1, 1, 1, 1]} : vector<2x12x8x8xbf16> to vector<2x4x8x8xbf16>
    %175 = vector.shape_cast %174 : vector<2x4x8x8xbf16> to vector<8x8x8xbf16>
    "tpu.trace_start"() <{level = 10 : i32, message = "bqd,bkd->bqk"}> : () -> ()
    %cst_59 = arith.constant dense<0.000000e+00> : vector<8x8x8xf32>
    %176 = tpu.matmul %171, %173, %cst_59 {dimension_numbers = #tpu.dot_dimension_numbers<[2], [2], [1], [1], [0, 0, 0, 1, 1, 1], [0], [0]>} : vector<8x8x8xbf16>, vector<8x8x8xbf16>, vector<8x8x8xf32> -> vector<8x8x8xf32>
    "tpu.trace_stop"() : () -> ()
    %177 = vector.broadcast %0 : vector<8x1x8xf32> to vector<8x8x8xf32>
    %178 = arith.addf %176, %177 : vector<8x8x8xf32>
    %cst_60 = arith.constant dense<0xFF800000> : vector<8x8xf32>
    %179 = vector.multi_reduction <maximumf>, %178, %cst_60 [2] : vector<8x8x8xf32> to vector<8x8xf32>
    %180 = vector.shape_cast %179 : vector<8x8xf32> to vector<8x8x1xf32>
    %181 = vector.broadcast %180 : vector<8x8x1xf32> to vector<8x8x8xf32>
    %182 = arith.subf %178, %181 : vector<8x8x8xf32>
    %183 = math.exp %182 : vector<8x8x8xf32>
    %cst_61 = arith.constant dense<0.000000e+00> : vector<8x8xf32>
    %184 = vector.multi_reduction <add>, %183, %cst_61 [2] : vector<8x8x8xf32> to vector<8x8xf32>
    %185 = vector.shape_cast %184 : vector<8x8xf32> to vector<8x8x1xf32>
    %186 = tpu.reciprocal %185 {approx = true} : vector<8x8x1xf32> -> vector<8x8x1xf32>
    %187 = vector.broadcast %186 : vector<8x8x1xf32> to vector<8x8x8xf32>
    %188 = arith.mulf %183, %187 : vector<8x8x8xf32>
    %189 = arith.truncf %188 : vector<8x8x8xf32> to vector<8x8x8xbf16>
    "tpu.trace_start"() <{level = 10 : i32, message = "bqk,bkd->bqd"}> : () -> ()
    %cst_62 = arith.constant dense<0.000000e+00> : vector<8x8x8xf32>
    %190 = tpu.matmul %189, %175, %cst_62 {dimension_numbers = #tpu.dot_dimension_numbers<[2], [1], [1], [2], [0, 0, 0, 1, 1, 2], [0], [0]>} : vector<8x8x8xbf16>, vector<8x8x8xbf16>, vector<8x8x8xf32> -> vector<8x8x8xf32>
    "tpu.trace_stop"() : () -> ()
    %191 = arith.truncf %190 : vector<8x8x8xf32> to vector<8x8x8xbf16>
    %192 = vector.shape_cast %191 : vector<8x8x8xbf16> to vector<2x4x8x8xbf16>
    %193 = tpu.transpose %192, [0, 2, 1, 3] : vector<2x4x8x8xbf16> -> vector<2x8x4x8xbf16>
    %194 = vector.shape_cast %193 : vector<2x8x4x8xbf16> to vector<16x32xbf16>
    %c1_63 = arith.constant 1 : index
    %c0_64 = arith.constant 0 : index
    %c0_65 = arith.constant 0 : index
    %195 = vector.load %arg5[%c1_63, %c0_64, %c0_65] : memref<2x32x32xbf16, #tpu.memory_space<vmem>>, vector<1x32x32xbf16>
    %196 = vector.shape_cast %195 : vector<1x32x32xbf16> to vector<32x32xbf16>
    %cst_66 = arith.constant dense<0.000000e+00> : vector<16x32xf32>
    %197 = tpu.matmul %194, %196, %cst_66 {dimension_numbers = #tpu.dot_dimension_numbers<[1], [0], [0], [1], [0, 0, 1, 1], [], []>} : vector<16x32xbf16>, vector<32x32xbf16>, vector<16x32xf32> -> vector<16x32xf32>
    %198 = vector.broadcast %155 : vector<1x32xf32> to vector<16x32xf32>
    %199 = arith.addf %197, %198 : vector<16x32xf32>
    %200 = arith.addf %199, %148 : vector<16x32xf32>
    %cst_67 = arith.constant dense<0.000000e+00> : vector<16xf32>
    %201 = vector.multi_reduction <add>, %200, %cst_67 [1] : vector<16x32xf32> to vector<16xf32>
    %202 = vector.shape_cast %201 : vector<16xf32> to vector<16x1xf32>
    %cst_68 = arith.constant 3.200000e+01 : f32
    %203 = vector.broadcast %cst_68 : f32 to vector<16x1xf32>
    %204 = arith.divf %202, %203 : vector<16x1xf32>
    %205 = vector.broadcast %204 : vector<16x1xf32> to vector<16x32xf32>
    %206 = arith.subf %200, %205 : vector<16x32xf32>
    %207 = arith.mulf %206, %206 : vector<16x32xf32>
    %cst_69 = arith.constant dense<0.000000e+00> : vector<16xf32>
    %208 = vector.multi_reduction <add>, %207, %cst_69 [1] : vector<16x32xf32> to vector<16xf32>
    %209 = vector.shape_cast %208 : vector<16xf32> to vector<16x1xf32>
    %cst_70 = arith.constant 3.200000e+01 : f32
    %210 = vector.broadcast %cst_70 : f32 to vector<16x1xf32>
    %211 = arith.divf %209, %210 : vector<16x1xf32>
    %212 = vector.broadcast %204 : vector<16x1xf32> to vector<16x32xf32>
    %213 = arith.subf %200, %212 : vector<16x32xf32>
    %cst_71 = arith.constant 9.99999996E-13 : f32
    %214 = vector.broadcast %cst_71 : f32 to vector<16x1xf32>
    %215 = arith.addf %211, %214 : vector<16x1xf32>
    %216 = math.rsqrt %215 : vector<16x1xf32>
    %217 = vector.broadcast %216 : vector<16x1xf32> to vector<16x32xf32>
    %218 = arith.mulf %213, %217 : vector<16x32xf32>
    %219 = vector.broadcast %156 : vector<1x32xf32> to vector<16x32xf32>
    %220 = arith.mulf %218, %219 : vector<16x32xf32>
    %221 = vector.broadcast %157 : vector<1x32xf32> to vector<16x32xf32>
    %222 = arith.addf %220, %221 : vector<16x32xf32>
    %223 = arith.truncf %222 : vector<16x32xf32> to vector<16x32xbf16>
    %c1_72 = arith.constant 1 : index
    %c0_73 = arith.constant 0 : index
    %c0_74 = arith.constant 0 : index
    %224 = vector.load %arg6[%c1_72, %c0_73, %c0_74] : memref<2x32x64xbf16, #tpu.memory_space<vmem>>, vector<1x32x64xbf16>
    %225 = vector.shape_cast %224 : vector<1x32x64xbf16> to vector<32x64xbf16>
    %cst_75 = arith.constant dense<0.000000e+00> : vector<16x64xf32>
    %226 = tpu.matmul %223, %225, %cst_75 {dimension_numbers = #tpu.dot_dimension_numbers<[1], [0], [0], [1], [0, 0, 1, 1], [], []>} : vector<16x32xbf16>, vector<32x64xbf16>, vector<16x64xf32> -> vector<16x64xf32>
    %227 = vector.broadcast %154 : vector<1x64xf32> to vector<16x64xf32>
    %228 = arith.addf %226, %227 : vector<16x64xf32>
    %229 = arith.mulf %228, %228 : vector<16x64xf32>
    %230 = arith.mulf %228, %229 : vector<16x64xf32>
    %cst_76 = arith.constant 4.471500e-02 : f32
    %231 = vector.broadcast %cst_76 : f32 to vector<16x64xf32>
    %232 = arith.mulf %231, %230 : vector<16x64xf32>
    %233 = arith.addf %228, %232 : vector<16x64xf32>
    %cst_77 = arith.constant 0.797884583 : f32
    %234 = vector.broadcast %cst_77 : f32 to vector<16x64xf32>
    %235 = arith.mulf %234, %233 : vector<16x64xf32>
    %236 = math.tanh %235 : vector<16x64xf32>
    %cst_78 = arith.constant 1.000000e+00 : f32
    %237 = vector.broadcast %cst_78 : f32 to vector<16x64xf32>
    %238 = arith.addf %237, %236 : vector<16x64xf32>
    %cst_79 = arith.constant 5.000000e-01 : f32
    %239 = vector.broadcast %cst_79 : f32 to vector<16x64xf32>
    %240 = arith.mulf %239, %238 : vector<16x64xf32>
    %241 = arith.mulf %228, %240 : vector<16x64xf32>
    %242 = arith.truncf %241 : vector<16x64xf32> to vector<16x64xbf16>
    %c1_80 = arith.constant 1 : index
    %c0_81 = arith.constant 0 : index
    %c0_82 = arith.constant 0 : index
    %243 = vector.load %arg7[%c1_80, %c0_81, %c0_82] : memref<2x64x32xbf16, #tpu.memory_space<vmem>>, vector<1x64x32xbf16>
    %244 = vector.shape_cast %243 : vector<1x64x32xbf16> to vector<64x32xbf16>
    %cst_83 = arith.constant dense<0.000000e+00> : vector<16x32xf32>
    %245 = tpu.matmul %242, %244, %cst_83 {dimension_numbers = #tpu.dot_dimension_numbers<[1], [0], [0], [1], [0, 0, 1, 1], [], []>} : vector<16x64xbf16>, vector<64x32xbf16>, vector<16x32xf32> -> vector<16x32xf32>
    %246 = vector.broadcast %158 : vector<1x32xf32> to vector<16x32xf32>
    %247 = arith.addf %245, %246 : vector<16x32xf32>
    %248 = arith.addf %247, %222 : vector<16x32xf32>
    %cst_84 = arith.constant dense<0.000000e+00> : vector<16xf32>
    %249 = vector.multi_reduction <add>, %248, %cst_84 [1] : vector<16x32xf32> to vector<16xf32>
    %250 = vector.shape_cast %249 : vector<16xf32> to vector<16x1xf32>
    %cst_85 = arith.constant 3.200000e+01 : f32
    %251 = vector.broadcast %cst_85 : f32 to vector<16x1xf32>
    %252 = arith.divf %250, %251 : vector<16x1xf32>
    %253 = vector.broadcast %252 : vector<16x1xf32> to vector<16x32xf32>
    %254 = arith.subf %248, %253 : vector<16x32xf32>
    %255 = arith.mulf %254, %254 : vector<16x32xf32>
    %cst_86 = arith.constant dense<0.000000e+00> : vector<16xf32>
    %256 = vector.multi_reduction <add>, %255, %cst_86 [1] : vector<16x32xf32> to vector<16xf32>
    %257 = vector.shape_cast %256 : vector<16xf32> to vector<16x1xf32>
    %cst_87 = arith.constant 3.200000e+01 : f32
    %258 = vector.broadcast %cst_87 : f32 to vector<16x1xf32>
    %259 = arith.divf %257, %258 : vector<16x1xf32>
    %260 = vector.broadcast %252 : vector<16x1xf32> to vector<16x32xf32>
    %261 = arith.subf %248, %260 : vector<16x32xf32>
    %cst_88 = arith.constant 9.99999996E-13 : f32
    %262 = vector.broadcast %cst_88 : f32 to vector<16x1xf32>
    %263 = arith.addf %259, %262 : vector<16x1xf32>
    %264 = math.rsqrt %263 : vector<16x1xf32>
    %265 = vector.broadcast %264 : vector<16x1xf32> to vector<16x32xf32>
    %266 = arith.mulf %261, %265 : vector<16x32xf32>
    %267 = vector.broadcast %159 : vector<1x32xf32> to vector<16x32xf32>
    %268 = arith.mulf %266, %267 : vector<16x32xf32>
    %269 = vector.broadcast %160 : vector<1x32xf32> to vector<16x32xf32>
    %270 = arith.addf %268, %269 : vector<16x32xf32>
    %271 = vector.shape_cast %270 : vector<16x32xf32> to vector<2x8x32xf32>
    %272 = vector.extract_strided_slice %271 {offsets = [0, 0, 0], sizes = [2, 1, 32], strides = [1, 1, 1]} : vector<2x8x32xf32> to vector<2x1x32xf32>
    %273 = vector.shape_cast %272 : vector<2x1x32xf32> to vector<2x32xf32>
    %c0_89 = arith.constant 0 : index
    %c0_90 = arith.constant 0 : index
    %274 = vector.load %arg10[%c0_89, %c0_90] : memref<2x32xf32, #tpu.memory_space<vmem>>, vector<2x32xf32>
    tpu.vector_store %arg10[%c0_89, %c0_90], %273 {strides = array<i32>} : memref<2x32xf32, #tpu.memory_space<vmem>>, vector<2x32xf32>,
    return
  }
  func.func @transform_0(%arg0: i32) -> (i32, i32) {
    %c0_i32 = arith.constant 0 : i32
    %c0_i32_0 = arith.constant 0 : i32
    %c0_i32_1 = arith.constant 0 : i32
    return %c0_i32, %c0_i32_0 : i32, i32
  }
  func.func @transform_1(%arg0: i32) -> (i32, i32, i32) {
    %c0_i32 = arith.constant 0 : i32
    %c0_i32_0 = arith.constant 0 : i32
    %c0_i32_1 = arith.constant 0 : i32
    %c0_i32_2 = arith.constant 0 : i32
    return %c0_i32, %c0_i32_0, %c0_i32_1 : i32, i32, i32
  }
  func.func @transform_2(%arg0: i32) -> (i32, i32) {
    %c0_i32 = arith.constant 0 : i32
    %c0_i32_0 = arith.constant 0 : i32
    %c0_i32_1 = arith.constant 0 : i32
    return %c0_i32, %c0_i32_0 : i32, i32
  }
  func.func @transform_3(%arg0: i32) -> (i32, i32, i32) {
    %c0_i32 = arith.constant 0 : i32
    %c0_i32_0 = arith.constant 0 : i32
    %c0_i32_1 = arith.constant 0 : i32
    %c0_i32_2 = arith.constant 0 : i32
    return %c0_i32, %c0_i32_0, %c0_i32_1 : i32, i32, i32
  }
  func.func @transform_4(%arg0: i32) -> (i32, i32, i32) {
    %c0_i32 = arith.constant 0 : i32
    %c0_i32_0 = arith.constant 0 : i32
    %c0_i32_1 = arith.constant 0 : i32
    %c0_i32_2 = arith.constant 0 : i32
    return %c0_i32, %c0_i32_0, %c0_i32_1 : i32, i32, i32
  }
  func.func @transform_5(%arg0: i32) -> (i32, i32, i32) {
    %c0_i32 = arith.constant 0 : i32
    %c0_i32_0 = arith.constant 0 : i32
    %c0_i32_1 = arith.constant 0 : i32
    %c0_i32_2 = arith.constant 0 : i32
    return %c0_i32, %c0_i32_0, %c0_i32_1 : i32, i32, i32
  }
  func.func @transform_6(%arg0: i32) -> (i32, i32, i32) {
    %c0_i32 = arith.constant 0 : i32
    %c0_i32_0 = arith.constant 0 : i32
    %c0_i32_1 = arith.constant 0 : i32
    %c0_i32_2 = arith.constant 0 : i32
    return %c0_i32, %c0_i32_0, %c0_i32_1 : i32, i32, i32
  }
  func.func @transform_7(%arg0: i32) -> (i32, i32, i32) {
    %c0_i32 = arith.constant 0 : i32
    %c0_i32_0 = arith.constant 0 : i32
    %c0_i32_1 = arith.constant 0 : i32
    %c0_i32_2 = arith.constant 0 : i32
    return %c0_i32, %c0_i32_0, %c0_i32_1 : i32, i32, i32
  }
  func.func @transform_8(%arg0: i32) -> (i32, i32, i32) {
    %c0_i32 = arith.constant 0 : i32
    %c0_i32_0 = arith.constant 0 : i32
    %c0_i32_1 = arith.constant 0 : i32
    %c0_i32_2 = arith.constant 0 : i32
    return %c0_i32, %c0_i32_0, %c0_i32_1 : i32, i32, i32
  }
  func.func @transform_9(%arg0: i32) -> (i32, i32) {
    %c0_i32 = arith.constant 0 : i32
    %c0_i32_0 = arith.constant 0 : i32
    %c0_i32_1 = arith.constant 0 : i32
    return %c0_i32, %c0_i32_0 : i32, i32
  }
}

</mosaic_0001>

<bundles_post_ra>
// kernel: text_encoder_forward.1
= control target key start
LH: loop header
LB: loop body
LE: loop exit
PB: predicated region body
PF: predicated region fallthrough
CT: control target
= control target key end

     0   :  { %vm45_vm0 = vcmask 261120   ;;  %s6135_s0 = inlined_call_operand.vmem [shape: f32[16,32], index: 0, kind: input, shape index: {}]   ;;  %s6136_s1 = inlined_call_operand.vmem [shape: f32[8,1,8], index: 1, kind: input, shape index: {}]   ;;  %s6137_s2 = inlined_call_operand.vmem [shape: f32[2,32], index: 2, kind: input, shape index: {}]   ;;  %s6138_s3 = inlined_call_operand.vmem [shape: bf16[2,32,96], index: 3, kind: input, shape index: {}]   ;;  %s6139_s4 = inlined_call_operand.vmem [shape: bf16[2,32,32], index: 4, kind: input, shape index: {}]   ;;  %s6140_s5 = inlined_call_operand.vmem [shape: bf16[2,32,64], index: 5, kind: input, shape index: {}]   ;;  %s6141_s6 = inlined_call_operand.vmem [shape: bf16[2,64,32], index: 6, kind: input, shape index: {}]   ;;  %s6142_s7 = inlined_call_operand.vmem [shape: f32[2,6,32], index: 7, kind: input, shape index: {}]   ;;  %s6143_s8 = inlined_call_operand.vmem [shape: f32[2,2,96], index: 8, kind: input, shape index: {}]   ;;  %s6144_s9 = inlined_call_operand.hbm [shape: f32[2,32], index: 9, kind: output, shape index: {}]  }
   0x1   :  { %v43_v0 = vld [vmem:[%s6135_s0] sm:$0xff]  ;;  %v44_v1 = vld [vmem:[%s6135_s0 + $0x8] sm:$0xff] }
   0x2   :  { %v46_v2 = vsel %vm45_vm0, %v43_v0, 0.0  ;;  %v49_v3 = vsel %vm45_vm0, %v44_v1, 0.0 }
   0x3   :  { %47 = vadd.xlane.f32.xlu0 %v46_v2 }
   0x7   :  { %50 = vadd.xlane.f32.xlu0 %v49_v3 }
   0x8   :  { %14 = vsyncpa [#allocation3], 0  ;;  %v5028_v14 = vld [vmem:[%s6138_s3] sm:$0xff]   ;;  %v5174_v15 = vmov 0.0   ;;  %v5029_v16 = vld [vmem:[%s6138_s3 + $0x8] sm:$0xff]   ;;  %vm5175_vm1 = vmmov 0   ;;  %v73_v21 = vlaneseq }
   0x9   :  { %4744 = vmatprep.subr.bf16.mxu1 %v5174_v15  ;;  %4758 = vmatprep.subr.bf16.mxu0 %v5174_v15  ;;  %v42_v26 = vld [vmem:[%s6137_s2] sm:$0x3]  ;;  %s5176_s19 = smov 112   ;;  %s5177_s20 = smov 120   ;;  %v5183_v50 = vmov 1983009808  }
   0xa   :  { %4745 = vmatpush3.bf16.msra.mxu1 %v5028_v14  ;;  %4748 = vmatprep.mubr.msk.bf16.mxu1 %vm5175_vm1, %v5174_v15  ;;  %v5268_v24 = vshrl.u32 %v73_v21, 7  ;;  %v86_v39 = vld [vmem:[%s6143_s8] sm:$0x3]  ;;  %s5178_s21 = smov 104   ;;  %s5179_s22 = smov 88   ;;  %v233_v51 = vunpack.c.l.s4 %v5183_v50  ;;  %vm854_vm2 = vcmask 64512  }
   0xb   :  { %4746 = vmatprep.subr.bf16.mxu1 %v5174_v15  ;;  %4760 = vmatprep.mubr.msk.bf16.mxu0 %vm5175_vm1, %v5174_v15  ;;  %s5180_s23 = smov 96   ;;  %s5181_s24 = smov 72   ;;  %v5184_v55 = vmov 1934713408   ;;  %vm1322_vm3 = vcmask 1043456   ;;  %vm2009_vm4 = vcmask 130048  }
   0xc   :  { %v5271_v25 = vsub.s32 0, %v5268_v24  ;;  %v5278_v30 = vsub.s32 1, %v5268_v24  ;;  %s5182_s25 = smov 80   ;;  %v234_v54 = vunpack.c.0.s8 %v233_v51  ;;  %v295_v56 = vunpack.c.l.s4 %v5184_v55  ;;  %s5186_s26 = smov 64  }
   0xd   :  { %s5187_s27 = smov 48   ;;  %s5188_s28 = smov 40   ;;  %vm2012_vm5 = vcmask 195584   ;;  %vm2238_vm6 = vcmask 523264   ;;  %vm4511_vm7 = vcmask 1041409   ;;  %vm4514_vm8 = vcmask 254976  }
   0xe   :  { %4747 = vmatpush3.bf16.msra.mxu1 %v5029_v16  ;;  %v76_v29 = vrot.slane %v42_v26, %v5271_v25  ;;  %v82_v34 = vrot.slane %v42_v26, %v5278_v30  ;;  %v95_v40 = vrot.slane %v86_v39, %v5271_v25  ;;  %v5311_v63 = vsub.s32 %v234_v54, %v5268_v24  ;;  %s5189_s29 = smov 56   ;;  %s5190_s0 = smov 16  }
   0xf   :  { %4752 = vmatprep.subr.bf16.mxu1 %v5174_v15  ;;  %s5191_s13 = smov 8   ;;  %s5192_s14 = smov 24  }
  0x90   :  { %v48_v4 = vpop.xlane.xlu0 %47 }
  0x91   :  { %v53_v5 = vmul.f32 0.03125, %v48_v4 }
  0x93   :  { %v55_v6 = vsub.f32 %v43_v0, %v53_v5  ;;  %v296_v0 = vunpack.c.0.s8 %v295_v56 }
  0x94   :  { %v51_v7 = vpop.xlane.xlu0 %50 }
  0x95   :  { %v54_v8 = vmul.f32 0.03125, %v51_v7  ;;  %v57_v9 = vmul.f32 %v55_v6, %v55_v6 }
  0x97   :  { %v56_v10 = vsub.f32 %v44_v1, %v54_v8  ;;  %v59_v11 = vsel %vm45_vm0, %v57_v9, 0.0 }
  0x98   :  { %60 = vadd.xlane.f32.xlu1 %v59_v11 }
  0x99   :  { %v58_v12 = vmul.f32 %v56_v10, %v56_v10 }
  0x9b   :  { %v62_v13 = vsel %vm45_vm0, %v58_v12, 0.0 }
  0x9c   :  { %63 = vadd.xlane.f32.xlu1 %v62_v13 }
 0x125   :  { %v61_v17 = vpop.xlane.xlu1 %60 }
 0x126   :  { %v65_v18 = vmul.f32 0.03125, %v61_v17 }
 0x128   :  { %v67_v19 = vadd.f32 1e-12, %v65_v18  ;;  %v5316_v18 = vsub.s32 %v296_v0, %v5268_v24 }
 0x129   :  { %v64_v20 = vpop.xlane.xlu1 %63 }
 0x12a   :  { %5048 = vrsqrt.f32 %v67_v19  ;;  %v66_v22 = vmul.f32 0.03125, %v64_v20 }
 0x12c   :  { %v68_v23 = vadd.f32 1e-12, %v66_v22 }
 0x12e   :  { %5050 = vrsqrt.f32 %v68_v23 }
 0x134   :  { %v5049_v27 = vpop.eup %5048 }
 0x135   :  { %v71_v28 = vmul.f32 %v5049_v27, %v55_v6 }
 0x137   :  { %v77_v33 = vmul.f32 %v76_v29, %v71_v28 }
 0x138   :  { %v5051_v31 = vpop.eup %5050 }
 0x139   :  { %v72_v32 = vmul.f32 %v5051_v31, %v56_v10  ;;  %v5281_v36 = vadd.f32 %v82_v34, %v77_v33 }
 0x13b   :  { %v78_v35 = vmul.f32 %v76_v29, %v72_v32 }
 0x13d   :  { %v5283_v37 = vadd.f32 %v82_v34, %v78_v35 }
 0x13f   :  { %v87_v38 = vpack.c.bf16 %v5283_v37, %v5281_v36 }
 0x141   :  { %4749 = vmatmul.mubr.msk.bf16.vlgmr.msra.gmra.mrb[0].mxu1 %vm45_vm0, %v87_v38 }
 0x142   :  { %4754 = vmatprep.mubr.msk.bf16.mxu1 %vm5175_vm1, %v5174_v15 }
 0x214   :  { %v145_v41 = vpop.f32.mrb[0].mxu1 }
 0x215   :  { %v4750_v42 = vpop.f32.mrb[1].mxu1  ;;  %v146_v44 = vadd.f32 %v145_v41, %v95_v40 }
 0x216   :  { %v148_v43 = vpop.f32.mrb[2].mxu1 }
 0x217   :  { %v149_v45 = vadd.f32 %v148_v43, %v95_v40  ;;  %v4751_v46 = vpop.f32.mrb[3].mxu1 }
 0x219   :  { %v5294_v47 = vpack.c.bf16 %v149_v45, %v146_v44 }
 0x21b   :  { %156 = vrot.lane.b32.xlu1 %v5294_v47, %s5176_s19  ;;  %154 = vrot.lane.b32.xlu0 %v5294_v47, %s5177_s20  ;;  %v180_v5 = vshrl.u32 %v5294_v47, 16 }
 0x21f   :  { %158 = vrot.lane.b32.xlu1 %v5294_v47, %s5178_s21  ;;  %162 = vrot.lane.b32.xlu0 %v5294_v47, %s5179_s22 }
 0x223   :  { %160 = vrot.lane.b32.xlu1 %v5294_v47, %s5180_s23  ;;  %166 = vrot.lane.b32.xlu0 %v5294_v47, %s5181_s24 }
 0x227   :  { %164 = vrot.lane.b32.xlu1 %v5294_v47, %s5182_s25 }
 0x28d   :  { %v157_v48 = vpop.permute.xlu1 %156  ;;  %v155_v49 = vpop.permute.xlu0 %154 }
 0x28e   :  { %v181_v60 = vshrl.u32 %v155_v49, 16  ;;  %v178_v1 = vpack.i.b16 %v155_v49, %v5294_v47  ;;  %v188_v4 = vshrl.u32 %v157_v48, 16 }
 0x290   :  { %v182_v12 = vpack.i.b16 %v181_v60, %v180_v5 }
 0x291   :  { %v159_v52 = vpop.permute.xlu1 %158  ;;  %v163_v53 = vpop.permute.xlu0 %162 }
 0x292   :  { %v197_v61 = vshrl.u32 %v163_v53, 16  ;;  %v189_v2 = vshrl.u32 %v159_v52, 16  ;;  %v186_v6 = vpack.i.b16 %v159_v52, %v157_v48 }
 0x294   :  { %v190_v13 = vpack.i.b16 %v189_v2, %v188_v4 }
 0x295   :  { %v161_v57 = vpop.permute.xlu1 %160  ;;  %v167_v62 = vpop.permute.xlu0 %166 }
 0x296   :  { %v196_v58 = vshrl.u32 %v161_v57, 16  ;;  %v194_v59 = vpack.i.b16 %v163_v53, %v161_v57  ;;  %v205_v9 = vshrl.u32 %v167_v62, 16 }
 0x298   :  { %v198_v7 = vpack.i.b16 %v197_v61, %v196_v58  ;;  %v230_v8 = vcombine.low %v178_v1, %v194_v59  ;;  %v231_v19 = vcombine.high %v178_v1, %v194_v59 }
 0x299   :  { %v165_v3 = vpop.permute.xlu1 %164 }
 0x29a   :  { %v202_v10 = vpack.i.b16 %v167_v62, %v165_v3  ;;  %v204_v11 = vshrl.u32 %v165_v3, 16  ;;  %v364_v20 = vcombine.low %v182_v12, %v198_v7  ;;  %v365_v21 = vcombine.high %v182_v12, %v198_v7 }
 0x29b   :  { %v238_v22 = vrot.slane %v230_v8, %v5311_v63  ;;  %v245_v38 = vrot.slane %v231_v19, %v5311_v63 }
 0x29c   :  { %v206_v14 = vpack.i.b16 %v205_v9, %v204_v11  ;;  %v246_v16 = vcombine.low %v186_v6, %v202_v10  ;;  %v247_v17 = vcombine.high %v186_v6, %v202_v10  ;;  %v372_v32 = vrot.slane %v364_v20, %v5311_v63 }
 0x29d   :  { %v379_v33 = vrot.slane %v365_v21, %v5311_v63 }
 0x29e   :  { %v254_v23 = vrot.slane %v246_v16, %v5311_v63  ;;  %v380_v26 = vcombine.low %v190_v13, %v206_v14  ;;  %v381_v27 = vcombine.high %v190_v13, %v206_v14  ;;  %v261_v28 = vrot.slane %v247_v17, %v5311_v63 }
 0x29f   :  { %v5185_v14 = vmov 0  }
 0x2a0   :  { %v292_v29 = vcombine.low %v238_v22, %v254_v23  ;;  %v293_v31 = vcombine.high %v238_v22, %v254_v23  ;;  %v388_v34 = vrot.slane %v380_v26, %v5311_v63  ;;  %v395_v35 = vrot.slane %v381_v27, %v5311_v63 }
 0x2a1   :  { %v308_v45 = vcombine.low %v245_v38, %v261_v28  ;;  %v309_v46 = vcombine.high %v245_v38, %v261_v28 }
 0x2a2   :  { %v300_v39 = vrot.slane %v292_v29, %v5316_v18  ;;  %v307_v40 = vrot.slane %v293_v31, %v5316_v18  ;;  %v426_v41 = vcombine.low %v372_v32, %v388_v34  ;;  %v427_v42 = vcombine.high %v372_v32, %v388_v34 }
 0x2a3   :  { %v442_v43 = vcombine.low %v379_v33, %v395_v35  ;;  %v443_v44 = vcombine.high %v379_v33, %v395_v35  ;;  %v316_v58 = vrot.slane %v308_v45, %v5316_v18  ;;  %v323_v59 = vrot.slane %v309_v46, %v5316_v18 }
 0x2a4   :  { %v4533_v48 = vcombine.low %v300_v39, %v307_v40  ;;  %v4535_v49 = vcombine.high %v300_v39, %v307_v40  ;;  %v434_v50 = vrot.slane %v426_v41, %v5316_v18  ;;  %v441_v51 = vrot.slane %v427_v42, %v5316_v18 }
 0x2a5   :  { %v450_v52 = vrot.slane %v442_v43, %v5316_v18  ;;  %v457_v53 = vrot.slane %v443_v44, %v5316_v18  ;;  %v4541_v4 = vcombine.low %v316_v58, %v323_v59  ;;  %v4543_v5 = vcombine.high %v316_v58, %v323_v59 }
 0x2a6   :  { %v506_v54 = vrot.slane %v4533_v48, %v5311_v63  ;;  %v522_v55 = vrot.slane %v4535_v49, %v5311_v63  ;;  %v4537_v56 = vcombine.low %v434_v50, %v441_v51  ;;  %v4539_v57 = vcombine.high %v434_v50, %v441_v51 }
 0x2a7   :  { %v4545_v0 = vcombine.low %v450_v52, %v457_v53  ;;  %v4547_v1 = vcombine.high %v450_v52, %v457_v53  ;;  %v624_v17 = vrot.slane %v4541_v4, %v5311_v63  ;;  %v640_v19 = vrot.slane %v4543_v5, %v5311_v63 }
 0x2a8   :  { %v531_v60 = vcombine.high %v506_v54, %v522_v55  ;;  %v565_v61 = vrot.slane %v4537_v56, %v5311_v63  ;;  %v581_v62 = vrot.slane %v4539_v57, %v5311_v63  ;;  %v530_v8 = vcombine.low %v506_v54, %v522_v55 }
 0x2a9   :  { %v683_v9 = vrot.slane %v4545_v0, %v5311_v63  ;;  %v699_v10 = vrot.slane %v4547_v1, %v5311_v63  ;;  %v649_v34 = vcombine.high %v624_v17, %v640_v19  ;;  %v648_v53 = vcombine.low %v624_v17, %v640_v19 }
 0x2aa   :  { %v545_v2 = vrot.slane %v531_v60, %v5316_v18  ;;  %v590_v3 = vcombine.high %v565_v61, %v581_v62  ;;  %v589_v6 = vcombine.low %v565_v61, %v581_v62  ;;  %v538_v27 = vrot.slane %v530_v8, %v5316_v18 }
 0x2ab   :  { %v708_v29 = vcombine.high %v683_v9, %v699_v10  ;;  %v663_v44 = vrot.slane %v649_v34, %v5316_v18  ;;  %v707_v49 = vcombine.low %v683_v9, %v699_v10  ;;  %v656_v0 = vrot.slane %v648_v53, %v5316_v18  ;;  %v4553_v53 = vld [vmem:[%s6136_s1 + $0x4] ss:$0 sm:$0xff] }
 0x2ac   :  { %v604_v7 = vrot.slane %v590_v3, %v5316_v18  ;;  %v749_v12 = vshrl.u32 %v545_v2, 16  ;;  %v597_v22 = vrot.slane %v589_v6, %v5316_v18  ;;  %v555_v23 = vcombine.high %v545_v2, %v5185_v14 }
 0x2ad   :  { %v737_v38 = vshrl.u32 %v538_v27, 16  ;;  %v722_v40 = vrot.slane %v708_v29, %v5316_v18  ;;  %v554_v46 = vcombine.high %v538_v27, %v5185_v14  ;;  %v785_v52 = vshrl.u32 %v663_v44, 16 }
 0x2ae   :  { %v748_v11 = vpack.i.b16 %v604_v7, %v545_v2  ;;  %v750_v13 = vshrl.u32 %v604_v7, 16  ;;  %v614_v16 = vcombine.high %v604_v7, %v5185_v14  ;;  %v738_v32 = vshrl.u32 %v597_v22, 16 }
 0x2af   :  { %v755_v33 = vshrl.u32 %v555_v23, 16  ;;  %v736_v35 = vpack.i.b16 %v597_v22, %v538_v27  ;;  %v613_v43 = vcombine.high %v597_v22, %v5185_v14  ;;  %v786_v48 = vshrl.u32 %v722_v40, 16  ;;  %v4550_v22 = vld [vmem:[%s6136_s1 + $0x1] ss:$0 sm:$0xff] }
 0x2b0   :  { %v859_v20 = vsel %vm854_vm2, %v748_v11, 0  ;;  %v751_v21 = vpack.i.b16 %v750_v13, %v749_v12  ;;  %v756_v28 = vshrl.u32 %v614_v16, 16  ;;  %v754_v31 = vpack.i.b16 %v614_v16, %v555_v23 }
 0x2b1   :  { %4753 = vmatpush3.bf16.xpose.msra.mxu1 %v859_v20  ;;  %v739_v42 = vpack.i.b16 %v738_v32, %v737_v38  ;;  %v784_v50 = vpack.i.b16 %v722_v40, %v663_v44  ;;  %v744_v51 = vshrl.u32 %v613_v43, 16  ;;  %v742_v54 = vpack.i.b16 %v613_v43, %v554_v46  ;;  %v4549_v20 = vld [vmem:[%s6136_s1] ss:$0 sm:$0xff] }
 0x2b2   :  { %v905_v26 = vsel %vm854_vm2, %v751_v21, 0  ;;  %4764 = vmatprep.subr.bf16.mxu1 %v5174_v15  ;;  %v757_v39 = vpack.i.b16 %v756_v28, %v755_v33  ;;  %v951_v41 = vsel %vm854_vm2, %v754_v31, 0  ;;  %v743_v55 = vshrl.u32 %v554_v46, 16 }
 0x2b3   :  { %4759 = vmatpush3.bf16.xpose.msra.mxu0 %v905_v26  ;;  %v787_v56 = vpack.i.b16 %v786_v48, %v785_v52  ;;  %v732_v57 = vcombine.high %v722_v40, %v5185_v14  ;;  %v1043_v58 = vsel %vm854_vm2, %v784_v50, 0  ;;  %v715_v60 = vrot.slane %v707_v49, %v5316_v18 }
 0x2b4   :  { %4770 = vmatprep.subr.bf16.mxu0 %v5174_v15  ;;  %v997_v45 = vsel %vm854_vm2, %v757_v39, 0  ;;  %v745_v59 = vpack.i.b16 %v744_v51, %v743_v55  ;;  %v673_v61 = vcombine.high %v663_v44, %v5185_v14  ;;  %v773_v6 = vshrl.u32 %v656_v0, 16  ;;  %v4551_v39 = vld [vmem:[%s6136_s1 + $0x2] ss:$0 sm:$0xff] }
 0x2b5   :  { %v1089_v62 = vsel %vm854_vm2, %v787_v56, 0  ;;  %v792_v1 = vshrl.u32 %v732_v57, 16  ;;  %v774_v3 = vshrl.u32 %v715_v60, 16  ;;  %v772_v5 = vpack.i.b16 %v715_v60, %v656_v0  ;;  %v4554_v56 = vld [vmem:[%s6136_s1 + $0x5] ss:$0 sm:$0xff] }
 0x2b6   :  { %v790_v2 = vpack.i.b16 %v732_v57, %v673_v61  ;;  %v791_v4 = vshrl.u32 %v673_v61, 16  ;;  %v731_v10 = vcombine.high %v715_v60, %v5185_v14  ;;  %v672_v12 = vcombine.high %v656_v0, %v5185_v14 }
 0x2b7   :  { %v775_v9 = vpack.i.b16 %v774_v3, %v773_v6 }
 0x2b8   :  { %4755 = vmatmul.mubr.msk.bf16.vlgmr.msra.gmra.mrb[4].mxu1 %vm854_vm2, %v736_v35  ;;  %v793_v7 = vpack.i.b16 %v792_v1, %v791_v4  ;;  %v1135_v8 = vsel %vm854_vm2, %v790_v2, 0  ;;  %v780_v13 = vshrl.u32 %v731_v10, 16  ;;  %v778_v16 = vpack.i.b16 %v731_v10, %v672_v12 }
 0x2b9   :  { %4765 = vmatpush3.bf16.xpose.msra.mxu1 %v951_v41  ;;  %4766 = vmatprep.mubr.msk.bf16.mxu1 %vm5175_vm1, %v5174_v15  ;;  %v779_v17 = vshrl.u32 %v672_v12, 16  ;;  %v4552_v41 = vld [vmem:[%s6136_s1 + $0x3] ss:$0 sm:$0xff] }
 0x2ba   :  { %4761 = vmatmul.mubr.msk.bf16.vlgmr.msra.gmra.mrb[0].mxu0 %vm854_vm2, %v739_v42  ;;  %4776 = vmatprep.subr.bf16.mxu1 %v5174_v15  ;;  %v1181_v11 = vsel %vm854_vm2, %v793_v7, 0  ;;  %v4556_v7 = vld [vmem:[%s6136_s1 + $0x7] ss:$0 sm:$0xff] }
 0x2bb   :  { %4771 = vmatpush3.bf16.xpose.msra.mxu0 %v997_v45  ;;  %4772 = vmatprep.mubr.msk.bf16.mxu0 %vm5175_vm1, %v5174_v15  ;;  %v781_v19 = vpack.i.b16 %v780_v13, %v779_v17 }
 0x2bc   :  { %4782 = vmatprep.subr.bf16.mxu0 %v5174_v15 }
 0x2c0   :  { %4767 = vmatmul.mubr.msk.bf16.vlgmr.msra.gmra.mrb[8].mxu1 %vm854_vm2, %v742_v54 }
 0x2c1   :  { %4777 = vmatpush3.bf16.xpose.msra.mxu1 %v1043_v58  ;;  %4778 = vmatprep.mubr.msk.bf16.mxu1 %vm5175_vm1, %v5174_v15 }
 0x2c2   :  { %4773 = vmatmul.mubr.msk.bf16.vlgmr.msra.gmra.mrb[4].mxu0 %vm854_vm2, %v745_v59  ;;  %4788 = vmatprep.subr.bf16.mxu1 %v5174_v15 }
 0x2c3   :  { %4783 = vmatpush3.bf16.xpose.msra.mxu0 %v1089_v62  ;;  %4784 = vmatprep.mubr.msk.bf16.mxu0 %vm5175_vm1, %v5174_v15 }
 0x2c4   :  { %4794 = vmatprep.subr.bf16.mxu0 %v5174_v15 }
 0x2c8   :  { %4779 = vmatmul.mubr.msk.bf16.vlgmr.msra.gmra.mrb[12].mxu1 %vm854_vm2, %v772_v5  ;;  %v4555_v5 = vld [vmem:[%s6136_s1 + $0x6] ss:$0 sm:$0xff] }
 0x2c9   :  { %4789 = vmatpush3.bf16.xpose.msra.mxu1 %v1135_v8  ;;  %4790 = vmatprep.mubr.msk.bf16.mxu1 %vm5175_vm1, %v5174_v15 }
 0x2ca   :  { %4785 = vmatmul.mubr.msk.bf16.vlgmr.msra.gmra.mrb[8].mxu0 %vm854_vm2, %v775_v9  ;;  %4800 = vmatprep.subr.bf16.mxu1 %v5174_v15 }
 0x2cb   :  { %4795 = vmatpush3.bf16.xpose.msra.mxu0 %v1181_v11  ;;  %4796 = vmatprep.mubr.msk.bf16.mxu0 %vm5175_vm1, %v5174_v15 }
 0x2cc   :  { %4806 = vmatprep.subr.bf16.mxu0 %v5174_v15 }
 0x2d0   :  { %4791 = vmatmul.mubr.msk.bf16.vlgmr.msra.gmra.mrb[16].mxu1 %vm854_vm2, %v778_v16 }
 0x2d1   :  { %4802 = vmatprep.mubr.msk.bf16.mxu1 %vm5175_vm1, %v5174_v15 }
 0x2d2   :  { %4797 = vmatmul.mubr.msk.bf16.vlgmr.msra.gmra.mrb[12].mxu0 %vm854_vm2, %v781_v19 }
 0x2d3   :  { %4808 = vmatprep.mubr.msk.bf16.mxu0 %vm5175_vm1, %v5174_v15 }
 0x38b   :  { %v895_v21 = vpop.f32.mrb[4].mxu1 }
 0x38c   :  { %v5404_v23 = vadd.f32 %v4549_v20, %v895_v21  ;;  %v4756_v26 = vpop.f32.mrb[5].mxu1 }
 0x38d   :  { %v898_v27 = vpop.f32.mrb[6].mxu1  ;;  %v941_v28 = vpop.f32.mrb[0].mxu0 }
 0x38e   :  { %v5406_v29 = vadd.f32 %v4550_v22, %v941_v28  ;;  %v4757_v31 = vpop.f32.mrb[7].mxu1  ;;  %v4762_v32 = vpop.f32.mrb[1].mxu0  ;;  %v1223_v33 = vsel %vm854_vm2, %v5404_v23, -inf }
 0x38f   :  { %v944_v34 = vpop.f32.mrb[2].mxu0  ;;  %1224 = vmax.xlane.f32.xlu1 %v1223_v33 }
 0x390   :  { %v4763_v35 = vpop.f32.mrb[3].mxu0  ;;  %v1226_v38 = vsel %vm854_vm2, %v5406_v29, -inf }
 0x391   :  { %1227 = vmax.xlane.f32.xlu0 %v1226_v38 }
 0x393   :  { %v987_v40 = vpop.f32.mrb[8].mxu1 }
 0x394   :  { %v5418_v42 = vadd.f32 %v4551_v39, %v987_v40  ;;  %v4768_v43 = vpop.f32.mrb[9].mxu1 }
 0x395   :  { %v990_v44 = vpop.f32.mrb[10].mxu1  ;;  %v1033_v45 = vpop.f32.mrb[4].mxu0 }
 0x396   :  { %v5420_v46 = vadd.f32 %v4552_v41, %v1033_v45  ;;  %v4769_v48 = vpop.f32.mrb[11].mxu1  ;;  %v4774_v49 = vpop.f32.mrb[5].mxu0  ;;  %v1229_v50 = vsel %vm854_vm2, %v5418_v42, -inf }
 0x397   :  { %v1036_v51 = vpop.f32.mrb[6].mxu0  ;;  %1230 = vmax.xlane.f32.xlu0 %v1229_v50 }
 0x398   :  { %v4775_v52 = vpop.f32.mrb[7].mxu0  ;;  %v1232_v54 = vsel %vm854_vm2, %v5420_v46, -inf }
 0x39b   :  { %v1079_v55 = vpop.f32.mrb[12].mxu1  ;;  %1233 = vmax.xlane.f32.xlu0 %v1232_v54 }
 0x39c   :  { %v5432_v57 = vadd.f32 %v4553_v53, %v1079_v55  ;;  %v4780_v58 = vpop.f32.mrb[13].mxu1 }
 0x39d   :  { %v1082_v59 = vpop.f32.mrb[14].mxu1  ;;  %v1125_v60 = vpop.f32.mrb[8].mxu0 }
 0x39e   :  { %v5434_v61 = vadd.f32 %v4554_v56, %v1125_v60  ;;  %v4781_v62 = vpop.f32.mrb[15].mxu1  ;;  %v4786_v0 = vpop.f32.mrb[9].mxu0  ;;  %v1235_v1 = vsel %vm854_vm2, %v5432_v57, -inf }
 0x39f   :  { %v1128_v2 = vpop.f32.mrb[10].mxu0  ;;  %1236 = vmax.xlane.f32.xlu1 %v1235_v1 }
 0x3a0   :  { %v4787_v3 = vpop.f32.mrb[11].mxu0  ;;  %v1238_v4 = vsel %vm854_vm2, %v5434_v61, -inf }
 0x3a1   :  { %1239 = vmax.xlane.f32.xlu0 %v1238_v4 }
 0x3a3   :  { %v1171_v6 = vpop.f32.mrb[16].mxu1 }
 0x3a4   :  { %v1172_v8 = vadd.f32 %v4555_v5, %v1171_v6  ;;  %v4792_v9 = vpop.f32.mrb[17].mxu1 }
 0x3a5   :  { %v1174_v10 = vpop.f32.mrb[18].mxu1  ;;  %v1217_v11 = vpop.f32.mrb[12].mxu0 }
 0x3a6   :  { %v1218_v12 = vadd.f32 %v4556_v7, %v1217_v11  ;;  %v4793_v13 = vpop.f32.mrb[19].mxu1  ;;  %v4798_v16 = vpop.f32.mrb[13].mxu0  ;;  %v1241_v17 = vsel %vm854_vm2, %v1172_v8, -inf }
 0x3a7   :  { %v1220_v19 = vpop.f32.mrb[14].mxu0  ;;  %1242 = vmax.xlane.f32.xlu1 %v1241_v17 }
 0x3a8   :  { %v4799_v20 = vpop.f32.mrb[15].mxu0  ;;  %v1244_v21 = vsel %vm854_vm2, %v1218_v12, -inf }
 0x3a9   :  { %1245 = vmax.xlane.f32.xlu0 %v1244_v21 }
 0x3b8   :  { %168 = vrot.lane.b32.xlu1 %v5294_v47, %s5186_s26 }
 0x41c   :  { %v1225_v22 = vpop.xlane.xlu1 %1224 }
 0x41d   :  { %v1247_v26 = vsub.f32 %v5404_v23, %v1225_v22 }
 0x41e   :  { %v1228_v27 = vpop.xlane.xlu0 %1227 }
 0x41f   :  { %v1255_v28 = vmul.f32 1.442695, %v1247_v26  ;;  %v1248_v31 = vsub.f32 %v5406_v29, %v1228_v27 }
 0x421   :  { %5052 = vpow2.f32 %v1255_v28  ;;  %v1257_v32 = vmul.f32 1.442695, %v1248_v31 }
 0x423   :  { %5054 = vpow2.f32 %v1257_v32 }
 0x424   :  { %v1231_v23 = vpop.xlane.xlu0 %1230 }
 0x425   :  { %v1249_v41 = vsub.f32 %v5418_v42, %v1231_v23 }
 0x427   :  { %v1259_v49 = vmul.f32 1.442695, %v1249_v41 }
 0x428   :  { %v1234_v29 = vpop.xlane.xlu0 %1233 }
 0x429   :  { %v1250_v40 = vsub.f32 %v5420_v46, %v1234_v29 }
 0x42b   :  { %v5452_v33 = vpop.eup %5052  ;;  %v1261_v44 = vmul.f32 1.442695, %v1250_v40 }
 0x42c   :  { %v1271_v34 = vsel %vm854_vm2, %v5452_v33, 0.0  ;;  %v1237_v39 = vpop.xlane.xlu1 %1236 }
 0x42d   :  { %v5456_v35 = vpop.eup %5054  ;;  %1272 = vadd.xlane.f32.xlu1 %v1271_v34  ;;  %v1251_v45 = vsub.f32 %v5432_v57, %v1237_v39  ;;  %5056 = vpow2.f32 %v1261_v44 }
 0x42e   :  { %v1274_v38 = vsel %vm854_vm2, %v5456_v35, 0.0  ;;  %v1240_v48 = vpop.xlane.xlu0 %1239  ;;  %5058 = vpow2.f32 %v1259_v49 }
 0x42f   :  { %1275 = vadd.xlane.f32.xlu0 %v1274_v38  ;;  %v1263_v51 = vmul.f32 1.442695, %v1251_v45  ;;  %v1252_v52 = vsub.f32 %v5434_v61, %v1240_v48 }
 0x431   :  { %5060 = vpow2.f32 %v1263_v51  ;;  %v1265_v54 = vmul.f32 1.442695, %v1252_v52 }
 0x434   :  { %v1243_v43 = vpop.xlane.xlu1 %1242 }
 0x435   :  { %v1253_v50 = vsub.f32 %v1172_v8, %v1243_v43 }
 0x436   :  { %v1246_v53 = vpop.xlane.xlu0 %1245 }
 0x437   :  { %v1254_v55 = vsub.f32 %v1218_v12, %v1246_v53  ;;  %v5470_v46 = vpop.eup %5056 }
 0x438   :  { %v5472_v56 = vpop.eup %5058  ;;  %v1280_v57 = vsel %vm854_vm2, %v5470_v46, 0.0  ;;  %v169_v4 = vpop.permute.xlu1 %168 }
 0x439   :  { %v1269_v42 = vmul.f32 1.442695, %v1254_v55  ;;  %v1277_v59 = vsel %vm854_vm2, %v5472_v56, 0.0  ;;  %v212_v12 = vshrl.u32 %v169_v4, 16 }
 0x43b   :  { %v5476_v58 = vpop.eup %5060 }
 0x43c   :  { %v1283_v61 = vsel %vm854_vm2, %v5476_v58, 0.0 }
 0x43e   :  { %172 = vrot.lane.b32.xlu1 %v5294_v47, %s5187_s27 }
 0x442   :  { %174 = vrot.lane.b32.xlu1 %v5294_v47, %s5188_s28 }
 0x445   :  { %170 = vrot.lane.b32.xlu0 %v5294_v47, %s5189_s29  ;;  %v1267_v47 = vmul.f32 1.442695, %v1253_v50 }
 0x447   :  { %5062 = vpow2.f32 %v1267_v47 }
 0x448   :  { %5064 = vpow2.f32 %v1265_v54 }
 0x449   :  { %5066 = vpow2.f32 %v1269_v42 }
 0x451   :  { %v5480_v60 = vpop.eup %5062 }
 0x452   :  { %v5484_v62 = vpop.eup %5064  ;;  %v1289_v0 = vsel %vm854_vm2, %v5480_v60, 0.0 }
 0x453   :  { %v1286_v1 = vsel %vm854_vm2, %v5484_v62, 0.0  ;;  %v5490_v2 = vpop.eup %5066 }
 0x454   :  { %v1292_v3 = vsel %vm854_vm2, %v5490_v2, 0.0 }
 0x464   :  { %1281 = vadd.xlane.f32.xlu0 %v1280_v57 }
 0x466   :  { %1278 = vadd.xlane.f32.xlu1 %v1277_v59  ;;  %v5518_v59 = vpack.i.b16 %v5185_v14, %v5185_v14 }
 0x468   :  { %1284 = vadd.xlane.f32.xlu0 %v1283_v61 }
 0x46a   :  { %1290 = vadd.xlane.f32.xlu1 %v1289_v0 }
 0x46c   :  { %1287 = vadd.xlane.f32.xlu0 %v1286_v1 }
 0x470   :  { %1293 = vadd.xlane.f32.xlu0 %v1292_v3 }
 0x4ba   :  { %v1273_v5 = vpop.xlane.xlu1 %1272 }
 0x4bb   :  { %5068 = vrcp.f32 %v1273_v5 }
 0x4bc   :  { %v1276_v6 = vpop.xlane.xlu0 %1275 }
 0x4bd   :  { %5070 = vrcp.f32 %v1276_v6 }
 0x4be   :  { %v173_v7 = vpop.permute.xlu1 %172 }
 0x4bf   :  { %v220_v16 = vshrl.u32 %v173_v7, 16 }
 0x4c0   :  { %v171_v8 = vpop.permute.xlu0 %170 }
 0x4c1   :  { %v213_v9 = vshrl.u32 %v171_v8, 16  ;;  %v5494_v10 = vpack.i.b16 %v171_v8, %v169_v4 }
 0x4c2   :  { %v175_v11 = vpop.permute.xlu1 %174 }
 0x4c3   :  { %v5496_v13 = vpack.i.b16 %v175_v11, %v173_v7  ;;  %v221_v17 = vshrl.u32 %v175_v11, 16  ;;  %v214_v19 = vpack.i.b16 %v213_v9, %v212_v12  ;;  %v269_v20 = vrot.slane %v5494_v10, %v5311_v63 }
 0x4c5   :  { %v222_v21 = vpack.i.b16 %v221_v17, %v220_v16  ;;  %v284_v22 = vrot.slane %v5496_v13, %v5311_v63  ;;  %v403_v28 = vrot.slane %v214_v19, %v5311_v63  ;;  %v5069_v53 = vpop.eup %5068  ;;  %v396_v11 = vcombine.high %v214_v19, %v5518_v59 }
 0x4c6   :  { %v1303_v57 = vmul.f32 %v5069_v53, %v5452_v33  ;;  %v277_v12 = vcombine.high %v5496_v13, %v5518_v59 }
 0x4c7   :  { %v324_v26 = vcombine.low %v269_v20, %v284_v22  ;;  %v325_v27 = vcombine.high %v269_v20, %v284_v22  ;;  %v418_v31 = vrot.slane %v222_v21, %v5311_v63  ;;  %v5071_v55 = vpop.eup %5070  ;;  %v411_v5 = vcombine.high %v222_v21, %v5518_v59 }
 0x4c8   :  { %v1304_v4 = vmul.f32 %v5071_v55, %v5456_v35  ;;  %v1311_v17 = vpack.c.bf16 %v1303_v57, %v1303_v57  ;;  %v262_v20 = vcombine.high %v5494_v10, %v5518_v59  ;;  %v410_v13 = vrot.slane %v396_v11, %v5311_v63 }
 0x4c9   :  { %v332_v32 = vrot.slane %v324_v26, %v5316_v18  ;;  %v339_v34 = vrot.slane %v325_v27, %v5316_v18  ;;  %v458_v38 = vcombine.low %v403_v28, %v418_v31  ;;  %v459_v23 = vcombine.high %v403_v28, %v418_v31 }
 0x4ca   :  { %v425_v21 = vrot.slane %v411_v5, %v5311_v63  ;;  %v1312_v22 = vpack.c.bf16 %v1304_v4, %v1304_v4  ;;  %v291_v26 = vrot.slane %v277_v12, %v5311_v63  ;;  %v276_v27 = vrot.slane %v262_v20, %v5311_v63 }
 0x4cb   :  { %v4534_v29 = vcombine.low %v332_v32, %v339_v34  ;;  %v4536_v39 = vcombine.high %v332_v32, %v339_v34  ;;  %v466_v40 = vrot.slane %v458_v38, %v5316_v18  ;;  %v473_v41 = vrot.slane %v459_v23, %v5316_v18 }
 0x4cc   :  { %v474_v28 = vcombine.low %v410_v13, %v425_v21  ;;  %v475_v31 = vcombine.high %v410_v13, %v425_v21  ;;  %v340_v32 = vcombine.low %v276_v27, %v291_v26  ;;  %v341_v34 = vcombine.high %v276_v27, %v291_v26 }
 0x4cd   :  { %v513_v43 = vrot.slane %v4534_v29, %v5311_v63  ;;  %v529_v44 = vrot.slane %v4536_v39, %v5311_v63  ;;  %v4538_v45 = vcombine.low %v466_v40, %v473_v41  ;;  %v4540_v48 = vcombine.high %v466_v40, %v473_v41 }
 0x4ce   :  { %v482_v38 = vrot.slane %v474_v28, %v5316_v18  ;;  %v489_v23 = vrot.slane %v475_v31, %v5316_v18  ;;  %v348_v29 = vrot.slane %v340_v32, %v5316_v18  ;;  %v355_v39 = vrot.slane %v341_v34, %v5316_v18 }
 0x4cf   :  { %v546_v49 = vcombine.low %v513_v43, %v529_v44  ;;  %v572_v50 = vrot.slane %v4538_v45, %v5311_v63  ;;  %v588_v51 = vrot.slane %v4540_v48, %v5311_v63 }
 0x4d0   :  { %v4546_v40 = vcombine.low %v482_v38, %v489_v23  ;;  %v4548_v41 = vcombine.high %v482_v38, %v489_v23  ;;  %v4542_v43 = vcombine.low %v348_v29, %v355_v39  ;;  %v4544_v44 = vcombine.high %v348_v29, %v355_v39 }
 0x4d1   :  { %v553_v52 = vrot.slane %v546_v49, %v5316_v18  ;;  %v605_v47 = vcombine.low %v572_v50, %v588_v51 }
 0x4d2   :  { %v690_v45 = vrot.slane %v4546_v40, %v5311_v63  ;;  %v706_v48 = vrot.slane %v4548_v41, %v5311_v63  ;;  %v631_v49 = vrot.slane %v4542_v43, %v5311_v63  ;;  %v647_v50 = vrot.slane %v4544_v44, %v5311_v63 }
 0x4d3   :  { %v556_v54 = vcombine.high %v553_v52, %v5185_v14  ;;  %v612_v42 = vrot.slane %v605_v47, %v5316_v18  ;;  %v761_v0 = vshrl.u32 %v553_v52, 16 }
 0x4d4   :  { %v664_v47 = vcombine.low %v631_v49, %v647_v50 }
 0x4d5   :  { %v760_v61 = vpack.i.b16 %v612_v42, %v553_v52  ;;  %v762_v1 = vshrl.u32 %v612_v42, 16  ;;  %v615_v3 = vcombine.high %v612_v42, %v5185_v14  ;;  %v767_v6 = vshrl.u32 %v556_v54, 16 }
 0x4d6   :  { %v723_v52 = vcombine.low %v690_v45, %v706_v48  ;;  %v671_v42 = vrot.slane %v664_v47, %v5316_v18 }
 0x4d7   :  { %v1324_v7 = vsel %vm1322_vm3, %v760_v61, 0  ;;  %v763_v8 = vpack.i.b16 %v762_v1, %v761_v0  ;;  %v766_v9 = vpack.i.b16 %v615_v3, %v556_v54  ;;  %v768_v33 = vshrl.u32 %v615_v3, 16 }
 0x4d8   :  { %4801 = vmatpush3.bf16.msra.mxu1 %v1324_v7  ;;  %v730_v55 = vrot.slane %v723_v52, %v5316_v18  ;;  %v797_v0 = vshrl.u32 %v671_v42, 16  ;;  %v674_v12 = vcombine.high %v671_v42, %v5185_v14 }
 0x4d9   :  { %v1370_v16 = vsel %vm1322_vm3, %v763_v8, 0  ;;  %4812 = vmatprep.subr.bf16.mxu1 %v5174_v15  ;;  %v769_v35 = vpack.i.b16 %v768_v33, %v767_v6  ;;  %v1416_v19 = vsel %vm1322_vm3, %v766_v9, 0 }
 0x4da   :  { %4807 = vmatpush3.bf16.msra.mxu0 %v1370_v16  ;;  %v798_v61 = vshrl.u32 %v730_v55, 16  ;;  %v733_v7 = vcombine.high %v730_v55, %v5185_v14  ;;  %v796_v11 = vpack.i.b16 %v730_v55, %v671_v42  ;;  %v803_v20 = vshrl.u32 %v674_v12, 16 }
 0x4db   :  { %4803 = vmatmul.mubr.msk.bf16.vlgmr.msra.gmra.mrb[20].mxu1 %vm854_vm2, %v1311_v17  ;;  %4818 = vmatprep.subr.bf16.mxu0 %v5174_v15  ;;  %v1462_v10 = vsel %vm1322_vm3, %v769_v35, 0 }
 0x4dc   :  { %4813 = vmatpush3.bf16.msra.mxu1 %v1416_v19  ;;  %4814 = vmatprep.mubr.msk.bf16.mxu1 %vm5175_vm1, %v5174_v15  ;;  %v799_v6 = vpack.i.b16 %v798_v61, %v797_v0 }
 0x4dd   :  { %4809 = vmatmul.mubr.msk.bf16.vlgmr.msra.gmra.mrb[16].mxu0 %vm854_vm2, %v1312_v22  ;;  %4824 = vmatprep.subr.bf16.mxu1 %v5174_v15 }
 0x4de   :  { %4819 = vmatpush3.bf16.msra.mxu0 %v1462_v10  ;;  %4820 = vmatprep.mubr.msk.bf16.mxu0 %vm5175_vm1, %v5174_v15  ;;  %v1554_v16 = vsel %vm1322_vm3, %v799_v6, 0  ;;  %v802_v10 = vpack.i.b16 %v733_v7, %v674_v12 }
 0x4df   :  { %4830 = vmatprep.subr.bf16.mxu0 %v5174_v15 }
 0x4f1   :  { %v1282_v51 = vpop.xlane.xlu0 %1281 }
 0x4f2   :  { %5072 = vrcp.f32 %v1282_v51 }
 0x4f3   :  { %v1279_v53 = vpop.xlane.xlu1 %1278 }
 0x4f4   :  { %5074 = vrcp.f32 %v1279_v53 }
 0x4f5   :  { %v1285_v54 = vpop.xlane.xlu0 %1284 }
 0x4f6   :  { %5076 = vrcp.f32 %v1285_v54 }
 0x4f7   :  { %v1291_v4 = vpop.xlane.xlu1 %1290 }
 0x4f9   :  { %v1288_v57 = vpop.xlane.xlu0 %1287 }
 0x4fa   :  { %5078 = vrcp.f32 %v1288_v57 }
 0x4fc   :  { %v5073_v1 = vpop.eup %5072 }
 0x4fd   :  { %v1306_v3 = vmul.f32 %v5073_v1, %v5470_v46  ;;  %v1294_v5 = vpop.xlane.xlu0 %1293  ;;  %v804_v46 = vshrl.u32 %v733_v7, 16 }
 0x4fe   :  { %v5075_v8 = vpop.eup %5074  ;;  %5080 = vrcp.f32 %v1294_v5 }
 0x4ff   :  { %v1305_v9 = vmul.f32 %v5075_v8, %v5472_v56  ;;  %v1314_v33 = vpack.c.bf16 %v1306_v3, %v1306_v3  ;;  %5082 = vrcp.f32 %v1291_v4  ;;  %v1508_v56 = vsel %vm1322_vm3, %v796_v11, 0 }
 0x500   :  { %v5077_v35 = vpop.eup %5076  ;;  %v805_v13 = vpack.i.b16 %v804_v46, %v803_v20 }
 0x501   :  { %4821 = vmatmul.mubr.msk.bf16.vlgmr.msra.gmra.mrb[20].mxu0 %vm854_vm2, %v1314_v33  ;;  %v1313_v17 = vpack.c.bf16 %v1305_v9, %v1305_v9  ;;  %v1307_v19 = vmul.f32 %v5077_v35, %v5476_v58 }
 0x502   :  { %4831 = vmatpush3.bf16.msra.mxu0 %v1554_v16  ;;  %4832 = vmatprep.mubr.msk.bf16.mxu0 %vm5175_vm1, %v5174_v15  ;;  %v1646_v28 = vsel %vm1322_vm3, %v805_v13, 0 }
 0x503   :  { %4815 = vmatmul.mubr.msk.bf16.vlgmr.msra.gmra.mrb[24].mxu1 %vm854_vm2, %v1313_v17  ;;  %4842 = vmatprep.subr.bf16.mxu0 %v5174_v15  ;;  %v1315_v31 = vpack.c.bf16 %v1307_v19, %v1307_v19 }
 0x504   :  { %v5079_v21 = vpop.eup %5078  ;;  %4825 = vmatpush3.bf16.msra.mxu1 %v1508_v56  ;;  %4826 = vmatprep.mubr.msk.bf16.mxu1 %vm5175_vm1, %v5174_v15 }
 0x505   :  { %v1308_v22 = vmul.f32 %v5079_v21, %v5484_v62  ;;  %4836 = vmatprep.subr.bf16.mxu1 %v5174_v15  ;;  %v1600_v62 = vsel %vm1322_vm3, %v802_v10, 0 }
 0x507   :  { %v1316_v26 = vpack.c.bf16 %v1308_v22, %v1308_v22 }
 0x508   :  { %v5081_v27 = vpop.eup %5080 }
 0x509   :  { %4833 = vmatmul.mubr.msk.bf16.vlgmr.msra.gmra.mrb[24].mxu0 %vm854_vm2, %v1316_v26  ;;  %v5083_v32 = vpop.eup %5082  ;;  %v1310_v58 = vmul.f32 %v5081_v27, %v5490_v2 }
 0x50a   :  { %4843 = vmatpush3.bf16.msra.mxu0 %v1646_v28  ;;  %4844 = vmatprep.mubr.msk.bf16.mxu0 %vm5175_vm1, %v5174_v15  ;;  %v1309_v34 = vmul.f32 %v5083_v32, %v5480_v60 }
 0x50b   :  { %4827 = vmatmul.mubr.msk.bf16.vlgmr.msra.gmra.mrb[28].mxu1 %vm854_vm2, %v1315_v31  ;;  %4856 = vmatprep.subr.bf16.mxu0 %v5174_v15  ;;  %v1318_v38 = vpack.c.bf16 %v1310_v58, %v1310_v58 }
 0x50c   :  { %4837 = vmatpush3.bf16.msra.mxu1 %v1600_v62  ;;  %4838 = vmatprep.mubr.msk.bf16.mxu1 %vm5175_vm1, %v5174_v15  ;;  %v1317_v23 = vpack.c.bf16 %v1309_v34, %v1309_v34 }
 0x50d   :  { %4848 = vmatprep.subr.bf16.mxu1 %v5174_v15 }
 0x511   :  { %4845 = vmatmul.mubr.msk.bf16.vlgmr.msra.gmra.mrb[28].mxu0 %vm854_vm2, %v1318_v38 }
 0x512   :  { %4860 = vmatprep.mubr.msk.bf16.mxu0 %vm5175_vm1, %v5174_v15 }
 0x513   :  { %4839 = vmatmul.mubr.msk.bf16.vlgmr.msra.gmra.mrb[32].mxu1 %vm854_vm2, %v1317_v23 }
 0x514   :  { %4852 = vmatprep.mubr.msk.bf16.mxu1 %vm5175_vm1, %v5174_v15 }
 0x5ae   :  { %v1360_v2 = vpop.f32.mrb[20].mxu1 }
 0x5af   :  { %v4804_v29 = vpop.f32.mrb[21].mxu1  ;;  %v1688_v49 = vpack.c.bf16 %v1360_v2, %v1360_v2 }
 0x5b0   :  { %v1363_v39 = vpop.f32.mrb[22].mxu1  ;;  %v1406_v40 = vpop.f32.mrb[16].mxu0 }
 0x5b1   :  { %v4805_v41 = vpop.f32.mrb[23].mxu1  ;;  %v4810_v60 = vpop.f32.mrb[17].mxu0  ;;  %v1722_v45 = vpack.c.bf16 %v1406_v40, %v1406_v40  ;;  %v1695_v0 = vrot.slane %v1688_v49, %v5311_v63 }
 0x5b2   :  { %v1409_v43 = vpop.f32.mrb[18].mxu0 }
 0x5b3   :  { %v4811_v44 = vpop.f32.mrb[19].mxu0  ;;  %v1729_v47 = vrot.slane %v1722_v45, %v5311_v63 }
 0x5d4   :  { %v1498_v48 = vpop.f32.mrb[20].mxu0 }
 0x5d5   :  { %v1730_v50 = vpack.c.bf16 %v1498_v48, %v1498_v48  ;;  %v4822_v51 = vpop.f32.mrb[21].mxu0 }
 0x5d6   :  { %v1452_v52 = vpop.f32.mrb[24].mxu1  ;;  %v1501_v53 = vpop.f32.mrb[22].mxu0 }
 0x5d7   :  { %v1737_v54 = vrot.slane %v1730_v50, %v5311_v63  ;;  %v1696_v55 = vpack.c.bf16 %v1452_v52, %v1452_v52  ;;  %v4816_v42 = vpop.f32.mrb[25].mxu1  ;;  %v4823_v57 = vpop.f32.mrb[23].mxu0 }
 0x5d8   :  { %v1455_v61 = vpop.f32.mrb[26].mxu1 }
 0x5d9   :  { %v1738_v1 = vcombine.low %v1729_v47, %v1737_v54  ;;  %v1739_v3 = vcombine.high %v1729_v47, %v1737_v54  ;;  %v1703_v4 = vrot.slane %v1696_v55, %v5311_v63  ;;  %v4817_v5 = vpop.f32.mrb[27].mxu1 }
 0x5db   :  { %v1746_v6 = vrot.slane %v1738_v1, %v5316_v18  ;;  %v1753_v7 = vrot.slane %v1739_v3, %v5316_v18  ;;  %v1704_v8 = vcombine.low %v1695_v0, %v1703_v4  ;;  %v1705_v9 = vcombine.high %v1695_v0, %v1703_v4 }
 0x5dc   :  { %v1590_v33 = vpop.f32.mrb[24].mxu0 }
 0x5dd   :  { %v1754_v11 = vcombine.high %v1746_v6, %v5185_v14  ;;  %v4834_v12 = vpop.f32.mrb[25].mxu0  ;;  %v1712_v16 = vrot.slane %v1704_v8, %v5316_v18  ;;  %v1719_v17 = vrot.slane %v1705_v9, %v5316_v18  ;;  %v1755_v56 = vcombine.high %v1753_v7, %v5185_v14 }
 0x5de   :  { %v1544_v46 = vpop.f32.mrb[28].mxu1  ;;  %v1593_v35 = vpop.f32.mrb[26].mxu0  ;;  %v1829_v20 = vshrl.u32 %v1746_v6, 16  ;;  %v1845_v21 = vshrl.u32 %v1753_v7, 16  ;;  %v1790_v62 = vpack.c.bf16 %v1590_v33, %v1590_v33 }
 0x5df   :  { %v4828_v19 = vpop.f32.mrb[29].mxu1  ;;  %v4835_v22 = vpop.f32.mrb[27].mxu0  ;;  %v1720_v13 = vcombine.high %v1712_v16, %v5185_v14  ;;  %v1721_v26 = vcombine.high %v1719_v17, %v5185_v14  ;;  %v1826_v10 = vpack.i.b16 %v1746_v6, %v1712_v16  ;;  %v1828_v27 = vshrl.u32 %v1712_v16, 16 }
 0x5e0   :  { %v1547_v28 = vpop.f32.mrb[30].mxu1  ;;  %v1837_v31 = vshrl.u32 %v1754_v11, 16  ;;  %v1842_v32 = vpack.i.b16 %v1753_v7, %v1719_v17  ;;  %v1844_v58 = vshrl.u32 %v1719_v17, 16  ;;  %v1853_v39 = vshrl.u32 %v1755_v56, 16 }
 0x5e1   :  { %v4829_v34 = vpop.f32.mrb[31].mxu1  ;;  %v1830_v38 = vpack.i.b16 %v1829_v20, %v1828_v27  ;;  %v1834_v23 = vpack.i.b16 %v1754_v11, %v1720_v13  ;;  %v1836_v2 = vshrl.u32 %v1720_v13, 16  ;;  %v1850_v29 = vpack.i.b16 %v1755_v56, %v1721_v26 }
 0x5e2   :  { %v1846_v40 = vpack.i.b16 %v1845_v21, %v1844_v58  ;;  %v1852_v41 = vshrl.u32 %v1721_v26, 16  ;;  %v1888_v60 = vcombine.low %v1826_v10, %v1842_v32  ;;  %v1756_v44 = vpack.c.bf16 %v1544_v46, %v1544_v46 }
 0x5e3   :  { %v1838_v43 = vpack.i.b16 %v1837_v31, %v1836_v2  ;;  %v1896_v48 = vcombine.low %v1834_v23, %v1850_v29  ;;  %v1797_v42 = vrot.slane %v1790_v62, %v5311_v63 }
 0x5e4   :  { %v1682_v45 = vpop.f32.mrb[28].mxu0  ;;  %v1854_v49 = vpack.i.b16 %v1853_v39, %v1852_v41  ;;  %v1938_v52 = vcombine.low %v1830_v38, %v1846_v40  ;;  %v1895_v54 = vrot.slane %v1888_v60, %v5311_v63  ;;  %v1763_v4 = vrot.slane %v1756_v44, %v5311_v63 }
 0x5e5   :  { %v1798_v50 = vpack.c.bf16 %v1682_v45, %v1682_v45  ;;  %v4846_v51 = vpop.f32.mrb[29].mxu0  ;;  %v1903_v55 = vrot.slane %v1896_v48, %v5311_v63  ;;  %v5030_v48 = vld [vmem:[%s6139_s4] sm:$0xff]  }
 0x5e6   :  { %v1636_v53 = vpop.f32.mrb[32].mxu1  ;;  %v1685_v47 = vpop.f32.mrb[30].mxu0  ;;  %v1946_v3 = vcombine.low %v1838_v43, %v1854_v49  ;;  %v1945_v12 = vrot.slane %v1938_v52, %v5311_v63  ;;  %4849 = vmatpush3.bf16.msra.mxu1 %v5030_v48 }
 0x5e7   :  { %v1805_v57 = vrot.slane %v1798_v50, %v5311_v63  ;;  %v1764_v61 = vpack.c.bf16 %v1636_v53, %v1636_v53  ;;  %v4840_v0 = vpop.f32.mrb[33].mxu1  ;;  %v4847_v1 = vpop.f32.mrb[31].mxu0  ;;  %v1920_v6 = vcombine.low %v1895_v54, %v1903_v55  ;;  %4850 = vmatprep.subr.bf16.mxu1 %v5174_v15  ;;  %v5031_v53 = vld [vmem:[%s6139_s4 + $0x8] sm:$0xff]  }
 0x5e8   :  { %v1639_v5 = vpop.f32.mrb[34].mxu1  ;;  %v1953_v11 = vrot.slane %v1946_v3, %v5311_v63 }
 0x5e9   :  { %v1806_v7 = vcombine.low %v1797_v42, %v1805_v57  ;;  %v1807_v8 = vcombine.high %v1797_v42, %v1805_v57  ;;  %v1771_v9 = vrot.slane %v1764_v61, %v5311_v63  ;;  %v4841_v33 = vpop.f32.mrb[35].mxu1  ;;  %v1927_v55 = vrot.slane %v1920_v6, %v5316_v18 }
 0x5ea   :  { %v1970_v56 = vcombine.low %v1945_v12, %v1953_v11  ;;  %4851 = vmatpush3.bf16.msra.mxu1 %v5031_v53 }
 0x5eb   :  { %v1814_v16 = vrot.slane %v1806_v7, %v5316_v18  ;;  %v1821_v17 = vrot.slane %v1807_v8, %v5316_v18  ;;  %v1772_v46 = vcombine.low %v1763_v4, %v1771_v9  ;;  %v1773_v35 = vcombine.high %v1763_v4, %v1771_v9  ;;  %4864 = vmatprep.subr.bf16.mxu1 %v5174_v15 }
 0x5ec   :  { %v1977_v1 = vrot.slane %v1970_v56, %v5316_v18 }
 0x5ed   :  { %v1822_v20 = vcombine.high %v1814_v16, %v5185_v14  ;;  %v1780_v21 = vrot.slane %v1772_v46, %v5316_v18  ;;  %v1787_v19 = vrot.slane %v1773_v35, %v5316_v18  ;;  %v1823_v22 = vcombine.high %v1821_v17, %v5185_v14 }
 0x5ee   :  { %v1861_v13 = vshrl.u32 %v1814_v16, 16  ;;  %v1877_v32 = vshrl.u32 %v1821_v17, 16 }
 0x5ef   :  { %v1788_v26 = vcombine.high %v1780_v21, %v5185_v14  ;;  %v1789_v10 = vcombine.high %v1787_v19, %v5185_v14  ;;  %v1858_v27 = vpack.i.b16 %v1814_v16, %v1780_v21  ;;  %v1860_v28 = vshrl.u32 %v1780_v21, 16 }
 0x5f0   :  { %v1869_v31 = vshrl.u32 %v1822_v20, 16  ;;  %v1874_v58 = vpack.i.b16 %v1821_v17, %v1787_v19  ;;  %v1876_v62 = vshrl.u32 %v1787_v19, 16  ;;  %v1885_v29 = vshrl.u32 %v1823_v22, 16  ;;  %v5646_v19 = vld [vmem:[%s6142_s7] sm:$0x3f] }
 0x5f1   :  { %v1862_v34 = vpack.i.b16 %v1861_v13, %v1860_v28  ;;  %v1866_v38 = vpack.i.b16 %v1822_v20, %v1788_v26  ;;  %v1868_v23 = vshrl.u32 %v1788_v26, 16  ;;  %v1882_v2 = vpack.i.b16 %v1823_v22, %v1789_v10 }
 0x5f2   :  { %v1878_v39 = vpack.i.b16 %v1877_v32, %v1876_v62  ;;  %v1884_v40 = vshrl.u32 %v1789_v10, 16  ;;  %v1904_v41 = vcombine.low %v1858_v27, %v1874_v58  ;;  %v2022_v22 = vrot.slane %v5646_v19, %v5271_v25 }
 0x5f3   :  { %v1870_v60 = vpack.i.b16 %v1869_v31, %v1868_v23  ;;  %v1912_v43 = vcombine.low %v1866_v38, %v1882_v2  ;;  %v2109_v53 = vrot.slane %v5646_v19, %v5278_v30 }
 0x5f4   :  { %v1886_v44 = vpack.i.b16 %v1885_v29, %v1884_v40  ;;  %v1954_v45 = vcombine.low %v1862_v34, %v1878_v39  ;;  %v1911_v49 = vrot.slane %v1904_v41, %v5311_v63 }
 0x5f5   :  { %v1919_v50 = vrot.slane %v1912_v43, %v5311_v63 }
 0x5f6   :  { %v1962_v51 = vcombine.low %v1870_v60, %v1886_v44  ;;  %v1961_v47 = vrot.slane %v1954_v45, %v5311_v63  ;;  %v5033_v44 = vld [vmem:[%s6140_s5 + $0x8] sm:$0xff]  }
 0x5f7   :  { %v1928_v52 = vcombine.low %v1911_v49, %v1919_v50 }
 0x5f8   :  { %v1969_v54 = vrot.slane %v1962_v51, %v5311_v63 }
 0x5f9   :  { %v1935_v42 = vrot.slane %v1928_v52, %v5316_v18 }
 0x5fa   :  { %v1978_v57 = vcombine.low %v1961_v47, %v1969_v54  ;;  %v2114_v47 = vsub.s32 2, %v5268_v24 }
 0x5fb   :  { %v1937_v61 = vcombine.high %v1927_v55, %v1935_v42  ;;  %v1936_v0 = vcombine.low %v1927_v55, %v1935_v42 }
 0x5fc   :  { %v1985_v3 = vrot.slane %v1978_v57, %v5316_v18 }
 0x5fd   :  { %v1991_v7 = vshrl.u32 %v1936_v0, 16  ;;  %v1997_v8 = vshrl.u32 %v1937_v61, 16 }
 0x5fe   :  { %v1987_v4 = vcombine.high %v1977_v1, %v1985_v3  ;;  %v1986_v5 = vcombine.low %v1977_v1, %v1985_v3 }
 0x600   :  { %v1996_v9 = vpack.i.b16 %v1987_v4, %v1937_v61  ;;  %v1992_v33 = vshrl.u32 %v1986_v5, 16  ;;  %v1998_v11 = vshrl.u32 %v1987_v4, 16  ;;  %v1990_v6 = vpack.i.b16 %v1986_v5, %v1936_v0 }
 0x601   :  { %v2115_v0 = vrot.slane %v5646_v19, %v2114_v47 }
 0x602   :  { %2002 = vrot.lane.b32.xlu0 %v1996_v9, %s5190_s0  ;;  %v1993_v12 = vpack.i.b16 %v1992_v33, %v1991_v7  ;;  %v1999_v16 = vpack.i.b16 %v1998_v11, %v1997_v8  ;;  %v5034_v7 = vld [vmem:[%s6141_s6] sm:$0xff]   ;;  %v5035_v8 = vld [vmem:[%s6141_s6 + $0x8] sm:$0xff]   ;;  %v5036_v9 = vld [vmem:[%s6141_s6 + $0x10] sm:$0xff]  }
 0x603   :  { %v5037_v33 = vld [vmem:[%s6141_s6 + $0x18] sm:$0xff]   ;;  %v5140_v11 = vld [vmem:[%s6143_s8] sm:$0x3] }
 0x604   :  { %2000 = vrot.lane.b32.xlu1 %v1993_v12, %s5191_s13 }
 0x608   :  { %2004 = vrot.lane.b32.xlu1 %v1999_v16, %s5192_s14 }
 0x674   :  { %v2003_v35 = vpop.permute.xlu0 %2002 }
 0x676   :  { %v2001_v17 = vpop.permute.xlu1 %2000 }
 0x677   :  { %v2008_v46 = vsel %vm854_vm2, %v1990_v6, %v2001_v17  ;;  %v2126_v6 = vrot.slane %v5140_v11, %v5278_v30 }
 0x678   :  { %v2011_v20 = vsel %vm2009_vm4, %v2008_v46, %v2003_v35 }
 0x67a   :  { %v2005_v56 = vpop.permute.xlu1 %2004 }
 0x67b   :  { %v2014_v21 = vsel %vm2012_vm5, %v2011_v20, %v2005_v56 }
 0x67c   :  { %4853 = vmatmul.mubr.msk.bf16.vlgmr.msra.gmra.mrb[36].mxu1 %vm45_vm0, %v2014_v21 }
 0x67d   :  { %4872 = vmatprep.mubr.msk.bf16.mxu1 %vm5175_vm1, %v5174_v15  ;;  %4865 = vmatpush3.bf16.msra.mxu1 %v5034_v7  ;;  %v5039_v7 = vld [vmem:[%s6138_s3 + $0x18] sm:$0xff]  }
 0x67e   :  { %4866 = vmatprep.subr.bf16.mxu1 %v5174_v15 }
 0x681   :  { %4867 = vmatpush3.bf16.msra.mxu1 %v5035_v8 }
 0x682   :  { %4868 = vmatprep.subr.bf16.mxu1 %v5174_v15 }
 0x685   :  { %4869 = vmatpush3.bf16.msra.mxu1 %v5036_v9 }
 0x686   :  { %4870 = vmatprep.subr.bf16.mxu1 %v5174_v15 }
 0x689   :  { %4871 = vmatpush3.bf16.msra.mxu1 %v5037_v33 }
 0x68a   :  { %4890 = vmatprep.subr.bf16.mxu1 %v5174_v15 }
 0x74f   :  { %v2071_v13 = vpop.f32.mrb[36].mxu1 }
 0x750   :  { %v2072_v26 = vadd.f32 %v2071_v13, %v2022_v22  ;;  %v4854_v10 = vpop.f32.mrb[37].mxu1 }
 0x751   :  { %v2074_v27 = vpop.f32.mrb[38].mxu1 }
 0x752   :  { %v2075_v28 = vadd.f32 %v2074_v27, %v2022_v22  ;;  %v4855_v31 = vpop.f32.mrb[39].mxu1  ;;  %v2078_v32 = vadd.f32 %v2072_v26, %v5281_v36 }
 0x754   :  { %v2080_v58 = vsel %vm45_vm0, %v2078_v32, 0.0  ;;  %v2079_v62 = vadd.f32 %v2075_v28, %v5283_v37  ;;  %v5032_v37 = vld [vmem:[%s6140_s5] sm:$0xff]  }
 0x755   :  { %2081 = vadd.xlane.f32.xlu1 %v2080_v58  ;;  %4857 = vmatpush3.bf16.msra.mxu0 %v5032_v37 }
 0x756   :  { %v2083_v34 = vsel %vm45_vm0, %v2079_v62, 0.0  ;;  %4858 = vmatprep.subr.bf16.mxu0 %v5174_v15 }
 0x757   :  { %2084 = vadd.xlane.f32.xlu0 %v2083_v34 }
 0x759   :  { %4859 = vmatpush3.bf16.msra.mxu0 %v5033_v44 }
 0x75a   :  { %4876 = vmatprep.subr.bf16.mxu0 %v5174_v15 }
 0x7e2   :  { %v2082_v38 = vpop.xlane.xlu1 %2081 }
 0x7e3   :  { %v2086_v23 = vmul.f32 0.03125, %v2082_v38 }
 0x7e4   :  { %v2085_v2 = vpop.xlane.xlu0 %2084 }
 0x7e5   :  { %v2088_v29 = vsub.f32 %v2078_v32, %v2086_v23  ;;  %v2087_v39 = vmul.f32 0.03125, %v2085_v2 }
 0x7e7   :  { %v2089_v40 = vsub.f32 %v2079_v62, %v2087_v39  ;;  %v2090_v41 = vmul.f32 %v2088_v29, %v2088_v29 }
 0x7e9   :  { %v2092_v60 = vsel %vm45_vm0, %v2090_v41, 0.0  ;;  %v2091_v43 = vmul.f32 %v2089_v40, %v2089_v40  ;;  %v2212_v41 = vsub.s32 3, %v5268_v24 }
 0x7ea   :  { %2093 = vadd.xlane.f32.xlu0 %v2092_v60 }
 0x7eb   :  { %v2095_v36 = vsel %vm45_vm0, %v2091_v43, 0.0  ;;  %v2213_v60 = vrot.slane %v5646_v19, %v2212_v41 }
 0x7ec   :  { %2096 = vadd.xlane.f32.xlu1 %v2095_v36 }
 0x877   :  { %v2094_v45 = vpop.xlane.xlu0 %2093 }
 0x878   :  { %v2098_v48 = vmul.f32 0.03125, %v2094_v45 }
 0x879   :  { %v2097_v49 = vpop.xlane.xlu1 %2096 }
 0x87a   :  { %v2100_v50 = vadd.f32 1e-12, %v2098_v48  ;;  %v2099_v51 = vmul.f32 0.03125, %v2097_v49 }
 0x87c   :  { %5084 = vrsqrt.f32 %v2100_v50  ;;  %v2101_v52 = vadd.f32 1e-12, %v2099_v51 }
 0x87e   :  { %5086 = vrsqrt.f32 %v2101_v52 }
 0x886   :  { %v5085_v54 = vpop.eup %5084 }
 0x887   :  { %v2104_v55 = vmul.f32 %v5085_v54, %v2088_v29 }
 0x888   :  { %v5087_v42 = vpop.eup %5086 }
 0x889   :  { %v2110_v57 = vmul.f32 %v2109_v53, %v2104_v55  ;;  %v2105_v61 = vmul.f32 %v5087_v42, %v2089_v40 }
 0x88b   :  { %v2111_v1 = vmul.f32 %v2109_v53, %v2105_v61  ;;  %v2116_v3 = vadd.f32 %v2115_v0, %v2110_v57 }
 0x88d   :  { %v2117_v4 = vadd.f32 %v2115_v0, %v2111_v1 }
 0x88f   :  { %v2118_v5 = vpack.c.bf16 %v2117_v4, %v2116_v3 }
 0x891   :  { %4861 = vmatmul.mubr.msk.bf16.vlgmr.msra.gmra.mrb[32].mxu0 %vm45_vm0, %v2118_v5 }
 0x892   :  { %4880 = vmatprep.mubr.msk.bf16.mxu0 %vm5175_vm1, %v5174_v15 }
 0x964   :  { %v2176_v12 = vpop.f32.mrb[32].mxu0 }
 0x965   :  { %v2177_v16 = vadd.f32 %v2176_v12, %v2126_v6  ;;  %v4862_v17 = vpop.f32.mrb[33].mxu0 }
 0x966   :  { %v2179_v46 = vpop.f32.mrb[34].mxu0 }
 0x967   :  { %v2183_v35 = vmul.f32 %v2177_v16, %v2177_v16  ;;  %v2180_v56 = vadd.f32 %v2179_v46, %v2126_v6  ;;  %v4863_v20 = vpop.f32.mrb[35].mxu0  ;;  %v2319_v46 = vsub.s32 5, %v5268_v24 }
 0x969   :  { %v2185_v21 = vmul.f32 %v2183_v35, %v2177_v16  ;;  %v2184_v22 = vmul.f32 %v2180_v56, %v2180_v56 }
 0x96b   :  { %v2187_v13 = vmul.f32 0.044715, %v2185_v21  ;;  %v2186_v26 = vmul.f32 %v2184_v22, %v2180_v56 }
 0x96d   :  { %v2189_v10 = vadd.f32 %v2187_v13, %v2177_v16  ;;  %v2188_v27 = vmul.f32 0.044715, %v2186_v26  ;;  %v2320_v13 = vrot.slane %v5646_v19, %v2319_v46 }
 0x96f   :  { %v2191_v28 = vmul.f32 0.7978846, %v2189_v10  ;;  %v2190_v31 = vadd.f32 %v2188_v27, %v2180_v56 }
 0x971   :  { %5088 = vtanh.f32 %v2191_v28  ;;  %v2192_v32 = vmul.f32 0.7978846, %v2190_v31  ;;  %v4585_v31 = vld [vmem:[%s6143_s8 + $0x2] sm:$0x3] }
 0x973   :  { %5090 = vtanh.f32 %v2192_v32  ;;  %v2336_v32 = vrot.slane %v4585_v31, %v5271_v25 }
 0x97b   :  { %v5089_v58 = vpop.eup %5088 }
 0x97c   :  { %v2195_v62 = vadd.f32 1.0, %v5089_v58 }
 0x97d   :  { %v5091_v34 = vpop.eup %5090 }
 0x97e   :  { %v2197_v38 = vmul.f32 0.5, %v2195_v62  ;;  %v2196_v23 = vadd.f32 1.0, %v5091_v34 }
 0x980   :  { %v2198_v2 = vmul.f32 0.5, %v2196_v23  ;;  %v2199_v29 = vmul.f32 %v2197_v38, %v2177_v16  ;;  %v2313_v16 = vsub.s32 4, %v5268_v24 }
 0x982   :  { %v2200_v39 = vmul.f32 %v2198_v2, %v2180_v56  ;;  %v2314_v17 = vrot.slane %v5646_v19, %v2313_v16 }
 0x984   :  { %v2201_v40 = vpack.c.bf16 %v2200_v39, %v2199_v29 }
 0x986   :  { %4873 = vmatmul.mubr.msk.bf16.vlgmr.msra.gmra.mrb[40].mxu1 %vm2238_vm6, %v2201_v40 }
 0x987   :  { %4892 = vmatprep.mubr.msk.bf16.mxu1 %vm5175_vm1, %v5174_v15 }
 0xa59   :  { %v2276_v43 = vpop.f32.mrb[40].mxu1 }
 0xa5a   :  { %v2277_v36 = vadd.f32 %v2276_v43, %v2213_v60  ;;  %v4874_v37 = vpop.f32.mrb[41].mxu1 }
 0xa5b   :  { %v2279_v44 = vpop.f32.mrb[42].mxu1 }
 0xa5c   :  { %v2280_v45 = vadd.f32 %v2279_v44, %v2213_v60  ;;  %v4875_v48 = vpop.f32.mrb[43].mxu1  ;;  %v2283_v49 = vadd.f32 %v2277_v36, %v2116_v3 }
 0xa5e   :  { %v2285_v50 = vsel %vm45_vm0, %v2283_v49, 0.0  ;;  %v2284_v51 = vadd.f32 %v2280_v45, %v2117_v4  ;;  %v5038_v4 = vld [vmem:[%s6138_s3 + $0x10] sm:$0xff]  }
 0xa5f   :  { %2286 = vadd.xlane.f32.xlu0 %v2285_v50  ;;  %4877 = vmatpush3.bf16.msra.mxu0 %v5038_v4 }
 0xa60   :  { %v2288_v52 = vsel %vm45_vm0, %v2284_v51, 0.0  ;;  %4878 = vmatprep.subr.bf16.mxu0 %v5174_v15 }
 0xa61   :  { %2289 = vadd.xlane.f32.xlu1 %v2288_v52 }
 0xa63   :  { %4879 = vmatpush3.bf16.msra.mxu0 %v5039_v7 }
 0xa64   :  { %4884 = vmatprep.subr.bf16.mxu0 %v5174_v15 }
 0xaec   :  { %v2287_v53 = vpop.xlane.xlu0 %2286 }
 0xaed   :  { %v2291_v54 = vmul.f32 0.03125, %v2287_v53 }
 0xaee   :  { %v2290_v55 = vpop.xlane.xlu1 %2289 }
 0xaef   :  { %v2293_v42 = vsub.f32 %v2283_v49, %v2291_v54  ;;  %v2292_v57 = vmul.f32 0.03125, %v2290_v55 }
 0xaf1   :  { %v2294_v61 = vsub.f32 %v2284_v51, %v2292_v57  ;;  %v2295_v0 = vmul.f32 %v2293_v42, %v2293_v42 }
 0xaf3   :  { %v2297_v1 = vsel %vm45_vm0, %v2295_v0, 0.0  ;;  %v2296_v5 = vmul.f32 %v2294_v61, %v2294_v61 }
 0xaf4   :  { %2298 = vadd.xlane.f32.xlu0 %v2297_v1 }
 0xaf5   :  { %v2300_v3 = vsel %vm45_vm0, %v2296_v5, 0.0 }
 0xaf6   :  { %2301 = vadd.xlane.f32.xlu1 %v2300_v3 }
 0xb81   :  { %v2299_v8 = vpop.xlane.xlu0 %2298 }
 0xb82   :  { %v2303_v9 = vmul.f32 0.03125, %v2299_v8 }
 0xb83   :  { %v2302_v33 = vpop.xlane.xlu1 %2301 }
 0xb84   :  { %v2305_v11 = vadd.f32 1e-12, %v2303_v9  ;;  %v2304_v6 = vmul.f32 0.03125, %v2302_v33 }
 0xb86   :  { %5092 = vrsqrt.f32 %v2305_v11  ;;  %v2306_v12 = vadd.f32 1e-12, %v2304_v6 }
 0xb88   :  { %5094 = vrsqrt.f32 %v2306_v12 }
 0xb90   :  { %v5093_v35 = vpop.eup %5092 }
 0xb91   :  { %v2309_v56 = vmul.f32 %v5093_v35, %v2293_v42 }
 0xb92   :  { %v5095_v20 = vpop.eup %5094 }
 0xb93   :  { %v2315_v21 = vmul.f32 %v2314_v17, %v2309_v56  ;;  %v2310_v22 = vmul.f32 %v5095_v20, %v2294_v61 }
 0xb95   :  { %v2316_v26 = vmul.f32 %v2314_v17, %v2310_v22  ;;  %v5720_v10 = vadd.f32 %v2320_v13, %v2315_v21 }
 0xb97   :  { %v5722_v27 = vadd.f32 %v2320_v13, %v2316_v26 }
 0xb99   :  { %v2327_v28 = vpack.c.bf16 %v5722_v27, %v5720_v10 }
 0xb9b   :  { %4881 = vmatmul.mubr.msk.bf16.vlgmr.msra.gmra.mrb[36].mxu0 %vm45_vm0, %v2327_v28 }
 0xb9c   :  { %4886 = vmatprep.mubr.msk.bf16.mxu0 %vm5175_vm1, %v5174_v15 }
 0xc6e   :  { %v2386_v19 = vpop.f32.mrb[36].mxu0 }
 0xc6f   :  { %v4882_v58 = vpop.f32.mrb[37].mxu0  ;;  %v2387_v34 = vadd.f32 %v2386_v19, %v2336_v32 }
 0xc70   :  { %v2389_v62 = vpop.f32.mrb[38].mxu0 }
 0xc71   :  { %v2390_v38 = vadd.f32 %v2389_v62, %v2336_v32  ;;  %v4883_v23 = vpop.f32.mrb[39].mxu0 }
 0xc73   :  { %v5733_v2 = vpack.c.bf16 %v2390_v38, %v2387_v34 }
 0xc75   :  { %2397 = vrot.lane.b32.xlu1 %v5733_v2, %s5176_s19  ;;  %2395 = vrot.lane.b32.xlu0 %v5733_v2, %s5177_s20  ;;  %v2421_v53 = vshrl.u32 %v5733_v2, 16 }
 0xc79   :  { %2399 = vrot.lane.b32.xlu1 %v5733_v2, %s5178_s21  ;;  %2403 = vrot.lane.b32.xlu0 %v5733_v2, %s5179_s22 }
 0xc7d   :  { %2401 = vrot.lane.b32.xlu1 %v5733_v2, %s5180_s23  ;;  %2407 = vrot.lane.b32.xlu0 %v5733_v2, %s5181_s24 }
 0xc81   :  { %2405 = vrot.lane.b32.xlu1 %v5733_v2, %s5182_s25 }
 0xce7   :  { %v2398_v29 = vpop.permute.xlu1 %2397  ;;  %v2396_v39 = vpop.permute.xlu0 %2395 }
 0xce8   :  { %v2422_v44 = vshrl.u32 %v2396_v39, 16  ;;  %v2419_v49 = vpack.i.b16 %v2396_v39, %v5733_v2  ;;  %v2429_v52 = vshrl.u32 %v2398_v29, 16 }
 0xcea   :  { %v2423_v1 = vpack.i.b16 %v2422_v44, %v2421_v53 }
 0xceb   :  { %v2400_v40 = vpop.permute.xlu1 %2399  ;;  %v2404_v60 = vpop.permute.xlu0 %2403 }
 0xcec   :  { %v2438_v45 = vshrl.u32 %v2404_v60, 16  ;;  %v2430_v50 = vshrl.u32 %v2400_v40, 16  ;;  %v2427_v54 = vpack.i.b16 %v2400_v40, %v2398_v29 }
 0xcee   :  { %v2431_v5 = vpack.i.b16 %v2430_v50, %v2429_v52 }
 0xcef   :  { %v2402_v43 = vpop.permute.xlu1 %2401  ;;  %v2408_v48 = vpop.permute.xlu0 %2407 }
 0xcf0   :  { %v2437_v36 = vshrl.u32 %v2402_v43, 16  ;;  %v2435_v37 = vpack.i.b16 %v2404_v60, %v2402_v43  ;;  %v2446_v57 = vshrl.u32 %v2408_v48, 16 }
 0xcf2   :  { %v2439_v55 = vpack.i.b16 %v2438_v45, %v2437_v36  ;;  %v2465_v42 = vcombine.low %v2419_v49, %v2435_v37  ;;  %v2466_v8 = vcombine.high %v2419_v49, %v2435_v37 }
 0xcf3   :  { %v2406_v51 = vpop.permute.xlu1 %2405 }
 0xcf4   :  { %v2443_v61 = vpack.i.b16 %v2408_v48, %v2406_v51  ;;  %v2445_v0 = vshrl.u32 %v2406_v51, 16  ;;  %v2599_v9 = vcombine.low %v2423_v1, %v2439_v55  ;;  %v2600_v33 = vcombine.high %v2423_v1, %v2439_v55 }
 0xcf5   :  { %v2473_v11 = vrot.slane %v2465_v42, %v5311_v63  ;;  %v2480_v28 = vrot.slane %v2466_v8, %v5311_v63 }
 0xcf6   :  { %v2447_v3 = vpack.i.b16 %v2446_v57, %v2445_v0  ;;  %v2481_v4 = vcombine.low %v2427_v54, %v2443_v61  ;;  %v2482_v7 = vcombine.high %v2427_v54, %v2443_v61  ;;  %v2607_v21 = vrot.slane %v2599_v9, %v5311_v63 }
 0xcf7   :  { %v2614_v22 = vrot.slane %v2600_v33, %v5311_v63 }
 0xcf8   :  { %v2489_v6 = vrot.slane %v2481_v4, %v5311_v63  ;;  %v2615_v12 = vcombine.low %v2431_v5, %v2447_v3  ;;  %v2616_v17 = vcombine.high %v2431_v5, %v2447_v3  ;;  %v2496_v35 = vrot.slane %v2482_v7, %v5311_v63 }
 0xcfa   :  { %v2527_v56 = vcombine.low %v2473_v11, %v2489_v6  ;;  %v2528_v20 = vcombine.high %v2473_v11, %v2489_v6  ;;  %v2623_v13 = vrot.slane %v2615_v12, %v5311_v63  ;;  %v2630_v26 = vrot.slane %v2616_v17, %v5311_v63 }
 0xcfb   :  { %v2543_v38 = vcombine.low %v2480_v28, %v2496_v35  ;;  %v2544_v23 = vcombine.high %v2480_v28, %v2496_v35 }
 0xcfc   :  { %v2535_v31 = vrot.slane %v2527_v56, %v5316_v18  ;;  %v2542_v32 = vrot.slane %v2528_v20, %v5316_v18  ;;  %v2661_v19 = vcombine.low %v2607_v21, %v2623_v13  ;;  %v2662_v58 = vcombine.high %v2607_v21, %v2623_v13 }
 0xcfd   :  { %v2677_v62 = vcombine.low %v2614_v22, %v2630_v26  ;;  %v2678_v34 = vcombine.high %v2614_v22, %v2630_v26  ;;  %v2551_v49 = vrot.slane %v2543_v38, %v5316_v18  ;;  %v2558_v50 = vrot.slane %v2544_v23, %v5316_v18 }
 0xcfe   :  { %v4593_v29 = vcombine.low %v2535_v31, %v2542_v32  ;;  %v4595_v39 = vcombine.high %v2535_v31, %v2542_v32  ;;  %v2669_v40 = vrot.slane %v2661_v19, %v5316_v18  ;;  %v2676_v60 = vrot.slane %v2662_v58, %v5316_v18 }
 0xcff   :  { %v2685_v43 = vrot.slane %v2677_v62, %v5316_v18  ;;  %v2692_v36 = vrot.slane %v2678_v34, %v5316_v18  ;;  %v4601_v61 = vcombine.low %v2551_v49, %v2558_v50  ;;  %v4603_v0 = vcombine.high %v2551_v49, %v2558_v50 }
 0xd00   :  { %v2741_v37 = vrot.slane %v4593_v29, %v5311_v63  ;;  %v2757_v44 = vrot.slane %v4595_v39, %v5311_v63  ;;  %v4597_v45 = vcombine.low %v2669_v40, %v2676_v60  ;;  %v4599_v48 = vcombine.high %v2669_v40, %v2676_v60 }
 0xd01   :  { %v4605_v54 = vcombine.low %v2685_v43, %v2692_v36  ;;  %v4607_v55 = vcombine.high %v2685_v43, %v2692_v36  ;;  %v2859_v6 = vrot.slane %v4601_v61, %v5311_v63  ;;  %v2875_v12 = vrot.slane %v4603_v0, %v5311_v63 }
 0xd02   :  { %v2766_v51 = vcombine.high %v2741_v37, %v2757_v44  ;;  %v2800_v52 = vrot.slane %v4597_v45, %v5311_v63  ;;  %v2816_v53 = vrot.slane %v4599_v48, %v5311_v63  ;;  %v2765_v3 = vcombine.low %v2741_v37, %v2757_v44 }
 0xd03   :  { %v2918_v4 = vrot.slane %v4605_v54, %v5311_v63  ;;  %v2934_v7 = vrot.slane %v4607_v55, %v5311_v63  ;;  %v2884_v19 = vcombine.high %v2859_v6, %v2875_v12  ;;  %v2883_v49 = vcombine.low %v2859_v6, %v2875_v12 }
 0xd04   :  { %v2780_v42 = vrot.slane %v2766_v51, %v5316_v18  ;;  %v2825_v57 = vcombine.high %v2800_v52, %v2816_v53  ;;  %v2824_v1 = vcombine.low %v2800_v52, %v2816_v53  ;;  %v2773_v22 = vrot.slane %v2765_v3, %v5316_v18 }
 0xd05   :  { %v2943_v26 = vcombine.high %v2918_v4, %v2934_v7  ;;  %v2898_v40 = vrot.slane %v2884_v19, %v5316_v18  ;;  %v2942_v37 = vcombine.low %v2918_v4, %v2934_v7  ;;  %v2891_v0 = vrot.slane %v2883_v49, %v5316_v18  ;;  %v5142_v19 = vld [vmem:[%s6136_s1 + $0x1] ss:$0 sm:$0xff] }
 0xd06   :  { %v2839_v5 = vrot.slane %v2825_v57, %v5316_v18  ;;  %v2984_v9 = vshrl.u32 %v2780_v42, 16  ;;  %v2832_v56 = vrot.slane %v2824_v1, %v5316_v18  ;;  %v2790_v20 = vcombine.high %v2780_v42, %v5185_v14 }
 0xd07   :  { %v2972_v62 = vshrl.u32 %v2773_v22, 16  ;;  %v2957_v38 = vrot.slane %v2943_v26, %v5316_v18  ;;  %v2789_v43 = vcombine.high %v2773_v22, %v5185_v14  ;;  %v3020_v48 = vshrl.u32 %v2898_v40, 16 }
 0xd08   :  { %v2983_v8 = vpack.i.b16 %v2839_v5, %v2780_v42  ;;  %v2985_v33 = vshrl.u32 %v2839_v5, 16  ;;  %v2849_v11 = vcombine.high %v2839_v5, %v5185_v14  ;;  %v2973_v31 = vshrl.u32 %v2832_v56, 16 }
 0xd09   :  { %v2990_v32 = vshrl.u32 %v2790_v20, 16  ;;  %v2971_v58 = vpack.i.b16 %v2832_v56, %v2773_v22  ;;  %v2848_v39 = vcombine.high %v2832_v56, %v5185_v14  ;;  %v3021_v36 = vshrl.u32 %v2957_v38, 16 }
 0xd0a   :  { %v3045_v17 = vsel %vm854_vm2, %v2983_v8, 0  ;;  %v2986_v35 = vpack.i.b16 %v2985_v33, %v2984_v9  ;;  %v2991_v13 = vshrl.u32 %v2849_v11, 16  ;;  %v2989_v28 = vpack.i.b16 %v2849_v11, %v2790_v20 }
 0xd0b   :  { %4885 = vmatpush3.bf16.xpose.msra.mxu0 %v3045_v17  ;;  %v2974_v29 = vpack.i.b16 %v2973_v31, %v2972_v62  ;;  %v3019_v44 = vpack.i.b16 %v2957_v38, %v2898_v40  ;;  %v2979_v45 = vshrl.u32 %v2848_v39, 16  ;;  %v2977_v50 = vpack.i.b16 %v2848_v39, %v2789_v43 }
 0xd0c   :  { %v3091_v21 = vsel %vm854_vm2, %v2986_v35, 0  ;;  %4896 = vmatprep.subr.bf16.mxu0 %v5174_v15  ;;  %v2992_v34 = vpack.i.b16 %v2991_v13, %v2990_v32  ;;  %v3137_v23 = vsel %vm854_vm2, %v2989_v28, 0  ;;  %v2978_v51 = vshrl.u32 %v2789_v43, 16  ;;  %v5141_v13 = vld [vmem:[%s6136_s1] ss:$0 sm:$0xff] }
 0xd0d   :  { %4891 = vmatpush3.bf16.xpose.msra.mxu1 %v3091_v21  ;;  %v3022_v52 = vpack.i.b16 %v3021_v36, %v3020_v48  ;;  %v2967_v53 = vcombine.high %v2957_v38, %v5185_v14  ;;  %v3229_v54 = vsel %vm854_vm2, %v3019_v44, 0  ;;  %v2950_v42 = vrot.slane %v2942_v37, %v5316_v18 }
 0xd0e   :  { %4902 = vmatprep.subr.bf16.mxu1 %v5174_v15  ;;  %v3183_v60 = vsel %vm854_vm2, %v2992_v34, 0  ;;  %v2980_v55 = vpack.i.b16 %v2979_v45, %v2978_v51  ;;  %v2908_v57 = vcombine.high %v2898_v40, %v5185_v14  ;;  %v3008_v8 = vshrl.u32 %v2891_v0, 16  ;;  %v5144_v45 = vld [vmem:[%s6136_s1 + $0x3] ss:$0 sm:$0xff] }
 0xd0f   :  { %v3275_v61 = vsel %vm854_vm2, %v3022_v52, 0  ;;  %v3027_v1 = vshrl.u32 %v2967_v53, 16  ;;  %v3009_v3 = vshrl.u32 %v2950_v42, 16  ;;  %v3007_v7 = vpack.i.b16 %v2950_v42, %v2891_v0 }
 0xd10   :  { %v3025_v5 = vpack.i.b16 %v2967_v53, %v2908_v57  ;;  %v3026_v4 = vshrl.u32 %v2908_v57, 16  ;;  %v2966_v6 = vcombine.high %v2950_v42, %v5185_v14  ;;  %v2907_v17 = vcombine.high %v2891_v0, %v5185_v14  ;;  %v5145_v42 = vld [vmem:[%s6136_s1 + $0x4] ss:$0 sm:$0xff] }
 0xd11   :  { %v3010_v11 = vpack.i.b16 %v3009_v3, %v3008_v8 }
 0xd12   :  { %4887 = vmatmul.mubr.msk.bf16.vlgmr.msra.gmra.mrb[40].mxu0 %vm854_vm2, %v2971_v58  ;;  %v3028_v9 = vpack.i.b16 %v3027_v1, %v3026_v4  ;;  %v3321_v33 = vsel %vm854_vm2, %v3025_v5, 0  ;;  %v3015_v35 = vshrl.u32 %v2966_v6, 16  ;;  %v3013_v56 = vpack.i.b16 %v2966_v6, %v2907_v17  ;;  %v5146_v5 = vld [vmem:[%s6136_s1 + $0x5] ss:$0 sm:$0xff] }
 0xd13   :  { %4897 = vmatpush3.bf16.xpose.msra.mxu0 %v3137_v23  ;;  %4898 = vmatprep.mubr.msk.bf16.mxu0 %vm5175_vm1, %v5174_v15  ;;  %v3014_v20 = vshrl.u32 %v2907_v17, 16 }
 0xd14   :  { %4893 = vmatmul.mubr.msk.bf16.vlgmr.msra.gmra.mrb[44].mxu1 %vm854_vm2, %v2974_v29  ;;  %4908 = vmatprep.subr.bf16.mxu0 %v5174_v15  ;;  %v3367_v12 = vsel %vm854_vm2, %v3028_v9, 0 }
 0xd15   :  { %4903 = vmatpush3.bf16.xpose.msra.mxu1 %v3183_v60  ;;  %4904 = vmatprep.mubr.msk.bf16.mxu1 %vm5175_vm1, %v5174_v15  ;;  %v3016_v21 = vpack.i.b16 %v3015_v35, %v3014_v20  ;;  %v5143_v60 = vld [vmem:[%s6136_s1 + $0x2] ss:$0 sm:$0xff] }
 0xd16   :  { %4914 = vmatprep.subr.bf16.mxu1 %v5174_v15 }
 0xd1a   :  { %4899 = vmatmul.mubr.msk.bf16.vlgmr.msra.gmra.mrb[44].mxu0 %vm854_vm2, %v2977_v50 }
 0xd1b   :  { %4909 = vmatpush3.bf16.xpose.msra.mxu0 %v3229_v54  ;;  %4910 = vmatprep.mubr.msk.bf16.mxu0 %vm5175_vm1, %v5174_v15 }
 0xd1c   :  { %4905 = vmatmul.mubr.msk.bf16.vlgmr.msra.gmra.mrb[48].mxu1 %vm854_vm2, %v2980_v55  ;;  %4920 = vmatprep.subr.bf16.mxu0 %v5174_v15 }
 0xd1d   :  { %4915 = vmatpush3.bf16.xpose.msra.mxu1 %v3275_v61  ;;  %4916 = vmatprep.mubr.msk.bf16.mxu1 %vm5175_vm1, %v5174_v15 }
 0xd1e   :  { %4926 = vmatprep.subr.bf16.mxu1 %v5174_v15 }
 0xd22   :  { %4911 = vmatmul.mubr.msk.bf16.vlgmr.msra.gmra.mrb[48].mxu0 %vm854_vm2, %v3007_v7 }
 0xd23   :  { %4921 = vmatpush3.bf16.xpose.msra.mxu0 %v3321_v33  ;;  %4922 = vmatprep.mubr.msk.bf16.mxu0 %vm5175_vm1, %v5174_v15 }
 0xd24   :  { %4917 = vmatmul.mubr.msk.bf16.vlgmr.msra.gmra.mrb[52].mxu1 %vm854_vm2, %v3010_v11  ;;  %4932 = vmatprep.subr.bf16.mxu0 %v5174_v15 }
 0xd25   :  { %4927 = vmatpush3.bf16.xpose.msra.mxu1 %v3367_v12  ;;  %4928 = vmatprep.mubr.msk.bf16.mxu1 %vm5175_vm1, %v5174_v15  ;;  %v5147_v12 = vld [vmem:[%s6136_s1 + $0x6] ss:$0 sm:$0xff] }
 0xd26   :  { %4938 = vmatprep.subr.bf16.mxu1 %v5174_v15 }
 0xd2a   :  { %4923 = vmatmul.mubr.msk.bf16.vlgmr.msra.gmra.mrb[52].mxu0 %vm854_vm2, %v3013_v56 }
 0xd2b   :  { %4934 = vmatprep.mubr.msk.bf16.mxu0 %vm5175_vm1, %v5174_v15 }
 0xd2c   :  { %4929 = vmatmul.mubr.msk.bf16.vlgmr.msra.gmra.mrb[56].mxu1 %vm854_vm2, %v3016_v21  ;;  %v5148_v21 = vld [vmem:[%s6136_s1 + $0x7] ss:$0 sm:$0xff] }
 0xd2d   :  { %4940 = vmatprep.mubr.msk.bf16.mxu1 %vm5175_vm1, %v5174_v15 }
 0xde5   :  { %v3081_v22 = vpop.f32.mrb[40].mxu0 }
 0xde6   :  { %v5834_v26 = vadd.f32 %v5141_v13, %v3081_v22  ;;  %v4888_v28 = vpop.f32.mrb[41].mxu0 }
 0xde7   :  { %v3084_v31 = vpop.f32.mrb[42].mxu0  ;;  %v3127_v32 = vpop.f32.mrb[44].mxu1 }
 0xde8   :  { %v5839_v58 = vadd.f32 %v5142_v19, %v3127_v32  ;;  %v4889_v62 = vpop.f32.mrb[43].mxu0  ;;  %v4894_v34 = vpop.f32.mrb[45].mxu1  ;;  %v3409_v38 = vsel %vm854_vm2, %v5834_v26, -inf }
 0xde9   :  { %3410 = vmax.xlane.f32.xlu1 %v3409_v38  ;;  %v3130_v23 = vpop.f32.mrb[46].mxu1 }
 0xdea   :  { %v4895_v29 = vpop.f32.mrb[47].mxu1  ;;  %v3412_v39 = vsel %vm854_vm2, %v5839_v58, -inf }
 0xdeb   :  { %3413 = vmax.xlane.f32.xlu0 %v3412_v39 }
 0xded   :  { %v3173_v40 = vpop.f32.mrb[44].mxu0 }
 0xdee   :  { %v5848_v43 = vadd.f32 %v5143_v60, %v3173_v40  ;;  %v4900_v36 = vpop.f32.mrb[45].mxu0 }
 0xdef   :  { %v3176_v37 = vpop.f32.mrb[46].mxu0  ;;  %v3219_v44 = vpop.f32.mrb[48].mxu1 }
 0xdf0   :  { %v5853_v48 = vadd.f32 %v5144_v45, %v3219_v44  ;;  %v4901_v49 = vpop.f32.mrb[47].mxu0  ;;  %v4906_v50 = vpop.f32.mrb[49].mxu1  ;;  %v3415_v51 = vsel %vm854_vm2, %v5848_v43, -inf }
 0xdf1   :  { %3416 = vmax.xlane.f32.xlu0 %v3415_v51  ;;  %v3222_v52 = vpop.f32.mrb[50].mxu1 }
 0xdf2   :  { %v4907_v53 = vpop.f32.mrb[51].mxu1  ;;  %v3418_v54 = vsel %vm854_vm2, %v5853_v48, -inf }
 0xdf5   :  { %v3265_v55 = vpop.f32.mrb[48].mxu0  ;;  %3419 = vmax.xlane.f32.xlu0 %v3418_v54 }
 0xdf6   :  { %v3266_v57 = vadd.f32 %v5145_v42, %v3265_v55  ;;  %v4912_v61 = vpop.f32.mrb[49].mxu0 }
 0xdf7   :  { %v3268_v0 = vpop.f32.mrb[50].mxu0  ;;  %v3311_v1 = vpop.f32.mrb[52].mxu1 }
 0xdf8   :  { %v3312_v3 = vadd.f32 %v5146_v5, %v3311_v1  ;;  %v4913_v4 = vpop.f32.mrb[51].mxu0  ;;  %v4918_v7 = vpop.f32.mrb[53].mxu1  ;;  %v3421_v8 = vsel %vm854_vm2, %v3266_v57, -inf }
 0xdf9   :  { %3422 = vmax.xlane.f32.xlu1 %v3421_v8  ;;  %v3314_v9 = vpop.f32.mrb[54].mxu1 }
 0xdfa   :  { %v4919_v33 = vpop.f32.mrb[55].mxu1  ;;  %v3424_v11 = vsel %vm854_vm2, %v3312_v3, -inf }
 0xdfb   :  { %3425 = vmax.xlane.f32.xlu0 %v3424_v11 }
 0xdfd   :  { %v3357_v6 = vpop.f32.mrb[52].mxu0 }
 0xdfe   :  { %v3358_v17 = vadd.f32 %v5147_v12, %v3357_v6  ;;  %v4924_v35 = vpop.f32.mrb[53].mxu0 }
 0xdff   :  { %v3360_v56 = vpop.f32.mrb[54].mxu0  ;;  %v3403_v20 = vpop.f32.mrb[56].mxu1 }
 0xe00   :  { %v3404_v22 = vadd.f32 %v5148_v21, %v3403_v20  ;;  %v4925_v13 = vpop.f32.mrb[55].mxu0  ;;  %v4930_v28 = vpop.f32.mrb[57].mxu1  ;;  %v3427_v31 = vsel %vm854_vm2, %v3358_v17, -inf }
 0xe01   :  { %3428 = vmax.xlane.f32.xlu1 %v3427_v31  ;;  %v3406_v32 = vpop.f32.mrb[58].mxu1 }
 0xe02   :  { %v4931_v19 = vpop.f32.mrb[59].mxu1  ;;  %v3430_v62 = vsel %vm854_vm2, %v3404_v22, -inf }
 0xe03   :  { %3431 = vmax.xlane.f32.xlu0 %v3430_v62 }
 0xe12   :  { %2409 = vrot.lane.b32.xlu1 %v5733_v2, %s5186_s26 }
 0xe76   :  { %v3411_v34 = vpop.xlane.xlu1 %3410 }
 0xe77   :  { %v3433_v38 = vsub.f32 %v5834_v26, %v3411_v34 }
 0xe78   :  { %v3414_v23 = vpop.xlane.xlu0 %3413 }
 0xe79   :  { %v3441_v29 = vmul.f32 1.442695, %v3433_v38  ;;  %v3434_v39 = vsub.f32 %v5839_v58, %v3414_v23 }
 0xe7b   :  { %5096 = vpow2.f32 %v3441_v29  ;;  %v3443_v40 = vmul.f32 1.442695, %v3434_v39 }
 0xe7d   :  { %5098 = vpow2.f32 %v3443_v40 }
 0xe7e   :  { %v3417_v26 = vpop.xlane.xlu0 %3416 }
 0xe7f   :  { %v3435_v50 = vsub.f32 %v5848_v43, %v3417_v26 }
 0xe81   :  { %v3445_v55 = vmul.f32 1.442695, %v3435_v50 }
 0xe82   :  { %v3420_v58 = vpop.xlane.xlu0 %3419 }
 0xe83   :  { %v3436_v49 = vsub.f32 %v5853_v48, %v3420_v58 }
 0xe85   :  { %v5879_v60 = vpop.eup %5096  ;;  %v3447_v52 = vmul.f32 1.442695, %v3436_v49 }
 0xe86   :  { %v3457_v36 = vsel %vm854_vm2, %v5879_v60, 0.0  ;;  %v3423_v45 = vpop.xlane.xlu1 %3422 }
 0xe87   :  { %v5883_v37 = vpop.eup %5098  ;;  %3458 = vadd.xlane.f32.xlu1 %v3457_v36  ;;  %v3437_v53 = vsub.f32 %v3266_v57, %v3423_v45  ;;  %5100 = vpow2.f32 %v3447_v52 }
 0xe88   :  { %v3460_v44 = vsel %vm854_vm2, %v5883_v37, 0.0  ;;  %v3426_v54 = vpop.xlane.xlu0 %3425  ;;  %5102 = vpow2.f32 %v3445_v55 }
 0xe89   :  { %3461 = vadd.xlane.f32.xlu0 %v3460_v44  ;;  %v3449_v61 = vmul.f32 1.442695, %v3437_v53  ;;  %v3438_v0 = vsub.f32 %v3312_v3, %v3426_v54 }
 0xe8b   :  { %5104 = vpow2.f32 %v3449_v61 }
 0xe8e   :  { %v3429_v51 = vpop.xlane.xlu1 %3428 }
 0xe8f   :  { %v3439_v42 = vsub.f32 %v3358_v17, %v3429_v51 }
 0xe90   :  { %v3432_v1 = vpop.xlane.xlu0 %3431 }
 0xe91   :  { %v3453_v5 = vmul.f32 1.442695, %v3439_v42  ;;  %v3440_v4 = vsub.f32 %v3404_v22, %v3432_v1  ;;  %v5895_v7 = vpop.eup %5100 }
 0xe92   :  { %v5897_v43 = vpop.eup %5102  ;;  %v3466_v57 = vsel %vm854_vm2, %v5895_v7, 0.0  ;;  %v2410_v56 = vpop.permute.xlu1 %2409 }
 0xe93   :  { %5106 = vpow2.f32 %v3453_v5  ;;  %v3455_v48 = vmul.f32 1.442695, %v3440_v4  ;;  %v3463_v3 = vsel %vm854_vm2, %v5897_v43, 0.0  ;;  %v2453_v19 = vshrl.u32 %v2410_v56, 16 }
 0xe95   :  { %v5901_v8 = vpop.eup %5104 }
 0xe96   :  { %v3469_v33 = vsel %vm854_vm2, %v5901_v8, 0.0 }
 0xe98   :  { %2413 = vrot.lane.b32.xlu1 %v5733_v2, %s5187_s27 }
 0xe9c   :  { %2415 = vrot.lane.b32.xlu1 %v5733_v2, %s5188_s28 }
 0xe9d   :  { %v5905_v9 = vpop.eup %5106 }
 0xe9e   :  { %v3475_v6 = vsel %vm854_vm2, %v5905_v9, 0.0 }
 0xe9f   :  { %2411 = vrot.lane.b32.xlu0 %v5733_v2, %s5189_s29  ;;  %v3451_v2 = vmul.f32 1.442695, %v3438_v0 }
 0xea1   :  { %5108 = vpow2.f32 %v3451_v2 }
 0xea2   :  { %5110 = vpow2.f32 %v3455_v48 }
 0xeab   :  { %v5909_v11 = vpop.eup %5108 }
 0xeac   :  { %v3472_v12 = vsel %vm854_vm2, %v5909_v11, 0.0  ;;  %v5915_v17 = vpop.eup %5110 }
 0xead   :  { %v3478_v35 = vsel %vm854_vm2, %v5915_v17, 0.0 }
 0xebe   :  { %3467 = vadd.xlane.f32.xlu0 %v3466_v57 }
 0xec0   :  { %3464 = vadd.xlane.f32.xlu1 %v3463_v3 }
 0xec2   :  { %3470 = vadd.xlane.f32.xlu0 %v3469_v33 }
 0xec4   :  { %3476 = vadd.xlane.f32.xlu1 %v3475_v6 }
 0xec6   :  { %3473 = vadd.xlane.f32.xlu0 %v3472_v12 }
 0xeca   :  { %3479 = vadd.xlane.f32.xlu0 %v3478_v35 }
 0xf14   :  { %v3459_v20 = vpop.xlane.xlu1 %3458 }
 0xf15   :  { %5112 = vrcp.f32 %v3459_v20 }
 0xf16   :  { %v3462_v21 = vpop.xlane.xlu0 %3461 }
 0xf17   :  { %5114 = vrcp.f32 %v3462_v21 }
 0xf18   :  { %v2414_v22 = vpop.permute.xlu1 %2413 }
 0xf19   :  { %v2461_v34 = vshrl.u32 %v2414_v22, 16 }
 0xf1a   :  { %v2412_v13 = vpop.permute.xlu0 %2411 }
 0xf1b   :  { %v2454_v28 = vshrl.u32 %v2412_v13, 16  ;;  %v5919_v31 = vpack.i.b16 %v2412_v13, %v2410_v56 }
 0xf1c   :  { %v2416_v32 = vpop.permute.xlu1 %2415 }
 0xf1d   :  { %v5921_v62 = vpack.i.b16 %v2416_v32, %v2414_v22  ;;  %v2462_v38 = vshrl.u32 %v2416_v32, 16  ;;  %v2455_v23 = vpack.i.b16 %v2454_v28, %v2453_v19  ;;  %v2504_v29 = vrot.slane %v5919_v31, %v5311_v63 }
 0xf1f   :  { %v2463_v39 = vpack.i.b16 %v2462_v38, %v2461_v34  ;;  %v2519_v40 = vrot.slane %v5921_v62, %v5311_v63  ;;  %v2638_v26 = vrot.slane %v2455_v23, %v5311_v63  ;;  %v5113_v57 = vpop.eup %5112 }
 0xf20   :  { %v3489_v35 = vmul.f32 %v5113_v57, %v5879_v60  ;;  %v2512_v60 = vcombine.high %v5921_v62, %v5518_v59 }
 0xf21   :  { %v2559_v36 = vcombine.low %v2504_v29, %v2519_v40  ;;  %v2560_v44 = vcombine.high %v2504_v29, %v2519_v40  ;;  %v2653_v58 = vrot.slane %v2463_v39, %v5311_v63  ;;  %v5115_v6 = vpop.eup %5114  ;;  %v2646_v28 = vcombine.high %v2463_v39, %v5518_v59 }
 0xf22   :  { %v3490_v13 = vmul.f32 %v5115_v6, %v5883_v37  ;;  %v2631_v40 = vcombine.high %v2455_v23, %v5518_v59  ;;  %v2497_v39 = vcombine.high %v5919_v31, %v5518_v59 }
 0xf23   :  { %v2567_v45 = vrot.slane %v2559_v36, %v5316_v18  ;;  %v2574_v49 = vrot.slane %v2560_v44, %v5316_v18  ;;  %v2693_v50 = vcombine.low %v2638_v26, %v2653_v58  ;;  %v2694_v51 = vcombine.high %v2638_v26, %v2653_v58 }
 0xf24   :  { %v3497_v44 = vpack.c.bf16 %v3489_v35, %v3489_v35  ;;  %v2660_v26 = vrot.slane %v2646_v28, %v5311_v63  ;;  %v3498_v58 = vpack.c.bf16 %v3490_v13, %v3490_v13  ;;  %v2645_v62 = vrot.slane %v2631_v40, %v5311_v63 }
 0xf25   :  { %v4594_v52 = vcombine.low %v2567_v45, %v2574_v49  ;;  %v4596_v53 = vcombine.high %v2567_v45, %v2574_v49  ;;  %v2701_v54 = vrot.slane %v2693_v50, %v5316_v18  ;;  %v2708_v55 = vrot.slane %v2694_v51, %v5316_v18 }
 0xf26   :  { %v2526_v45 = vrot.slane %v2512_v60, %v5311_v63  ;;  %v2511_v31 = vrot.slane %v2497_v39, %v5311_v63  ;;  %v2709_v49 = vcombine.low %v2645_v62, %v2660_v26  ;;  %v2710_v50 = vcombine.high %v2645_v62, %v2660_v26 }
 0xf27   :  { %v2748_v42 = vrot.slane %v4594_v52, %v5311_v63  ;;  %v2764_v61 = vrot.slane %v4596_v53, %v5311_v63  ;;  %v4598_v0 = vcombine.low %v2701_v54, %v2708_v55  ;;  %v4600_v1 = vcombine.high %v2701_v54, %v2708_v55 }
 0xf28   :  { %v2575_v51 = vcombine.low %v2511_v31, %v2526_v45  ;;  %v2576_v52 = vcombine.high %v2511_v31, %v2526_v45  ;;  %v2717_v53 = vrot.slane %v2709_v49, %v5316_v18  ;;  %v2724_v54 = vrot.slane %v2710_v50, %v5316_v18 }
 0xf29   :  { %v2781_v5 = vcombine.low %v2748_v42, %v2764_v61  ;;  %v2807_v2 = vrot.slane %v4598_v0, %v5311_v63  ;;  %v2823_v4 = vrot.slane %v4600_v1, %v5311_v63 }
 0xf2a   :  { %v2583_v55 = vrot.slane %v2575_v51, %v5316_v18  ;;  %v2590_v42 = vrot.slane %v2576_v52, %v5316_v18  ;;  %v4606_v61 = vcombine.low %v2717_v53, %v2724_v54  ;;  %v4608_v0 = vcombine.high %v2717_v53, %v2724_v54 }
 0xf2b   :  { %v2788_v48 = vrot.slane %v2781_v5, %v5316_v18  ;;  %v2840_v3 = vcombine.low %v2807_v2, %v2823_v4 }
 0xf2c   :  { %v4602_v1 = vcombine.low %v2583_v55, %v2590_v42  ;;  %v4604_v5 = vcombine.high %v2583_v55, %v2590_v42  ;;  %v2925_v2 = vrot.slane %v4606_v61, %v5311_v63  ;;  %v2941_v4 = vrot.slane %v4608_v0, %v5311_v63 }
 0xf2d   :  { %v2791_v33 = vcombine.high %v2788_v48, %v5185_v14  ;;  %v2847_v12 = vrot.slane %v2840_v3, %v5316_v18  ;;  %v2996_v20 = vshrl.u32 %v2788_v48, 16 }
 0xf2e   :  { %v2882_v57 = vrot.slane %v4604_v5, %v5311_v63 }
 0xf2f   :  { %v2995_v56 = vpack.i.b16 %v2847_v12, %v2788_v48  ;;  %v2997_v21 = vshrl.u32 %v2847_v12, 16  ;;  %v2850_v22 = vcombine.high %v2847_v12, %v5185_v14  ;;  %v3002_v32 = vshrl.u32 %v2791_v33, 16 }
 0xf30   :  { %v2866_v48 = vrot.slane %v4602_v1, %v5311_v63 }
 0xf31   :  { %v3509_v19 = vsel %vm1322_vm3, %v2995_v56, 0  ;;  %v2998_v34 = vpack.i.b16 %v2997_v21, %v2996_v20  ;;  %v3001_v38 = vpack.i.b16 %v2850_v22, %v2791_v33  ;;  %v3003_v29 = vshrl.u32 %v2850_v22, 16 }
 0xf32   :  { %4933 = vmatpush3.bf16.msra.mxu0 %v3509_v19  ;;  %v2958_v33 = vcombine.low %v2925_v2, %v2941_v4  ;;  %v2899_v12 = vcombine.low %v2866_v48, %v2882_v57 }
 0xf33   :  { %v3555_v36 = vsel %vm1322_vm3, %v2998_v34, 0  ;;  %4944 = vmatprep.subr.bf16.mxu0 %v5174_v15  ;;  %v3004_v37 = vpack.i.b16 %v3003_v29, %v3002_v32  ;;  %v3601_v23 = vsel %vm1322_vm3, %v3001_v38, 0 }
 0xf34   :  { %4939 = vmatpush3.bf16.msra.mxu1 %v3555_v36  ;;  %v2965_v56 = vrot.slane %v2958_v33, %v5316_v18  ;;  %v2906_v20 = vrot.slane %v2899_v12, %v5316_v18 }
 0xf35   :  { %4935 = vmatmul.mubr.msk.bf16.vlgmr.msra.gmra.mrb[56].mxu0 %vm854_vm2, %v3497_v44  ;;  %4950 = vmatprep.subr.bf16.mxu1 %v5174_v15  ;;  %v3647_v59 = vsel %vm1322_vm3, %v3004_v37, 0 }
 0xf36   :  { %4945 = vmatpush3.bf16.msra.mxu0 %v3601_v23  ;;  %4946 = vmatprep.mubr.msk.bf16.mxu0 %vm5175_vm1, %v5174_v15  ;;  %v3033_v22 = vshrl.u32 %v2965_v56, 16  ;;  %v3032_v13 = vshrl.u32 %v2906_v20, 16  ;;  %v2968_v29 = vcombine.high %v2965_v56, %v5185_v14  ;;  %v3031_v44 = vpack.i.b16 %v2965_v56, %v2906_v20 }
 0xf37   :  { %4941 = vmatmul.mubr.msk.bf16.vlgmr.msra.gmra.mrb[60].mxu1 %vm854_vm2, %v3498_v58  ;;  %4956 = vmatprep.subr.bf16.mxu0 %v5174_v15  ;;  %v2909_v37 = vcombine.high %v2906_v20, %v5185_v14 }
 0xf38   :  { %4951 = vmatpush3.bf16.msra.mxu1 %v3647_v59  ;;  %4952 = vmatprep.mubr.msk.bf16.mxu1 %vm5175_vm1, %v5174_v15  ;;  %v3034_v38 = vpack.i.b16 %v3033_v22, %v3032_v13 }
 0xf39   :  { %4962 = vmatprep.subr.bf16.mxu1 %v5174_v15  ;;  %v3038_v58 = vshrl.u32 %v2909_v37, 16  ;;  %v3037_v50 = vpack.i.b16 %v2968_v29, %v2909_v37 }
 0xf3a   :  { %v3739_v39 = vsel %vm1322_vm3, %v3034_v38, 0 }
 0xf4b   :  { %v3468_v3 = vpop.xlane.xlu0 %3467 }
 0xf4c   :  { %5116 = vrcp.f32 %v3468_v3 }
 0xf4d   :  { %v3465_v6 = vpop.xlane.xlu1 %3464 }
 0xf4e   :  { %5118 = vrcp.f32 %v3465_v6 }
 0xf4f   :  { %v3471_v35 = vpop.xlane.xlu0 %3470 }
 0xf50   :  { %5120 = vrcp.f32 %v3471_v35 }
 0xf51   :  { %v3477_v19 = vpop.xlane.xlu1 %3476 }
 0xf53   :  { %v3474_v21 = vpop.xlane.xlu0 %3473 }
 0xf54   :  { %5122 = vrcp.f32 %v3474_v21 }
 0xf56   :  { %v5117_v28 = vpop.eup %5116 }
 0xf57   :  { %v3492_v32 = vmul.f32 %v5117_v28, %v5895_v7  ;;  %v3480_v34 = vpop.xlane.xlu0 %3479  ;;  %v3039_v7 = vshrl.u32 %v2968_v29, 16 }
 0xf58   :  { %v5119_v40 = vpop.eup %5118  ;;  %5124 = vrcp.f32 %v3480_v34 }
 0xf59   :  { %v3491_v60 = vmul.f32 %v5119_v40, %v5897_v43  ;;  %v3500_v36 = vpack.c.bf16 %v3492_v32, %v3492_v32  ;;  %5126 = vrcp.f32 %v3477_v19  ;;  %v3693_v43 = vsel %vm1322_vm3, %v3031_v44, 0 }
 0xf5a   :  { %v5121_v23 = vpop.eup %5120  ;;  %v3040_v31 = vpack.i.b16 %v3039_v7, %v3038_v58 }
 0xf5b   :  { %4953 = vmatmul.mubr.msk.bf16.vlgmr.msra.gmra.mrb[64].mxu1 %vm854_vm2, %v3500_v36  ;;  %v3499_v26 = vpack.c.bf16 %v3491_v60, %v3491_v60  ;;  %v3493_v45 = vmul.f32 %v5121_v23, %v5901_v8 }
 0xf5c   :  { %4963 = vmatpush3.bf16.msra.mxu1 %v3739_v39  ;;  %4964 = vmatprep.mubr.msk.bf16.mxu1 %vm5175_vm1, %v5174_v15  ;;  %v3831_v52 = vsel %vm1322_vm3, %v3040_v31, 0 }
 0xf5d   :  { %4947 = vmatmul.mubr.msk.bf16.vlgmr.msra.gmra.mrb[60].mxu0 %vm854_vm2, %v3499_v26  ;;  %4974 = vmatprep.subr.bf16.mxu1 %v5174_v15  ;;  %v3501_v53 = vpack.c.bf16 %v3493_v45, %v3493_v45 }
 0xf5e   :  { %v5123_v62 = vpop.eup %5122  ;;  %4957 = vmatpush3.bf16.msra.mxu0 %v3693_v43  ;;  %4958 = vmatprep.mubr.msk.bf16.mxu0 %vm5175_vm1, %v5174_v15 }
 0xf5f   :  { %v3494_v59 = vmul.f32 %v5123_v62, %v5909_v11  ;;  %4968 = vmatprep.subr.bf16.mxu0 %v5174_v15  ;;  %v3785_v11 = vsel %vm1322_vm3, %v3037_v50, 0 }
 0xf61   :  { %v3502_v49 = vpack.c.bf16 %v3494_v59, %v3494_v59 }
 0xf62   :  { %v5125_v51 = vpop.eup %5124 }
 0xf63   :  { %4965 = vmatmul.mubr.msk.bf16.vlgmr.msra.gmra.mrb[68].mxu1 %vm854_vm2, %v3502_v49  ;;  %v5127_v54 = vpop.eup %5126  ;;  %v3496_v8 = vmul.f32 %v5125_v51, %v5915_v17 }
 0xf64   :  { %4975 = vmatpush3.bf16.msra.mxu1 %v3831_v52  ;;  %4976 = vmatprep.mubr.msk.bf16.mxu1 %vm5175_vm1, %v5174_v15  ;;  %v3495_v55 = vmul.f32 %v5127_v54, %v5905_v9 }
 0xf65   :  { %4959 = vmatmul.mubr.msk.bf16.vlgmr.msra.gmra.mrb[64].mxu0 %vm854_vm2, %v3501_v53  ;;  %4988 = vmatprep.subr.bf16.mxu1 %v5174_v15  ;;  %v3504_v42 = vpack.c.bf16 %v3496_v8, %v3496_v8 }
 0xf66   :  { %4969 = vmatpush3.bf16.msra.mxu0 %v3785_v11  ;;  %4970 = vmatprep.mubr.msk.bf16.mxu0 %vm5175_vm1, %v5174_v15  ;;  %v3503_v61 = vpack.c.bf16 %v3495_v55, %v3495_v55 }
 0xf67   :  { %4980 = vmatprep.subr.bf16.mxu0 %v5174_v15 }
 0xf6b   :  { %4977 = vmatmul.mubr.msk.bf16.vlgmr.msra.gmra.mrb[72].mxu1 %vm854_vm2, %v3504_v42 }
 0xf6c   :  { %4992 = vmatprep.mubr.msk.bf16.mxu1 %vm5175_vm1, %v5174_v15 }
 0xf6d   :  { %4971 = vmatmul.mubr.msk.bf16.vlgmr.msra.gmra.mrb[68].mxu0 %vm854_vm2, %v3503_v61 }
 0xf6e   :  { %4984 = vmatprep.mubr.msk.bf16.mxu0 %vm5175_vm1, %v5174_v15 }
0x1008   :  { %v3545_v17 = vpop.f32.mrb[56].mxu0 }
0x1009   :  { %v4936_v0 = vpop.f32.mrb[57].mxu0  ;;  %v3873_v33 = vpack.c.bf16 %v3545_v17, %v3545_v17 }
0x100a   :  { %v3548_v1 = vpop.f32.mrb[58].mxu0  ;;  %v3591_v5 = vpop.f32.mrb[60].mxu1 }
0x100b   :  { %v4937_v2 = vpop.f32.mrb[59].mxu0  ;;  %v4942_v9 = vpop.f32.mrb[61].mxu1  ;;  %v3907_v57 = vpack.c.bf16 %v3591_v5, %v3591_v5  ;;  %v3880_v19 = vrot.slane %v3873_v33, %v5311_v63 }
0x100c   :  { %v3594_v4 = vpop.f32.mrb[62].mxu1 }
0x100d   :  { %v4943_v48 = vpop.f32.mrb[63].mxu1  ;;  %v3914_v20 = vrot.slane %v3907_v57, %v5311_v63 }
0x102e   :  { %v3683_v3 = vpop.f32.mrb[64].mxu1 }
0x102f   :  { %v3915_v6 = vpack.c.bf16 %v3683_v3, %v3683_v3  ;;  %v4954_v12 = vpop.f32.mrb[65].mxu1 }
0x1030   :  { %v3637_v35 = vpop.f32.mrb[60].mxu0  ;;  %v3686_v56 = vpop.f32.mrb[66].mxu1 }
0x1031   :  { %v3922_v21 = vrot.slane %v3915_v6, %v5311_v63  ;;  %v3881_v22 = vpack.c.bf16 %v3637_v35, %v3637_v35  ;;  %v4948_v13 = vpop.f32.mrb[61].mxu0  ;;  %v4955_v28 = vpop.f32.mrb[67].mxu1 }
0x1032   :  { %v3640_v32 = vpop.f32.mrb[62].mxu0 }
0x1033   :  { %v3923_v34 = vcombine.low %v3914_v20, %v3922_v21  ;;  %v3924_v38 = vcombine.high %v3914_v20, %v3922_v21  ;;  %v3888_v29 = vrot.slane %v3881_v22, %v5311_v63  ;;  %v4949_v40 = vpop.f32.mrb[63].mxu0 }
0x1035   :  { %v3931_v60 = vrot.slane %v3923_v34, %v5316_v18  ;;  %v3938_v36 = vrot.slane %v3924_v38, %v5316_v18  ;;  %v3889_v44 = vcombine.low %v3880_v19, %v3888_v29  ;;  %v3890_v37 = vcombine.high %v3880_v19, %v3888_v29 }
0x1036   :  { %v3775_v39 = vpop.f32.mrb[68].mxu1 }
0x1037   :  { %v3939_v26 = vcombine.high %v3931_v60, %v5185_v14  ;;  %v4966_v7 = vpop.f32.mrb[69].mxu1  ;;  %v3897_v23 = vrot.slane %v3889_v44, %v5316_v18  ;;  %v3904_v43 = vrot.slane %v3890_v37, %v5316_v18  ;;  %v3940_v45 = vcombine.high %v3938_v36, %v5185_v14 }
0x1038   :  { %v3729_v58 = vpop.f32.mrb[64].mxu0  ;;  %v3778_v62 = vpop.f32.mrb[70].mxu1  ;;  %v4014_v59 = vshrl.u32 %v3931_v60, 16  ;;  %v4030_v31 = vshrl.u32 %v3938_v36, 16  ;;  %v3975_v61 = vpack.c.bf16 %v3775_v39, %v3775_v39 }
0x1039   :  { %v4960_v49 = vpop.f32.mrb[65].mxu0  ;;  %v4967_v50 = vpop.f32.mrb[71].mxu1  ;;  %v3905_v51 = vcombine.high %v3897_v23, %v5185_v14  ;;  %v3906_v52 = vcombine.high %v3904_v43, %v5185_v14  ;;  %v4011_v53 = vpack.i.b16 %v3931_v60, %v3897_v23  ;;  %v4013_v54 = vshrl.u32 %v3897_v23, 16 }
0x103a   :  { %v3732_v8 = vpop.f32.mrb[66].mxu0  ;;  %v4022_v11 = vshrl.u32 %v3939_v26, 16  ;;  %v4027_v55 = vpack.i.b16 %v3938_v36, %v3904_v43  ;;  %v4029_v42 = vshrl.u32 %v3904_v43, 16  ;;  %v4038_v9 = vshrl.u32 %v3940_v45, 16 }
0x103b   :  { %v4961_v17 = vpop.f32.mrb[67].mxu0  ;;  %v4015_v0 = vpack.i.b16 %v4014_v59, %v4013_v54  ;;  %v4019_v1 = vpack.i.b16 %v3939_v26, %v3905_v51  ;;  %v4021_v5 = vshrl.u32 %v3905_v51, 16  ;;  %v4035_v2 = vpack.i.b16 %v3940_v45, %v3906_v52 }
0x103c   :  { %v4031_v4 = vpack.i.b16 %v4030_v31, %v4029_v42  ;;  %v4037_v48 = vshrl.u32 %v3906_v52, 16  ;;  %v4073_v57 = vcombine.low %v4011_v53, %v4027_v55  ;;  %v3941_v33 = vpack.c.bf16 %v3729_v58, %v3729_v58 }
0x103d   :  { %v4023_v3 = vpack.i.b16 %v4022_v11, %v4021_v5  ;;  %v4081_v12 = vcombine.low %v4019_v1, %v4035_v2  ;;  %v3982_v19 = vrot.slane %v3975_v61, %v5311_v63 }
0x103e   :  { %v3867_v6 = vpop.f32.mrb[72].mxu1  ;;  %v4039_v35 = vpack.i.b16 %v4038_v9, %v4037_v48  ;;  %v4123_v21 = vcombine.low %v4015_v0, %v4031_v4  ;;  %v4080_v28 = vrot.slane %v4073_v57, %v5311_v63  ;;  %v3948_v36 = vrot.slane %v3941_v33, %v5311_v63 }
0x103f   :  { %v3983_v56 = vpack.c.bf16 %v3867_v6, %v3867_v6  ;;  %v4978_v20 = vpop.f32.mrb[73].mxu1  ;;  %v4088_v32 = vrot.slane %v4081_v12, %v5311_v63 }
0x1040   :  { %v3821_v22 = vpop.f32.mrb[68].mxu0  ;;  %v3870_v13 = vpop.f32.mrb[74].mxu1  ;;  %v4131_v60 = vcombine.low %v4023_v3, %v4039_v35  ;;  %v4130_v58 = vrot.slane %v4123_v21, %v5311_v63 }
0x1041   :  { %v3990_v34 = vrot.slane %v3983_v56, %v5311_v63  ;;  %v3949_v38 = vpack.c.bf16 %v3821_v22, %v3821_v22  ;;  %v4972_v29 = vpop.f32.mrb[69].mxu0  ;;  %v4979_v40 = vpop.f32.mrb[75].mxu1  ;;  %v4105_v37 = vcombine.low %v4080_v28, %v4088_v32  ;;  %v5041_v28 = vld [vmem:[%s6139_s4 + $0x18] sm:$0xff]  }
0x1042   :  { %v3824_v44 = vpop.f32.mrb[70].mxu0  ;;  %v4138_v43 = vrot.slane %v4131_v60, %v5311_v63 }
0x1043   :  { %v3991_v39 = vcombine.low %v3982_v19, %v3990_v34  ;;  %v3992_v26 = vcombine.high %v3982_v19, %v3990_v34  ;;  %v3956_v7 = vrot.slane %v3949_v38, %v5311_v63  ;;  %v4973_v23 = vpop.f32.mrb[71].mxu0  ;;  %v4112_v34 = vrot.slane %v4105_v37, %v5316_v18 }
0x1044   :  { %v4155_v49 = vcombine.low %v4130_v58, %v4138_v43 }
0x1045   :  { %v3999_v62 = vrot.slane %v3991_v39, %v5316_v18  ;;  %v4006_v45 = vrot.slane %v3992_v26, %v5316_v18  ;;  %v3957_v59 = vcombine.low %v3948_v36, %v3956_v7  ;;  %v3958_v31 = vcombine.high %v3948_v36, %v3956_v7 }
0x1046   :  { %v4162_v36 = vrot.slane %v4155_v49, %v5316_v18 }
0x1047   :  { %v4007_v50 = vcombine.high %v3999_v62, %v5185_v14  ;;  %v3965_v51 = vrot.slane %v3957_v59, %v5316_v18  ;;  %v3972_v52 = vrot.slane %v3958_v31, %v5316_v18  ;;  %v4008_v53 = vcombine.high %v4006_v45, %v5185_v14 }
0x1048   :  { %v4046_v54 = vshrl.u32 %v3999_v62, 16  ;;  %v4062_v17 = vshrl.u32 %v4006_v45, 16 }
0x1049   :  { %v3973_v8 = vcombine.high %v3965_v51, %v5185_v14  ;;  %v3974_v11 = vcombine.high %v3972_v52, %v5185_v14  ;;  %v4043_v55 = vpack.i.b16 %v3999_v62, %v3965_v51  ;;  %v4045_v42 = vshrl.u32 %v3965_v51, 16  ;;  %v5040_v14 = vld [vmem:[%s6139_s4 + $0x10] sm:$0xff]  }
0x104a   :  { %v4054_v61 = vshrl.u32 %v4007_v50, 16  ;;  %v4059_v0 = vpack.i.b16 %v4006_v45, %v3972_v52  ;;  %v4061_v1 = vshrl.u32 %v3972_v52, 16  ;;  %v4070_v48 = vshrl.u32 %v4008_v53, 16  ;;  %4981 = vmatpush3.bf16.msra.mxu0 %v5040_v14  ;;  %v6067_v52 = vld [vmem:[%s6142_s7 + $0x8] sm:$0x3f] }
0x104b   :  { %v4047_v5 = vpack.i.b16 %v4046_v54, %v4045_v42  ;;  %v4051_v2 = vpack.i.b16 %v4007_v50, %v3973_v8  ;;  %v4053_v9 = vshrl.u32 %v3973_v8, 16  ;;  %v4067_v4 = vpack.i.b16 %v4008_v53, %v3974_v11  ;;  %4982 = vmatprep.subr.bf16.mxu0 %v5174_v15 }
0x104c   :  { %v4063_v57 = vpack.i.b16 %v4062_v17, %v4061_v1  ;;  %v4069_v3 = vshrl.u32 %v3974_v11, 16  ;;  %v4089_v33 = vcombine.low %v4043_v55, %v4059_v0  ;;  %v4206_v53 = vrot.slane %v6067_v52, %v5271_v25 }
0x104d   :  { %v4055_v6 = vpack.i.b16 %v4054_v61, %v4053_v9  ;;  %v4097_v12 = vcombine.low %v4051_v2, %v4067_v4 }
0x104e   :  { %v4071_v35 = vpack.i.b16 %v4070_v48, %v4069_v3  ;;  %v4139_v56 = vcombine.low %v4047_v5, %v4063_v57  ;;  %v4096_v20 = vrot.slane %v4089_v33, %v5311_v63  ;;  %4983 = vmatpush3.bf16.msra.mxu0 %v5041_v28 }
0x104f   :  { %v4104_v21 = vrot.slane %v4097_v12, %v5311_v63  ;;  %4996 = vmatprep.subr.bf16.mxu0 %v5174_v15  ;;  %v5043_v12 = vld [vmem:[%s6140_s5 + $0x18] sm:$0xff]  }
0x1050   :  { %v4147_v22 = vcombine.low %v4055_v6, %v4071_v35  ;;  %v4146_v32 = vrot.slane %v4139_v56, %v5311_v63 }
0x1051   :  { %v4113_v13 = vcombine.low %v4096_v20, %v4104_v21 }
0x1052   :  { %v4154_v19 = vrot.slane %v4147_v22, %v5311_v63 }
0x1053   :  { %v4120_v38 = vrot.slane %v4113_v13, %v5316_v18  ;;  %v4293_v13 = vrot.slane %v6067_v52, %v5278_v30 }
0x1054   :  { %v4163_v29 = vcombine.low %v4146_v32, %v4154_v19 }
0x1055   :  { %v4122_v40 = vcombine.high %v4112_v34, %v4120_v38  ;;  %v4121_v60 = vcombine.low %v4112_v34, %v4120_v38 }
0x1056   :  { %v4170_v44 = vrot.slane %v4163_v29, %v5316_v18  ;;  %v4299_v29 = vrot.slane %v6067_v52, %v2114_v47  ;;  %v5046_v47 = vld [vmem:[%s6141_s6 + $0x30] sm:$0xff]  }
0x1057   :  { %v4176_v7 = vshrl.u32 %v4121_v60, 16  ;;  %v4182_v23 = vshrl.u32 %v4122_v40, 16 }
0x1058   :  { %v4172_v39 = vcombine.high %v4162_v36, %v4170_v44  ;;  %v4171_v26 = vcombine.low %v4162_v36, %v4170_v44 }
0x105a   :  { %v4181_v43 = vpack.i.b16 %v4172_v39, %v4122_v40  ;;  %v4177_v63 = vshrl.u32 %v4171_v26, 16  ;;  %v4183_v58 = vshrl.u32 %v4172_v39, 16  ;;  %v4175_v37 = vpack.i.b16 %v4171_v26, %v4121_v60  ;;  %v5044_v39 = vld [vmem:[%s6141_s6 + $0x20] sm:$0xff]   ;;  %v5045_v26 = vld [vmem:[%s6141_s6 + $0x28] sm:$0xff]  }
0x105c   :  { %4187 = vrot.lane.b32.xlu0 %v4181_v43, %s5190_s0  ;;  %v4178_v62 = vpack.i.b16 %v4177_v63, %v4176_v7  ;;  %v4184_v45 = vpack.i.b16 %v4183_v58, %v4182_v23  ;;  %v5047_v7 = vld [vmem:[%s6141_s6 + $0x38] sm:$0xff]   ;;  %v5149_v23 = vld [vmem:[%s6143_s8 + $0x2] sm:$0x3]  ;;  %s5193_s6 = smov [#allocation2]  }
0x105d   :  { %v4311_v43 = vrot.slane %v5149_v23, %v5278_v30  ;;  %s4522_s8 = sshll.u32 %s5193_s6, 4  ;;  %s4523_s8 = int_to_ptr.vmem [resolvable:$true] %s4522_s8 }
0x105e   :  { %4185 = vrot.lane.b32.xlu1 %v4178_v62, %s5191_s13  ;;  %s5150_s18 = scalar_lea.vmem %s4523_s8, 32  ;;  %p5155_p1 = scmp.lt.s32.totalorder %s4523_s8, %s4523_s8 }
0x105f   :  { %p5151_p0 = scmp.ne.s32.totalorder %s4523_s8, %s5150_s18  ;;  %p5156_p2 = scmp.lt.s32.totalorder %s5150_s18, %s5150_s18 }
0x1061   :  { %p5157_p3 = por %p5156_p2, %p5155_p1 }
0x1062   :  { %4189 = vrot.lane.b32.xlu1 %v4184_v45, %s5192_s14 }
0x1063   :  { %p5158_p4 = pnand %p5157_p3, %p5151_p0 }
0x10ce   :  { %v4188_v18 = vpop.permute.xlu0 %4187 }
0x10d0   :  { %v4186_v59 = vpop.permute.xlu1 %4185 }
0x10d1   :  { %v4193_v31 = vsel %vm854_vm2, %v4175_v37, %v4186_v59 }
0x10d2   :  { %v4195_v50 = vsel %vm2009_vm4, %v4193_v31, %v4188_v18 }
0x10d4   :  { %v4190_v49 = vpop.permute.xlu1 %4189 }
0x10d5   :  { %v4197_v51 = vsel %vm2012_vm5, %v4195_v50, %v4190_v49 }
0x10d6   :  { %4985 = vmatmul.mubr.msk.bf16.vlgmr.msra.gmra.mrb[72].mxu0 %vm45_vm0, %v4197_v51 }
0x10d7   :  { %5004 = vmatprep.mubr.msk.bf16.mxu0 %vm5175_vm1, %v5174_v15  ;;  %4997 = vmatpush3.bf16.msra.mxu0 %v5044_v39  ;;  %v4499_v39 = vrot.slane %v6067_v52, %v2313_v16 }
0x10d8   :  { %4998 = vmatprep.subr.bf16.mxu0 %v5174_v15 }
0x10db   :  { %4999 = vmatpush3.bf16.msra.mxu0 %v5045_v26 }
0x10dc   :  { %5000 = vmatprep.subr.bf16.mxu0 %v5174_v15 }
0x10df   :  { %5001 = vmatpush3.bf16.msra.mxu0 %v5046_v47 }
0x10e0   :  { %5002 = vmatprep.subr.bf16.mxu0 %v5174_v15 }
0x10e3   :  { %5003 = vmatpush3.bf16.msra.mxu0 %v5047_v7 }
0x11a9   :  { %v4255_v54 = vpop.f32.mrb[72].mxu0 }
0x11aa   :  { %v4256_v8 = vadd.f32 %v4255_v54, %v4206_v53  ;;  %v4986_v11 = vpop.f32.mrb[73].mxu0 }
0x11ab   :  { %v4258_v55 = vpop.f32.mrb[74].mxu0 }
0x11ac   :  { %v4259_v42 = vadd.f32 %v4258_v55, %v4206_v53  ;;  %v4987_v61 = vpop.f32.mrb[75].mxu0  ;;  %v4262_v17 = vadd.f32 %v4256_v8, %v5720_v10 }
0x11ae   :  { %v4264_v0 = vsel %vm45_vm0, %v4262_v17, 0.0  ;;  %v4263_v1 = vadd.f32 %v4259_v42, %v5722_v27  ;;  %v5042_v27 = vld [vmem:[%s6140_s5 + $0x10] sm:$0xff]  }
0x11af   :  { %4265 = vadd.xlane.f32.xlu1 %v4264_v0  ;;  %4989 = vmatpush3.bf16.msra.mxu1 %v5042_v27 }
0x11b0   :  { %v4267_v5 = vsel %vm45_vm0, %v4263_v1, 0.0  ;;  %4990 = vmatprep.subr.bf16.mxu1 %v5174_v15 }
0x11b1   :  { %4268 = vadd.xlane.f32.xlu0 %v4267_v5 }
0x11b3   :  { %4991 = vmatpush3.bf16.msra.mxu1 %v5043_v12 }
0x123c   :  { %v4266_v2 = vpop.xlane.xlu1 %4265 }
0x123d   :  { %v4270_v9 = vmul.f32 0.03125, %v4266_v2 }
0x123e   :  { %v4269_v4 = vpop.xlane.xlu0 %4268 }
0x123f   :  { %v4272_v25 = vsub.f32 %v4262_v17, %v4270_v9  ;;  %v4271_v48 = vmul.f32 0.03125, %v4269_v4  ;;  %v4399_v9 = vrot.slane %v6067_v52, %v2212_v41 }
0x1241   :  { %v4273_v57 = vsub.f32 %v4263_v1, %v4271_v48  ;;  %v4274_v3 = vmul.f32 %v4272_v25, %v4272_v25 }
0x1243   :  { %v4276_v33 = vsel %vm45_vm0, %v4274_v3, 0.0  ;;  %v4275_v6 = vmul.f32 %v4273_v57, %v4273_v57 }
0x1244   :  { %4277 = vadd.xlane.f32.xlu0 %v4276_v33 }
0x1245   :  { %v4279_v10 = vsel %vm45_vm0, %v4275_v6, 0.0 }
0x1246   :  { %4280 = vadd.xlane.f32.xlu1 %v4279_v10 }
0x12d1   :  { %v4278_v35 = vpop.xlane.xlu0 %4277 }
0x12d2   :  { %v4282_v56 = vmul.f32 0.03125, %v4278_v35 }
0x12d3   :  { %v4281_v14 = vpop.xlane.xlu1 %4280 }
0x12d4   :  { %v4284_v20 = vadd.f32 1e-12, %v4282_v56  ;;  %v4283_v21 = vmul.f32 0.03125, %v4281_v14 }
0x12d6   :  { %5128 = vrsqrt.f32 %v4284_v20  ;;  %v4285_v22 = vadd.f32 1e-12, %v4283_v21 }
0x12d8   :  { %5130 = vrsqrt.f32 %v4285_v22 }
0x12e0   :  { %v5129_v28 = vpop.eup %5128 }
0x12e1   :  { %v4288_v32 = vmul.f32 %v5129_v28, %v4272_v25 }
0x12e2   :  { %v5131_v19 = vpop.eup %5130 }
0x12e3   :  { %v4294_v34 = vmul.f32 %v4293_v13, %v4288_v32  ;;  %v4289_v38 = vmul.f32 %v5131_v19, %v4273_v57 }
0x12e5   :  { %v4295_v40 = vmul.f32 %v4293_v13, %v4289_v38  ;;  %v4300_v60 = vadd.f32 %v4299_v29, %v4294_v34 }
0x12e7   :  { %v4301_v36 = vadd.f32 %v4299_v29, %v4295_v40 }
0x12e9   :  { %v4302_v44 = vpack.c.bf16 %v4301_v36, %v4300_v60 }
0x12eb   :  { %4993 = vmatmul.mubr.msk.bf16.vlgmr.msra.gmra.mrb[76].mxu1 %vm45_vm0, %v4302_v44 }
0x13be   :  { %v4361_v63 = vpop.f32.mrb[76].mxu1 }
0x13bf   :  { %v4362_v58 = vadd.f32 %v4361_v63, %v4311_v43  ;;  %v4994_v37 = vpop.f32.mrb[77].mxu1 }
0x13c0   :  { %v4364_v62 = vpop.f32.mrb[78].mxu1 }
0x13c1   :  { %v4368_v45 = vmul.f32 %v4362_v58, %v4362_v58  ;;  %v4365_v59 = vadd.f32 %v4364_v62, %v4311_v43  ;;  %v4995_v31 = vpop.f32.mrb[79].mxu1  ;;  %v4505_v43 = vrot.slane %v6067_v52, %v2319_v46 }
0x13c3   :  { %v4370_v18 = vmul.f32 %v4368_v45, %v4362_v58  ;;  %v4369_v49 = vmul.f32 %v4365_v59, %v4365_v59 }
0x13c5   :  { %v4372_v50 = vmul.f32 0.044715, %v4370_v18  ;;  %v4371_v51 = vmul.f32 %v4369_v49, %v4365_v59 }
0x13c7   :  { %v4374_v53 = vadd.f32 %v4372_v50, %v4362_v58  ;;  %v4373_v15 = vmul.f32 0.044715, %v4371_v51 }
0x13c9   :  { %v4376_v54 = vmul.f32 0.7978846, %v4374_v53  ;;  %v4375_v8 = vadd.f32 %v4373_v15, %v4365_v59 }
0x13cb   :  { %5132 = vtanh.f32 %v4376_v54  ;;  %v4377_v11 = vmul.f32 0.7978846, %v4375_v8 }
0x13cd   :  { %5134 = vtanh.f32 %v4377_v11 }
0x13d5   :  { %v5133_v55 = vpop.eup %5132 }
0x13d6   :  { %v4380_v30 = vadd.f32 1.0, %v5133_v55 }
0x13d7   :  { %v5135_v42 = vpop.eup %5134 }
0x13d8   :  { %v4382_v61 = vmul.f32 0.5, %v4380_v30  ;;  %v4381_v17 = vadd.f32 1.0, %v5135_v42 }
0x13da   :  { %v4383_v0 = vmul.f32 0.5, %v4381_v17  ;;  %v4384_v1 = vmul.f32 %v4382_v61, %v4362_v58 }
0x13dc   :  { %v4385_v5 = vmul.f32 %v4383_v0, %v4365_v59 }
0x13de   :  { %v4386_v2 = vpack.c.bf16 %v4385_v5, %v4384_v1 }
0x13e0   :  { %5005 = vmatmul.mubr.msk.bf16.vlgmr.msra.gmra.mrb[76].mxu0 %vm2238_vm6, %v4386_v2 }
0x14b3   :  { %v4461_v4 = vpop.f32.mrb[76].mxu0 }
0x14b4   :  { %v4462_v25 = vadd.f32 %v4461_v4, %v4399_v9  ;;  %v5006_v48 = vpop.f32.mrb[77].mxu0 }
0x14b5   :  { %v4464_v57 = vpop.f32.mrb[78].mxu0 }
0x14b6   :  { %v4465_v3 = vadd.f32 %v4464_v57, %v4399_v9  ;;  %v5007_v33 = vpop.f32.mrb[79].mxu0  ;;  %v4468_v6 = vadd.f32 %v4462_v25, %v4300_v60 }
0x14b8   :  { %v4470_v10 = vsel %vm45_vm0, %v4468_v6, 0.0  ;;  %v4469_v27 = vadd.f32 %v4465_v3, %v4301_v36 }
0x14b9   :  { %4471 = vadd.xlane.f32.xlu1 %v4470_v10 }
0x14ba   :  { %v4473_v12 = vsel %vm45_vm0, %v4469_v27, 0.0 }
0x14bb   :  { %4474 = vadd.xlane.f32.xlu0 %v4473_v12 }
0x1546   :  { %v4472_v35 = vpop.xlane.xlu1 %4471 }
0x1547   :  { %v4476_v56 = vmul.f32 0.03125, %v4472_v35 }
0x1548   :  { %v4475_v14 = vpop.xlane.xlu0 %4474 }
0x1549   :  { %v4478_v20 = vsub.f32 %v4468_v6, %v4476_v56  ;;  %v4477_v21 = vmul.f32 0.03125, %v4475_v14 }
0x154b   :  { %v4479_v41 = vsub.f32 %v4469_v27, %v4477_v21  ;;  %v4480_v22 = vmul.f32 %v4478_v20, %v4478_v20 }
0x154d   :  { %v4482_v13 = vsel %vm45_vm0, %v4480_v22, 0.0  ;;  %v4481_v28 = vmul.f32 %v4479_v41, %v4479_v41 }
0x154e   :  { %4483 = vadd.xlane.f32.xlu1 %v4482_v13 }
0x154f   :  { %v4485_v32 = vsel %vm45_vm0, %v4481_v28, 0.0 }
0x1550   :  { %4486 = vadd.xlane.f32.xlu0 %v4485_v32 }
0x15db   :  { %v4484_v19 = vpop.xlane.xlu1 %4483 }
0x15dc   :  { %v4488_v34 = vmul.f32 0.03125, %v4484_v19 }
0x15dd   :  { %v4487_v38 = vpop.xlane.xlu0 %4486 }
0x15de   :  { %v4490_v29 = vadd.f32 1e-12, %v4488_v34  ;;  %v4489_v40 = vmul.f32 0.03125, %v4487_v38 }
0x15e0   :  { %5136 = vrsqrt.f32 %v4490_v29  ;;  %v4491_v60 = vadd.f32 1e-12, %v4489_v40 }
0x15e2   :  { %5138 = vrsqrt.f32 %v4491_v60 }
0x15ea   :  { %v5137_v36 = vpop.eup %5136 }
0x15eb   :  { %v4494_v44 = vmul.f32 %v5137_v36, %v4478_v20 }
0x15ec   :  { %v5139_v26 = vpop.eup %5138 }
0x15ed   :  { %v4495_v47 = vmul.f32 %v5139_v26, %v4479_v41  ;;  %v4500_v7 = vmul.f32 %v4499_v39, %v4494_v44 }
0x15ef   :  { %v4501_v23 = vmul.f32 %v4499_v39, %v4495_v47  ;;  %v4506_v58 = vadd.f32 %v4505_v43, %v4500_v7 }
0x15f1   :  { %v4507_v63 = vadd.f32 %v4505_v43, %v4501_v23 }
0x15f3   :  { %v4510_v37 = vrot.slane %v4507_v63, 7 }
0x15f5   :  { %v4512_v62 = vsel %vm4511_vm7, %v4510_v37, %v4506_v58 }
0x15f6   :  { %4515 = vst.msk [vmem:[#allocation2] sm:$0x3] %vm4514_vm8, %v4512_v62 }
0x15f7   :  { %5161 = shalt.err (!%p5158_p4)
}
0x15f8   :  { %s5162_s11 = scalar_lea.hbm %s6144_s9, 32 }
0x15f9   :  { %p5163_p5 = scmp.ne.s32.totalorder %s6144_s9, %s5162_s11  ;;  %p5166_p6 = scmp.lt.u32.totalorder %s5162_s11, %s6144_s9 }
0x15fb   :  { %p5168_p7 = pnand %p5166_p6, %p5163_p5 }
0x15fd   :  { %5171 = shalt.err (!%p5168_p7)
}
0x15fe   :  { %4525 = dma.vmem_to_hbm [thread:$0]  %s4523_s8, 32, %s6144_s9, [#allocation3]  }
0x15ff   :  { %5172 = dma.done.wait [#allocation3], 32  }
0x1600   :  { %5173 = vsyncadd [#allocation3], 4294967264 }
0x1601   :  { %4529 = vsyncpa [#allocation3], 1 }

</bundles_post_ra>
